<compile_context>
chip_gen: v7x
topology: tpu7x:2x2x1
jax: 0.10.0
libtpu: 0.0.40
codegen_flags: <defaults>
</compile_context>

<pallas_src>
import functools
import math

import jax
import jax.numpy as jnp
from jax.experimental import pallas as pl
from jax.experimental.pallas import tpu as pltpu

# ---------------- small BERT config (synthetic, deterministic) ----------------
HIDDEN = 128
NUM_LAYERS = 2
NUM_HEADS = 2
HEAD_DIM = HIDDEN // NUM_HEADS
INTERMEDIATE = 512
VOCAB = 64
MAX_POS = 16
NUM_LABELS = 4
LN_EPS = 1e-12
BATCH = 2
SEQ = 8

HEAD_SLOT = 128                       # each head's Q/K/V slot padded to 128 lanes
QKV_WIDTH = NUM_HEADS * 3 * HEAD_SLOT  # fused, padded QKV projection width
WO_ROWS = NUM_HEADS * HEAD_SLOT        # padded W_o row count
CLS_PAD = 128                          # classifier output padded to 128 lanes
ROW_PAD = 8                            # logits rows padded to a full sublane tile


def _is_v7x():
    try:
        return "v7" in jax.devices()[0].device_kind.lower()
    except Exception:  # pragma: no cover - conservative fallback
        return False


# ------------------------------- fused kernel ---------------------------------
def _erf_gelu(x):
    """Exact (erf-based) BERT GELU in f32 (A&S 7.1.26, |err| < 2e-7)."""
    z = x * (1.0 / math.sqrt(2.0))
    az = jnp.abs(z)
    t = 1.0 / (1.0 + 0.3275911 * az)
    poly = ((((1.061405429 * t - 1.453152027) * t + 1.421413741) * t
             - 0.284496736) * t + 0.254829592) * t
    erf_az = 1.0 - poly * jnp.exp(-az * az)
    erf_z = jnp.where(z >= 0.0, erf_az, -erf_az)
    return 0.5 * x * (1.0 + erf_z)


def _bert_forward_kernel(
    # activations / mask
    word_ref, pos_ref, typ_ref, mask_ref,
    # embedding LayerNorm
    emb_ln_g_ref, emb_ln_b_ref,
    # encoder weights, stacked on a leading NUM_LAYERS axis
    wqkv_ref, bqkv_ref, wo_ref, bo_ref,
    wi_ref, bi_ref, wf_ref, bf_ref,
    ln1_g_ref, ln1_b_ref, ln2_g_ref, ln2_b_ref,
    # pooler + classifier
    wp_ref, bp_ref, wc_ref, bc_ref,
    # output
    logits_ref,
    *, batch, seq, grid_mode,
):
    scale = 1.0 / math.sqrt(HEAD_DIM)

    def layernorm(x, g, b):
        mu = jnp.mean(x, axis=-1, keepdims=True)
        d = x - mu
        var = jnp.mean(d * d, axis=-1, keepdims=True)
        return d * jax.lax.rsqrt(var + LN_EPS) * g + b

    def dense(x_f32, w_bf16, b_f32):
        # bf16 MXU operands, f32 accumulation, f32 bias add.
        return jnp.dot(x_f32.astype(jnp.bfloat16), w_bf16,
                       preferred_element_type=jnp.float32) + b_f32

    # ---- fused embedding sum (word + position + token-type) + LayerNorm ----
    pos = pos_ref[...]                                                   # (S, H)
    pos_full = pos if batch == 1 else jnp.concatenate([pos] * batch, axis=0)
    x = layernorm(word_ref[...] + pos_full + typ_ref[...],
                  emb_ln_g_ref[...], emb_ln_b_ref[...])                  # (B*S, H) f32

    # ---- additive attention bias, hoisted & pre-broadcast (once, not per layer) ----
    if grid_mode:
        b0 = pl.program_id(0)
        mask_rows = mask_ref[pl.ds(b0, 1), :]                            # (1, S)
    else:
        mask_rows = mask_ref[...]                                        # (batch, S)
    bias_slabs = [
        jnp.broadcast_to((1.0 - mask_rows[b:b + 1, :]) * (-1e9), (seq, seq))
        for b in range(batch)
    ]

    for l in range(NUM_LAYERS):
        # fused Q|K|V projection into 128-lane-aligned head slots
        qkv = dense(x, wqkv_ref[l], bqkv_ref[l])                         # (B*S, QKV_WIDTH) f32

        ctx_batches = []
        for b in range(batch):
            r0 = b * seq
            # one wide f32->bf16 cast per (batch, layer); 8-row f32 slice is tile-aligned
            qkv_b = qkv[r0:r0 + seq, :].astype(jnp.bfloat16)             # (S, QKV_WIDTH) bf16
            bias_b = bias_slabs[b]
            ctx_heads = []
            for h in range(NUM_HEADS):
                base = h * 3 * HEAD_SLOT
                # full-vreg, 128-lane-aligned slices (zero pad lanes)
                q = qkv_b[:, base:base + HEAD_SLOT]                      # (S, 128)
                k = qkv_b[:, base + HEAD_SLOT:base + 2 * HEAD_SLOT]
                v = qkv_b[:, base + 2 * HEAD_SLOT:base + 3 * HEAD_SLOT]
                # scores = q @ k^T (pad lanes contribute zero)
                s = jax.lax.dot_general(
                    q, k, dimension_numbers=(((1,), (1,)), ((), ())),
                    preferred_element_type=jnp.float32)                  # (S, S)
                s = s * scale + bias_b
                s = s - jnp.max(s, axis=-1, keepdims=True)
                p = jnp.exp(s)
                p = p * pl.reciprocal(jnp.sum(p, axis=-1, keepdims=True),
                                      approx=True)
                ctx_heads.append(jnp.dot(p.astype(jnp.bfloat16), v,
                                         preferred_element_type=jnp.float32))  # (S, 128)
            ctx_batches.append(ctx_heads[0] if NUM_HEADS == 1
                               else jnp.concatenate(ctx_heads, axis=1))  # (S, WO_ROWS)
        ctx_all = (ctx_batches[0] if batch == 1
                   else jnp.concatenate(ctx_batches, axis=0))            # (B*S, WO_ROWS)

        # ONE output projection per layer (W_o pad rows are zero)
        attn = dense(ctx_all, wo_ref[l], bo_ref[l])                      # (B*S, H)
        x = layernorm(attn + x, ln1_g_ref[l], ln1_b_ref[l])

        inter = _erf_gelu(dense(x, wi_ref[l], bi_ref[l]))                # (B*S, I)
        ffn = dense(inter, wf_ref[l], bf_ref[l])
        x = layernorm(ffn + x, ln2_g_ref[l], ln2_b_ref[l])
    # TODO(synk): for NUM_LAYERS >> 2, switch to lax.fori_loop over the stacked
    # layer refs to bound vreg live ranges / compile time.

    # ---- CLS rows via static sublane slices, padded to a full 8-row tile ----
    cls_rows = [x[b * seq:b * seq + 1, :] for b in range(batch)]
    cls_rows += [cls_rows[0]] * (ROW_PAD - batch)
    cls = jnp.concatenate(cls_rows, axis=0)                              # (8, H)

    pooled = jnp.tanh(dense(cls, wp_ref[...], bp_ref[...]))
    # dropout(p=0.1): identity at inference (eval mode)
    logits = dense(pooled, wc_ref[...], bc_ref[...])                     # (8, CLS_PAD)
    logits_ref[...] = logits.astype(logits_ref.dtype)                    # unmasked store


# ------------------------------ parameter setup --------------------------------
def init_params(key):
    def nrm(k, shape):
        return 0.02 * jax.random.normal(k, shape, jnp.float32)

    keys = iter(jax.random.split(key, 12))

    # per-head Q/K/V packed into 128-lane-aligned slots (zero pad lanes)
    wq = nrm(next(keys), (NUM_LAYERS, HIDDEN, HIDDEN))
    wk = nrm(next(keys), (NUM_LAYERS, HIDDEN, HIDDEN))
    wv = nrm(next(keys), (NUM_LAYERS, HIDDEN, HIDDEN))
    wqkv = jnp.zeros((NUM_LAYERS, HIDDEN, QKV_WIDTH), jnp.float32)
    for h in range(NUM_HEADS):
        base = h * 3 * HEAD_SLOT
        src = slice(h * HEAD_DIM, (h + 1) * HEAD_DIM)
        wqkv = wqkv.at[:, :, base:base + HEAD_DIM].set(wq[:, :, src])
        wqkv = wqkv.at[:, :, base + HEAD_SLOT:
                       base + HEAD_SLOT + HEAD_DIM].set(wk[:, :, src])
        wqkv = wqkv.at[:, :, base + 2 * HEAD_SLOT:
                       base + 2 * HEAD_SLOT + HEAD_DIM].set(wv[:, :, src])

    # W_o padded with zero rows so (ctx pad lanes) x (zero rows) is a no-op
    wo_raw = nrm(next(keys), (NUM_LAYERS, HIDDEN, HIDDEN))
    wo = jnp.zeros((NUM_LAYERS, WO_ROWS, HIDDEN), jnp.float32)
    for h in range(NUM_HEADS):
        wo = wo.at[:, h * HEAD_SLOT:h * HEAD_SLOT + HEAD_DIM, :].set(
            wo_raw[:, h * HEAD_DIM:(h + 1) * HEAD_DIM, :])

    p = {
        # embeddings (word gather stays in plain JAX; add happens in-kernel)
        "word_emb": nrm(next(keys), (VOCAB, HIDDEN)),
        "pos_emb": nrm(next(keys), (MAX_POS, HIDDEN)),
        "type_emb": nrm(next(keys), (2, HIDDEN)),
        "emb_ln_g": jnp.ones((1, HIDDEN), jnp.float32),
        "emb_ln_b": jnp.zeros((1, HIDDEN), jnp.float32),
        # encoder weights stacked on a leading NUM_LAYERS axis (bf16 matmul wts)
        "wqkv": wqkv.astype(jnp.bfloat16),
        "bqkv": jnp.zeros((NUM_LAYERS, 1, QKV_WIDTH), jnp.float32),
        "wo": wo.astype(jnp.bfloat16),
        "bo": jnp.zeros((NUM_LAYERS, 1, HIDDEN), jnp.float32),
        "wi": nrm(next(keys), (NUM_LAYERS, HIDDEN, INTERMEDIATE)).astype(jnp.bfloat16),
        "bi": jnp.zeros((NUM_LAYERS, 1, INTERMEDIATE), jnp.float32),
        "wf": nrm(next(keys), (NUM_LAYERS, INTERMEDIATE, HIDDEN)).astype(jnp.bfloat16),
        "bf": jnp.zeros((NUM_LAYERS, 1, HIDDEN), jnp.float32),
        "ln1_g": jnp.ones((NUM_LAYERS, 1, HIDDEN), jnp.float32),
        "ln1_b": jnp.zeros((NUM_LAYERS, 1, HIDDEN), jnp.float32),
        "ln2_g": jnp.ones((NUM_LAYERS, 1, HIDDEN), jnp.float32),
        "ln2_b": jnp.zeros((NUM_LAYERS, 1, HIDDEN), jnp.float32),
        # pooler
        "wp": nrm(next(keys), (HIDDEN, HIDDEN)).astype(jnp.bfloat16),
        "bp": jnp.zeros((1, HIDDEN), jnp.float32),
    }
    # classifier, zero-padded to a full 128-lane tile; wrapper slices NUM_LABELS
    wc = nrm(next(keys), (HIDDEN, NUM_LABELS))
    p["wc"] = (jnp.zeros((HIDDEN, CLS_PAD), jnp.float32)
               .at[:, :NUM_LABELS].set(wc)).astype(jnp.bfloat16)
    p["bc"] = jnp.zeros((1, CLS_PAD), jnp.float32)
    return p


# --------------------------------- forward -------------------------------------
def classification_forward(params, input_ids, attention_mask, use_batch_grid=None):
    B, S = input_ids.shape
    assert B <= ROW_PAD

    # data-dependent word-embedding gather stays in plain JAX; the embedding
    # add + LayerNorm and everything after run inside the fused Pallas kernel.
    word = jnp.take(params["word_emb"], input_ids.reshape(-1), axis=0)   # (B*S, H)
    pos = params["pos_emb"][:S]                                          # (S, H)
    typ = params["type_emb"][0:1]                                        # token_type_ids = 0
    mask = attention_mask.astype(jnp.float32)                            # (B, S)

    args = (word, pos, typ, mask,
            params["emb_ln_g"], params["emb_ln_b"],
            params["wqkv"], params["bqkv"], params["wo"], params["bo"],
            params["wi"], params["bi"], params["wf"], params["bf"],
            params["ln1_g"], params["ln1_b"], params["ln2_g"], params["ln2_b"],
            params["wp"], params["bp"], params["wc"], params["bc"])

    if use_batch_grid is None:
        use_batch_grid = _is_v7x() and B > 1

    if not use_batch_grid:
        # v5e / v6e: single TensorCore -> single no-grid invocation; every
        # operand is mapped whole into VMEM (~1.1 MB weights + tiny activations).
        kernel = functools.partial(_bert_forward_kernel,
                                   batch=B, seq=S, grid_mode=False)
        logits_pad = pl.pallas_call(
            kernel,
            out_shape=jax.ShapeDtypeStruct((ROW_PAD, CLS_PAD), jnp.float32),
        )(*args)
        return logits_pad[:B, :NUM_LABELS]

    # v7x: 2 TensorCores/chip -> shard the batch across cores with a
    # "parallel" grid axis; weights are mapped whole with a constant index_map.
    def whole(a):
        nd = a.ndim
        return pl.BlockSpec(a.shape, lambda i, _nd=nd: (0,) * _nd)

    kernel = functools.partial(_bert_forward_kernel,
                               batch=1, seq=S, grid_mode=True)
    in_specs = [
        pl.BlockSpec((S, HIDDEN), lambda i: (i, 0)),      # word: one batch per step
        whole(pos), whole(typ), whole(mask),
        whole(params["emb_ln_g"]), whole(params["emb_ln_b"]),
        whole(params["wqkv"]), whole(params["bqkv"]),
        whole(params["wo"]), whole(params["bo"]),
        whole(params["wi"]), whole(params["bi"]),
        whole(params["wf"]), whole(params["bf"]),
        whole(params["ln1_g"]), whole(params["ln1_b"]),
        whole(params["ln2_g"]), whole(params["ln2_b"]),
        whole(params["wp"]), whole(params["bp"]),
        whole(params["wc"]), whole(params["bc"]),
    ]
    logits_pad = pl.pallas_call(
        kernel,
        grid=(B,),
        in_specs=in_specs,
        out_specs=pl.BlockSpec((ROW_PAD, CLS_PAD), lambda i: (i, 0)),
        out_shape=jax.ShapeDtypeStruct((B * ROW_PAD, CLS_PAD), jnp.float32),
        compiler_params=pltpu.CompilerParams(dimension_semantics=("parallel",)),
    )(*args)
    return logits_pad.reshape(B, ROW_PAD, CLS_PAD)[:, 0, :NUM_LABELS]


# ----------------------------------- main ---------------------------------------
if __name__ == "__main__":
    key = jax.random.PRNGKey(0)
    k_param, k_ids = jax.random.split(key)

    params = init_params(k_param)
    input_ids = jax.random.randint(k_ids, (BATCH, SEQ), 0, VOCAB, dtype=jnp.int32)
    attention_mask = jnp.ones((BATCH, SEQ), jnp.int32)
    attention_mask = attention_mask.at[1, SEQ - 2:].set(0)   # exercise masking

    fwd = jax.jit(classification_forward)
    logits = fwd(params, input_ids, attention_mask)
    jax.block_until_ready(logits)

    assert logits.shape == (BATCH, NUM_LABELS)
    assert bool(jnp.all(jnp.isfinite(logits)))
    print("KERNEL_OK")
</pallas_src>

<mosaic_0001>
module attributes {stable_mosaic.version = 11 : i64} {
  func.func @_bert_forward_kernel(%arg0: memref<16x128xf32, #tpu.memory_space<vmem>>, %arg1: memref<8x128xf32, #tpu.memory_space<vmem>>, %arg2: memref<1x128xf32, #tpu.memory_space<vmem>>, %arg3: memref<2x8xf32, #tpu.memory_space<vmem>>, %arg4: memref<1x128xf32, #tpu.memory_space<vmem>>, %arg5: memref<1x128xf32, #tpu.memory_space<vmem>>, %arg6: memref<2x128x768xbf16, #tpu.memory_space<vmem>>, %arg7: memref<2x1x768xf32, #tpu.memory_space<vmem>>, %arg8: memref<2x256x128xbf16, #tpu.memory_space<vmem>>, %arg9: memref<2x1x128xf32, #tpu.memory_space<vmem>>, %arg10: memref<2x128x512xbf16, #tpu.memory_space<vmem>>, %arg11: memref<2x1x512xf32, #tpu.memory_space<vmem>>, %arg12: memref<2x512x128xbf16, #tpu.memory_space<vmem>>, %arg13: memref<2x1x128xf32, #tpu.memory_space<vmem>>, %arg14: memref<2x1x128xf32, #tpu.memory_space<vmem>>, %arg15: memref<2x1x128xf32, #tpu.memory_space<vmem>>, %arg16: memref<2x1x128xf32, #tpu.memory_space<vmem>>, %arg17: memref<2x1x128xf32, #tpu.memory_space<vmem>>, %arg18: memref<128x128xbf16, #tpu.memory_space<vmem>>, %arg19: memref<1x128xf32, #tpu.memory_space<vmem>>, %arg20: memref<128x128xbf16, #tpu.memory_space<vmem>>, %arg21: memref<1x128xf32, #tpu.memory_space<vmem>>, %arg22: memref<8x128xf32, #tpu.memory_space<vmem>>) attributes {dimension_semantics = [], scalar_prefetch = 0 : i64, scratch_operands = 0 : i64, tpu.core_type = #tpu.core_type<tc>} {
    %c0 = arith.constant 0 : index
    %c0_0 = arith.constant 0 : index
    %0 = vector.load %arg1[%c0, %c0_0] : memref<8x128xf32, #tpu.memory_space<vmem>>, vector<8x128xf32>
    %1 = tpu.concatenate %0, %0 in 0 : vector<8x128xf32>, vector<8x128xf32> -> vector<16x128xf32>
    %c0_1 = arith.constant 0 : index
    %c0_2 = arith.constant 0 : index
    %2 = vector.load %arg0[%c0_1, %c0_2] : memref<16x128xf32, #tpu.memory_space<vmem>>, vector<16x128xf32>
    %3 = arith.addf %2, %1 : vector<16x128xf32>
    %c0_3 = arith.constant 0 : index
    %c0_4 = arith.constant 0 : index
    %4 = vector.load %arg2[%c0_3, %c0_4] : memref<1x128xf32, #tpu.memory_space<vmem>>, vector<1x128xf32>
    %5 = vector.broadcast %4 : vector<1x128xf32> to vector<16x128xf32>
    %6 = arith.addf %3, %5 : vector<16x128xf32>
    %c0_5 = arith.constant 0 : index
    %c0_6 = arith.constant 0 : index
    %7 = vector.load %arg4[%c0_5, %c0_6] : memref<1x128xf32, #tpu.memory_space<vmem>>, vector<1x128xf32>
    %c0_7 = arith.constant 0 : index
    %c0_8 = arith.constant 0 : index
    %8 = vector.load %arg5[%c0_7, %c0_8] : memref<1x128xf32, #tpu.memory_space<vmem>>, vector<1x128xf32>
    %cst = arith.constant dense<0.000000e+00> : vector<16xf32>
    %9 = vector.multi_reduction <add>, %6, %cst [1] : vector<16x128xf32> to vector<16xf32>
    %10 = vector.shape_cast %9 : vector<16xf32> to vector<16x1xf32>
    %cst_9 = arith.constant 1.280000e+02 : f32
    %11 = vector.broadcast %cst_9 : f32 to vector<16x1xf32>
    %12 = arith.divf %10, %11 : vector<16x1xf32>
    %13 = vector.broadcast %12 : vector<16x1xf32> to vector<16x128xf32>
    %14 = arith.subf %6, %13 : vector<16x128xf32>
    %15 = arith.mulf %14, %14 : vector<16x128xf32>
    %cst_10 = arith.constant dense<0.000000e+00> : vector<16xf32>
    %16 = vector.multi_reduction <add>, %15, %cst_10 [1] : vector<16x128xf32> to vector<16xf32>
    %17 = vector.shape_cast %16 : vector<16xf32> to vector<16x1xf32>
    %cst_11 = arith.constant 1.280000e+02 : f32
    %18 = vector.broadcast %cst_11 : f32 to vector<16x1xf32>
    %19 = arith.divf %17, %18 : vector<16x1xf32>
    %cst_12 = arith.constant 9.99999996E-13 : f32
    %20 = vector.broadcast %cst_12 : f32 to vector<16x1xf32>
    %21 = arith.addf %19, %20 : vector<16x1xf32>
    %22 = math.rsqrt %21 : vector<16x1xf32>
    %23 = vector.broadcast %22 : vector<16x1xf32> to vector<16x128xf32>
    %24 = arith.mulf %14, %23 : vector<16x128xf32>
    %25 = vector.broadcast %7 : vector<1x128xf32> to vector<16x128xf32>
    %26 = arith.mulf %24, %25 : vector<16x128xf32>
    %27 = vector.broadcast %8 : vector<1x128xf32> to vector<16x128xf32>
    %28 = arith.addf %26, %27 : vector<16x128xf32>
    %c0_13 = arith.constant 0 : index
    %c0_14 = arith.constant 0 : index
    %29 = vector.load %arg3[%c0_13, %c0_14] : memref<2x8xf32, #tpu.memory_space<vmem>>, vector<2x8xf32>
    %30 = vector.extract_strided_slice %29 {offsets = [0, 0], sizes = [1, 8], strides = [1, 1]} : vector<2x8xf32> to vector<1x8xf32>
    %cst_15 = arith.constant 1.000000e+00 : f32
    %31 = vector.broadcast %cst_15 : f32 to vector<1x8xf32>
    %32 = arith.subf %31, %30 : vector<1x8xf32>
    %cst_16 = arith.constant -1.000000e+09 : f32
    %33 = vector.broadcast %cst_16 : f32 to vector<1x8xf32>
    %34 = arith.mulf %32, %33 : vector<1x8xf32>
    %35 = vector.shape_cast %34 : vector<1x8xf32> to vector<1x8xf32>
    %36 = vector.broadcast %35 : vector<1x8xf32> to vector<8x8xf32>
    %37 = vector.extract_strided_slice %29 {offsets = [1, 0], sizes = [1, 8], strides = [1, 1]} : vector<2x8xf32> to vector<1x8xf32>
    %cst_17 = arith.constant 1.000000e+00 : f32
    %38 = vector.broadcast %cst_17 : f32 to vector<1x8xf32>
    %39 = arith.subf %38, %37 : vector<1x8xf32>
    %cst_18 = arith.constant -1.000000e+09 : f32
    %40 = vector.broadcast %cst_18 : f32 to vector<1x8xf32>
    %41 = arith.mulf %39, %40 : vector<1x8xf32>
    %42 = vector.shape_cast %41 : vector<1x8xf32> to vector<1x8xf32>
    %43 = vector.broadcast %42 : vector<1x8xf32> to vector<8x8xf32>
    %c0_19 = arith.constant 0 : index
    %c0_20 = arith.constant 0 : index
    %c0_21 = arith.constant 0 : index
    %44 = vector.load %arg6[%c0_19, %c0_20, %c0_21] : memref<2x128x768xbf16, #tpu.memory_space<vmem>>, vector<1x128x768xbf16>
    %45 = vector.shape_cast %44 : vector<1x128x768xbf16> to vector<128x768xbf16>
    %c0_22 = arith.constant 0 : index
    %c0_23 = arith.constant 0 : index
    %c0_24 = arith.constant 0 : index
    %46 = vector.load %arg7[%c0_22, %c0_23, %c0_24] : memref<2x1x768xf32, #tpu.memory_space<vmem>>, vector<1x1x768xf32>
    %47 = vector.shape_cast %46 : vector<1x1x768xf32> to vector<1x768xf32>
    %48 = arith.truncf %28 : vector<16x128xf32> to vector<16x128xbf16>
    %cst_25 = arith.constant dense<0.000000e+00> : vector<16x768xf32>
    %49 = tpu.matmul %48, %45, %cst_25 {dimension_numbers = #tpu.dot_dimension_numbers<[1], [0], [0], [1], [0, 0, 1, 1], [], []>} : vector<16x128xbf16>, vector<128x768xbf16>, vector<16x768xf32> -> vector<16x768xf32>
    %50 = vector.broadcast %47 : vector<1x768xf32> to vector<16x768xf32>
    %51 = arith.addf %49, %50 : vector<16x768xf32>
    %52 = vector.extract_strided_slice %51 {offsets = [0, 0], sizes = [8, 768], strides = [1, 1]} : vector<16x768xf32> to vector<8x768xf32>
    %53 = arith.truncf %52 : vector<8x768xf32> to vector<8x768xbf16>
    %54 = vector.extract_strided_slice %53 {offsets = [0, 0], sizes = [8, 128], strides = [1, 1]} : vector<8x768xbf16> to vector<8x128xbf16>
    %55 = vector.extract_strided_slice %53 {offsets = [0, 128], sizes = [8, 128], strides = [1, 1]} : vector<8x768xbf16> to vector<8x128xbf16>
    %56 = vector.extract_strided_slice %53 {offsets = [0, 256], sizes = [8, 128], strides = [1, 1]} : vector<8x768xbf16> to vector<8x128xbf16>
    %cst_26 = arith.constant dense<0.000000e+00> : vector<8x8xf32>
    %57 = tpu.matmul %54, %55, %cst_26 {dimension_numbers = #tpu.dot_dimension_numbers<[1], [1], [0], [0], [0, 0, 1, 0], [], []>} : vector<8x128xbf16>, vector<8x128xbf16>, vector<8x8xf32> -> vector<8x8xf32>
    %cst_27 = arith.constant 1.250000e-01 : f32
    %58 = vector.broadcast %cst_27 : f32 to vector<8x8xf32>
    %59 = arith.mulf %57, %58 : vector<8x8xf32>
    %60 = arith.addf %59, %36 : vector<8x8xf32>
    %cst_28 = arith.constant dense<0xFF800000> : vector<8xf32>
    %61 = vector.multi_reduction <maximumf>, %60, %cst_28 [1] : vector<8x8xf32> to vector<8xf32>
    %62 = vector.shape_cast %61 : vector<8xf32> to vector<8x1xf32>
    %63 = vector.broadcast %62 : vector<8x1xf32> to vector<8x8xf32>
    %64 = arith.subf %60, %63 : vector<8x8xf32>
    %65 = math.exp %64 : vector<8x8xf32>
    %cst_29 = arith.constant dense<0.000000e+00> : vector<8xf32>
    %66 = vector.multi_reduction <add>, %65, %cst_29 [1] : vector<8x8xf32> to vector<8xf32>
    %67 = vector.shape_cast %66 : vector<8xf32> to vector<8x1xf32>
    %68 = tpu.reciprocal %67 {approx = true} : vector<8x1xf32> -> vector<8x1xf32>
    %69 = vector.broadcast %68 : vector<8x1xf32> to vector<8x8xf32>
    %70 = arith.mulf %65, %69 : vector<8x8xf32>
    %71 = arith.truncf %70 : vector<8x8xf32> to vector<8x8xbf16>
    %cst_30 = arith.constant dense<0.000000e+00> : vector<8x128xf32>
    %72 = tpu.matmul %71, %56, %cst_30 {dimension_numbers = #tpu.dot_dimension_numbers<[1], [0], [0], [1], [0, 0, 1, 1], [], []>} : vector<8x8xbf16>, vector<8x128xbf16>, vector<8x128xf32> -> vector<8x128xf32>
    %73 = vector.extract_strided_slice %53 {offsets = [0, 384], sizes = [8, 128], strides = [1, 1]} : vector<8x768xbf16> to vector<8x128xbf16>
    %74 = vector.extract_strided_slice %53 {offsets = [0, 512], sizes = [8, 128], strides = [1, 1]} : vector<8x768xbf16> to vector<8x128xbf16>
    %75 = vector.extract_strided_slice %53 {offsets = [0, 640], sizes = [8, 128], strides = [1, 1]} : vector<8x768xbf16> to vector<8x128xbf16>
    %cst_31 = arith.constant dense<0.000000e+00> : vector<8x8xf32>
    %76 = tpu.matmul %73, %74, %cst_31 {dimension_numbers = #tpu.dot_dimension_numbers<[1], [1], [0], [0], [0, 0, 1, 0], [], []>} : vector<8x128xbf16>, vector<8x128xbf16>, vector<8x8xf32> -> vector<8x8xf32>
    %cst_32 = arith.constant 1.250000e-01 : f32
    %77 = vector.broadcast %cst_32 : f32 to vector<8x8xf32>
    %78 = arith.mulf %76, %77 : vector<8x8xf32>
    %79 = arith.addf %78, %36 : vector<8x8xf32>
    %cst_33 = arith.constant dense<0xFF800000> : vector<8xf32>
    %80 = vector.multi_reduction <maximumf>, %79, %cst_33 [1] : vector<8x8xf32> to vector<8xf32>
    %81 = vector.shape_cast %80 : vector<8xf32> to vector<8x1xf32>
    %82 = vector.broadcast %81 : vector<8x1xf32> to vector<8x8xf32>
    %83 = arith.subf %79, %82 : vector<8x8xf32>
    %84 = math.exp %83 : vector<8x8xf32>
    %cst_34 = arith.constant dense<0.000000e+00> : vector<8xf32>
    %85 = vector.multi_reduction <add>, %84, %cst_34 [1] : vector<8x8xf32> to vector<8xf32>
    %86 = vector.shape_cast %85 : vector<8xf32> to vector<8x1xf32>
    %87 = tpu.reciprocal %86 {approx = true} : vector<8x1xf32> -> vector<8x1xf32>
    %88 = vector.broadcast %87 : vector<8x1xf32> to vector<8x8xf32>
    %89 = arith.mulf %84, %88 : vector<8x8xf32>
    %90 = arith.truncf %89 : vector<8x8xf32> to vector<8x8xbf16>
    %cst_35 = arith.constant dense<0.000000e+00> : vector<8x128xf32>
    %91 = tpu.matmul %90, %75, %cst_35 {dimension_numbers = #tpu.dot_dimension_numbers<[1], [0], [0], [1], [0, 0, 1, 1], [], []>} : vector<8x8xbf16>, vector<8x128xbf16>, vector<8x128xf32> -> vector<8x128xf32>
    %92 = tpu.concatenate %72, %91 in 1 : vector<8x128xf32>, vector<8x128xf32> -> vector<8x256xf32>
    %93 = vector.extract_strided_slice %51 {offsets = [8, 0], sizes = [8, 768], strides = [1, 1]} : vector<16x768xf32> to vector<8x768xf32>
    %94 = arith.truncf %93 : vector<8x768xf32> to vector<8x768xbf16>
    %95 = vector.extract_strided_slice %94 {offsets = [0, 0], sizes = [8, 128], strides = [1, 1]} : vector<8x768xbf16> to vector<8x128xbf16>
    %96 = vector.extract_strided_slice %94 {offsets = [0, 128], sizes = [8, 128], strides = [1, 1]} : vector<8x768xbf16> to vector<8x128xbf16>
    %97 = vector.extract_strided_slice %94 {offsets = [0, 256], sizes = [8, 128], strides = [1, 1]} : vector<8x768xbf16> to vector<8x128xbf16>
    %cst_36 = arith.constant dense<0.000000e+00> : vector<8x8xf32>
    %98 = tpu.matmul %95, %96, %cst_36 {dimension_numbers = #tpu.dot_dimension_numbers<[1], [1], [0], [0], [0, 0, 1, 0], [], []>} : vector<8x128xbf16>, vector<8x128xbf16>, vector<8x8xf32> -> vector<8x8xf32>
    %cst_37 = arith.constant 1.250000e-01 : f32
    %99 = vector.broadcast %cst_37 : f32 to vector<8x8xf32>
    %100 = arith.mulf %98, %99 : vector<8x8xf32>
    %101 = arith.addf %100, %43 : vector<8x8xf32>
    %cst_38 = arith.constant dense<0xFF800000> : vector<8xf32>
    %102 = vector.multi_reduction <maximumf>, %101, %cst_38 [1] : vector<8x8xf32> to vector<8xf32>
    %103 = vector.shape_cast %102 : vector<8xf32> to vector<8x1xf32>
    %104 = vector.broadcast %103 : vector<8x1xf32> to vector<8x8xf32>
    %105 = arith.subf %101, %104 : vector<8x8xf32>
    %106 = math.exp %105 : vector<8x8xf32>
    %cst_39 = arith.constant dense<0.000000e+00> : vector<8xf32>
    %107 = vector.multi_reduction <add>, %106, %cst_39 [1] : vector<8x8xf32> to vector<8xf32>
    %108 = vector.shape_cast %107 : vector<8xf32> to vector<8x1xf32>
    %109 = tpu.reciprocal %108 {approx = true} : vector<8x1xf32> -> vector<8x1xf32>
    %110 = vector.broadcast %109 : vector<8x1xf32> to vector<8x8xf32>
    %111 = arith.mulf %106, %110 : vector<8x8xf32>
    %112 = arith.truncf %111 : vector<8x8xf32> to vector<8x8xbf16>
    %cst_40 = arith.constant dense<0.000000e+00> : vector<8x128xf32>
    %113 = tpu.matmul %112, %97, %cst_40 {dimension_numbers = #tpu.dot_dimension_numbers<[1], [0], [0], [1], [0, 0, 1, 1], [], []>} : vector<8x8xbf16>, vector<8x128xbf16>, vector<8x128xf32> -> vector<8x128xf32>
    %114 = vector.extract_strided_slice %94 {offsets = [0, 384], sizes = [8, 128], strides = [1, 1]} : vector<8x768xbf16> to vector<8x128xbf16>
    %115 = vector.extract_strided_slice %94 {offsets = [0, 512], sizes = [8, 128], strides = [1, 1]} : vector<8x768xbf16> to vector<8x128xbf16>
    %116 = vector.extract_strided_slice %94 {offsets = [0, 640], sizes = [8, 128], strides = [1, 1]} : vector<8x768xbf16> to vector<8x128xbf16>
    %cst_41 = arith.constant dense<0.000000e+00> : vector<8x8xf32>
    %117 = tpu.matmul %114, %115, %cst_41 {dimension_numbers = #tpu.dot_dimension_numbers<[1], [1], [0], [0], [0, 0, 1, 0], [], []>} : vector<8x128xbf16>, vector<8x128xbf16>, vector<8x8xf32> -> vector<8x8xf32>
    %cst_42 = arith.constant 1.250000e-01 : f32
    %118 = vector.broadcast %cst_42 : f32 to vector<8x8xf32>
    %119 = arith.mulf %117, %118 : vector<8x8xf32>
    %120 = arith.addf %119, %43 : vector<8x8xf32>
    %cst_43 = arith.constant dense<0xFF800000> : vector<8xf32>
    %121 = vector.multi_reduction <maximumf>, %120, %cst_43 [1] : vector<8x8xf32> to vector<8xf32>
    %122 = vector.shape_cast %121 : vector<8xf32> to vector<8x1xf32>
    %123 = vector.broadcast %122 : vector<8x1xf32> to vector<8x8xf32>
    %124 = arith.subf %120, %123 : vector<8x8xf32>
    %125 = math.exp %124 : vector<8x8xf32>
    %cst_44 = arith.constant dense<0.000000e+00> : vector<8xf32>
    %126 = vector.multi_reduction <add>, %125, %cst_44 [1] : vector<8x8xf32> to vector<8xf32>
    %127 = vector.shape_cast %126 : vector<8xf32> to vector<8x1xf32>
    %128 = tpu.reciprocal %127 {approx = true} : vector<8x1xf32> -> vector<8x1xf32>
    %129 = vector.broadcast %128 : vector<8x1xf32> to vector<8x8xf32>
    %130 = arith.mulf %125, %129 : vector<8x8xf32>
    %131 = arith.truncf %130 : vector<8x8xf32> to vector<8x8xbf16>
    %cst_45 = arith.constant dense<0.000000e+00> : vector<8x128xf32>
    %132 = tpu.matmul %131, %116, %cst_45 {dimension_numbers = #tpu.dot_dimension_numbers<[1], [0], [0], [1], [0, 0, 1, 1], [], []>} : vector<8x8xbf16>, vector<8x128xbf16>, vector<8x128xf32> -> vector<8x128xf32>
    %133 = tpu.concatenate %113, %132 in 1 : vector<8x128xf32>, vector<8x128xf32> -> vector<8x256xf32>
    %134 = tpu.concatenate %92, %133 in 0 : vector<8x256xf32>, vector<8x256xf32> -> vector<16x256xf32>
    %c0_46 = arith.constant 0 : index
    %c0_47 = arith.constant 0 : index
    %c0_48 = arith.constant 0 : index
    %135 = vector.load %arg8[%c0_46, %c0_47, %c0_48] : memref<2x256x128xbf16, #tpu.memory_space<vmem>>, vector<1x256x128xbf16>
    %136 = vector.shape_cast %135 : vector<1x256x128xbf16> to vector<256x128xbf16>
    %c0_49 = arith.constant 0 : index
    %c0_50 = arith.constant 0 : index
    %c0_51 = arith.constant 0 : index
    %137 = vector.load %arg9[%c0_49, %c0_50, %c0_51] : memref<2x1x128xf32, #tpu.memory_space<vmem>>, vector<1x1x128xf32>
    %138 = vector.shape_cast %137 : vector<1x1x128xf32> to vector<1x128xf32>
    %139 = arith.truncf %134 : vector<16x256xf32> to vector<16x256xbf16>
    %cst_52 = arith.constant dense<0.000000e+00> : vector<16x128xf32>
    %140 = tpu.matmul %139, %136, %cst_52 {dimension_numbers = #tpu.dot_dimension_numbers<[1], [0], [0], [1], [0, 0, 1, 1], [], []>} : vector<16x256xbf16>, vector<256x128xbf16>, vector<16x128xf32> -> vector<16x128xf32>
    %141 = vector.broadcast %138 : vector<1x128xf32> to vector<16x128xf32>
    %142 = arith.addf %140, %141 : vector<16x128xf32>
    %143 = arith.addf %142, %28 : vector<16x128xf32>
    %c0_53 = arith.constant 0 : index
    %c0_54 = arith.constant 0 : index
    %c0_55 = arith.constant 0 : index
    %144 = vector.load %arg14[%c0_53, %c0_54, %c0_55] : memref<2x1x128xf32, #tpu.memory_space<vmem>>, vector<1x1x128xf32>
    %145 = vector.shape_cast %144 : vector<1x1x128xf32> to vector<1x128xf32>
    %c0_56 = arith.constant 0 : index
    %c0_57 = arith.constant 0 : index
    %c0_58 = arith.constant 0 : index
    %146 = vector.load %arg15[%c0_56, %c0_57, %c0_58] : memref<2x1x128xf32, #tpu.memory_space<vmem>>, vector<1x1x128xf32>
    %147 = vector.shape_cast %146 : vector<1x1x128xf32> to vector<1x128xf32>
    %cst_59 = arith.constant dense<0.000000e+00> : vector<16xf32>
    %148 = vector.multi_reduction <add>, %143, %cst_59 [1] : vector<16x128xf32> to vector<16xf32>
    %149 = vector.shape_cast %148 : vector<16xf32> to vector<16x1xf32>
    %cst_60 = arith.constant 1.280000e+02 : f32
    %150 = vector.broadcast %cst_60 : f32 to vector<16x1xf32>
    %151 = arith.divf %149, %150 : vector<16x1xf32>
    %152 = vector.broadcast %151 : vector<16x1xf32> to vector<16x128xf32>
    %153 = arith.subf %143, %152 : vector<16x128xf32>
    %154 = arith.mulf %153, %153 : vector<16x128xf32>
    %cst_61 = arith.constant dense<0.000000e+00> : vector<16xf32>
    %155 = vector.multi_reduction <add>, %154, %cst_61 [1] : vector<16x128xf32> to vector<16xf32>
    %156 = vector.shape_cast %155 : vector<16xf32> to vector<16x1xf32>
    %cst_62 = arith.constant 1.280000e+02 : f32
    %157 = vector.broadcast %cst_62 : f32 to vector<16x1xf32>
    %158 = arith.divf %156, %157 : vector<16x1xf32>
    %cst_63 = arith.constant 9.99999996E-13 : f32
    %159 = vector.broadcast %cst_63 : f32 to vector<16x1xf32>
    %160 = arith.addf %158, %159 : vector<16x1xf32>
    %161 = math.rsqrt %160 : vector<16x1xf32>
    %162 = vector.broadcast %161 : vector<16x1xf32> to vector<16x128xf32>
    %163 = arith.mulf %153, %162 : vector<16x128xf32>
    %164 = vector.broadcast %145 : vector<1x128xf32> to vector<16x128xf32>
    %165 = arith.mulf %163, %164 : vector<16x128xf32>
    %166 = vector.broadcast %147 : vector<1x128xf32> to vector<16x128xf32>
    %167 = arith.addf %165, %166 : vector<16x128xf32>
    %c0_64 = arith.constant 0 : index
    %c0_65 = arith.constant 0 : index
    %c0_66 = arith.constant 0 : index
    %168 = vector.load %arg10[%c0_64, %c0_65, %c0_66] : memref<2x128x512xbf16, #tpu.memory_space<vmem>>, vector<1x128x512xbf16>
    %169 = vector.shape_cast %168 : vector<1x128x512xbf16> to vector<128x512xbf16>
    %c0_67 = arith.constant 0 : index
    %c0_68 = arith.constant 0 : index
    %c0_69 = arith.constant 0 : index
    %170 = vector.load %arg11[%c0_67, %c0_68, %c0_69] : memref<2x1x512xf32, #tpu.memory_space<vmem>>, vector<1x1x512xf32>
    %171 = vector.shape_cast %170 : vector<1x1x512xf32> to vector<1x512xf32>
    %172 = arith.truncf %167 : vector<16x128xf32> to vector<16x128xbf16>
    %cst_70 = arith.constant dense<0.000000e+00> : vector<16x512xf32>
    %173 = tpu.matmul %172, %169, %cst_70 {dimension_numbers = #tpu.dot_dimension_numbers<[1], [0], [0], [1], [0, 0, 1, 1], [], []>} : vector<16x128xbf16>, vector<128x512xbf16>, vector<16x512xf32> -> vector<16x512xf32>
    %174 = vector.broadcast %171 : vector<1x512xf32> to vector<16x512xf32>
    %175 = arith.addf %173, %174 : vector<16x512xf32>
    %cst_71 = arith.constant 0.707106769 : f32
    %176 = vector.broadcast %cst_71 : f32 to vector<16x512xf32>
    %177 = arith.mulf %175, %176 : vector<16x512xf32>
    %178 = math.absf %177 : vector<16x512xf32>
    %cst_72 = arith.constant 0.327591091 : f32
    %179 = vector.broadcast %cst_72 : f32 to vector<16x512xf32>
    %180 = arith.mulf %179, %178 : vector<16x512xf32>
    %cst_73 = arith.constant 1.000000e+00 : f32
    %181 = vector.broadcast %cst_73 : f32 to vector<16x512xf32>
    %182 = arith.addf %181, %180 : vector<16x512xf32>
    %cst_74 = arith.constant 1.000000e+00 : f32
    %183 = vector.broadcast %cst_74 : f32 to vector<16x512xf32>
    %184 = arith.divf %183, %182 : vector<16x512xf32>
    %cst_75 = arith.constant 1.06140542 : f32
    %185 = vector.broadcast %cst_75 : f32 to vector<16x512xf32>
    %186 = arith.mulf %185, %184 : vector<16x512xf32>
    %cst_76 = arith.constant 1.45315206 : f32
    %187 = vector.broadcast %cst_76 : f32 to vector<16x512xf32>
    %188 = arith.subf %186, %187 : vector<16x512xf32>
    %189 = arith.mulf %188, %184 : vector<16x512xf32>
    %cst_77 = arith.constant 1.42141378 : f32
    %190 = vector.broadcast %cst_77 : f32 to vector<16x512xf32>
    %191 = arith.addf %189, %190 : vector<16x512xf32>
    %192 = arith.mulf %191, %184 : vector<16x512xf32>
    %cst_78 = arith.constant 0.284496725 : f32
    %193 = vector.broadcast %cst_78 : f32 to vector<16x512xf32>
    %194 = arith.subf %192, %193 : vector<16x512xf32>
    %195 = arith.mulf %194, %184 : vector<16x512xf32>
    %cst_79 = arith.constant 0.254829586 : f32
    %196 = vector.broadcast %cst_79 : f32 to vector<16x512xf32>
    %197 = arith.addf %195, %196 : vector<16x512xf32>
    %198 = arith.mulf %197, %184 : vector<16x512xf32>
    %cst_80 = arith.constant 0.000000e+00 : f32
    %199 = vector.broadcast %cst_80 : f32 to vector<16x512xf32>
    %200 = arith.subf %199, %178 : vector<16x512xf32>
    %201 = arith.mulf %200, %178 : vector<16x512xf32>
    %202 = math.exp %201 : vector<16x512xf32>
    %203 = arith.mulf %198, %202 : vector<16x512xf32>
    %cst_81 = arith.constant 1.000000e+00 : f32
    %204 = vector.broadcast %cst_81 : f32 to vector<16x512xf32>
    %205 = arith.subf %204, %203 : vector<16x512xf32>
    %cst_82 = arith.constant 0.000000e+00 : f32
    %206 = vector.broadcast %cst_82 : f32 to vector<16x512xf32>
    %207 = arith.cmpf oge, %177, %206 : vector<16x512xf32>
    %cst_83 = arith.constant 0.000000e+00 : f32
    %208 = vector.broadcast %cst_83 : f32 to vector<16x512xf32>
    %209 = arith.subf %208, %205 : vector<16x512xf32>
    %210 = arith.select %207, %205, %209 : vector<16x512xi1>, vector<16x512xf32>
    %cst_84 = arith.constant 5.000000e-01 : f32
    %211 = vector.broadcast %cst_84 : f32 to vector<16x512xf32>
    %212 = arith.mulf %211, %175 : vector<16x512xf32>
    %cst_85 = arith.constant 1.000000e+00 : f32
    %213 = vector.broadcast %cst_85 : f32 to vector<16x512xf32>
    %214 = arith.addf %213, %210 : vector<16x512xf32>
    %215 = arith.mulf %212, %214 : vector<16x512xf32>
    %c0_86 = arith.constant 0 : index
    %c0_87 = arith.constant 0 : index
    %c0_88 = arith.constant 0 : index
    %216 = vector.load %arg12[%c0_86, %c0_87, %c0_88] : memref<2x512x128xbf16, #tpu.memory_space<vmem>>, vector<1x512x128xbf16>
    %217 = vector.shape_cast %216 : vector<1x512x128xbf16> to vector<512x128xbf16>
    %c0_89 = arith.constant 0 : index
    %c0_90 = arith.constant 0 : index
    %c0_91 = arith.constant 0 : index
    %218 = vector.load %arg13[%c0_89, %c0_90, %c0_91] : memref<2x1x128xf32, #tpu.memory_space<vmem>>, vector<1x1x128xf32>
    %219 = vector.shape_cast %218 : vector<1x1x128xf32> to vector<1x128xf32>
    %220 = arith.truncf %215 : vector<16x512xf32> to vector<16x512xbf16>
    %cst_92 = arith.constant dense<0.000000e+00> : vector<16x128xf32>
    %221 = tpu.matmul %220, %217, %cst_92 {dimension_numbers = #tpu.dot_dimension_numbers<[1], [0], [0], [1], [0, 0, 1, 1], [], []>} : vector<16x512xbf16>, vector<512x128xbf16>, vector<16x128xf32> -> vector<16x128xf32>
    %222 = vector.broadcast %219 : vector<1x128xf32> to vector<16x128xf32>
    %223 = arith.addf %221, %222 : vector<16x128xf32>
    %224 = arith.addf %223, %167 : vector<16x128xf32>
    %c0_93 = arith.constant 0 : index
    %c0_94 = arith.constant 0 : index
    %c0_95 = arith.constant 0 : index
    %225 = vector.load %arg16[%c0_93, %c0_94, %c0_95] : memref<2x1x128xf32, #tpu.memory_space<vmem>>, vector<1x1x128xf32>
    %226 = vector.shape_cast %225 : vector<1x1x128xf32> to vector<1x128xf32>
    %c0_96 = arith.constant 0 : index
    %c0_97 = arith.constant 0 : index
    %c0_98 = arith.constant 0 : index
    %227 = vector.load %arg17[%c0_96, %c0_97, %c0_98] : memref<2x1x128xf32, #tpu.memory_space<vmem>>, vector<1x1x128xf32>
    %228 = vector.shape_cast %227 : vector<1x1x128xf32> to vector<1x128xf32>
    %cst_99 = arith.constant dense<0.000000e+00> : vector<16xf32>
    %229 = vector.multi_reduction <add>, %224, %cst_99 [1] : vector<16x128xf32> to vector<16xf32>
    %230 = vector.shape_cast %229 : vector<16xf32> to vector<16x1xf32>
    %cst_100 = arith.constant 1.280000e+02 : f32
    %231 = vector.broadcast %cst_100 : f32 to vector<16x1xf32>
    %232 = arith.divf %230, %231 : vector<16x1xf32>
    %233 = vector.broadcast %232 : vector<16x1xf32> to vector<16x128xf32>
    %234 = arith.subf %224, %233 : vector<16x128xf32>
    %235 = arith.mulf %234, %234 : vector<16x128xf32>
    %cst_101 = arith.constant dense<0.000000e+00> : vector<16xf32>
    %236 = vector.multi_reduction <add>, %235, %cst_101 [1] : vector<16x128xf32> to vector<16xf32>
    %237 = vector.shape_cast %236 : vector<16xf32> to vector<16x1xf32>
    %cst_102 = arith.constant 1.280000e+02 : f32
    %238 = vector.broadcast %cst_102 : f32 to vector<16x1xf32>
    %239 = arith.divf %237, %238 : vector<16x1xf32>
    %cst_103 = arith.constant 9.99999996E-13 : f32
    %240 = vector.broadcast %cst_103 : f32 to vector<16x1xf32>
    %241 = arith.addf %239, %240 : vector<16x1xf32>
    %242 = math.rsqrt %241 : vector<16x1xf32>
    %243 = vector.broadcast %242 : vector<16x1xf32> to vector<16x128xf32>
    %244 = arith.mulf %234, %243 : vector<16x128xf32>
    %245 = vector.broadcast %226 : vector<1x128xf32> to vector<16x128xf32>
    %246 = arith.mulf %244, %245 : vector<16x128xf32>
    %247 = vector.broadcast %228 : vector<1x128xf32> to vector<16x128xf32>
    %248 = arith.addf %246, %247 : vector<16x128xf32>
    %c1 = arith.constant 1 : index
    %c0_104 = arith.constant 0 : index
    %c0_105 = arith.constant 0 : index
    %249 = vector.load %arg6[%c1, %c0_104, %c0_105] : memref<2x128x768xbf16, #tpu.memory_space<vmem>>, vector<1x128x768xbf16>
    %250 = vector.shape_cast %249 : vector<1x128x768xbf16> to vector<128x768xbf16>
    %c1_106 = arith.constant 1 : index
    %c0_107 = arith.constant 0 : index
    %c0_108 = arith.constant 0 : index
    %251 = vector.load %arg7[%c1_106, %c0_107, %c0_108] : memref<2x1x768xf32, #tpu.memory_space<vmem>>, vector<1x1x768xf32>
    %252 = vector.shape_cast %251 : vector<1x1x768xf32> to vector<1x768xf32>
    %253 = arith.truncf %248 : vector<16x128xf32> to vector<16x128xbf16>
    %cst_109 = arith.constant dense<0.000000e+00> : vector<16x768xf32>
    %254 = tpu.matmul %253, %250, %cst_109 {dimension_numbers = #tpu.dot_dimension_numbers<[1], [0], [0], [1], [0, 0, 1, 1], [], []>} : vector<16x128xbf16>, vector<128x768xbf16>, vector<16x768xf32> -> vector<16x768xf32>
    %255 = vector.broadcast %252 : vector<1x768xf32> to vector<16x768xf32>
    %256 = arith.addf %254, %255 : vector<16x768xf32>
    %257 = vector.extract_strided_slice %256 {offsets = [0, 0], sizes = [8, 768], strides = [1, 1]} : vector<16x768xf32> to vector<8x768xf32>
    %258 = arith.truncf %257 : vector<8x768xf32> to vector<8x768xbf16>
    %259 = vector.extract_strided_slice %258 {offsets = [0, 0], sizes = [8, 128], strides = [1, 1]} : vector<8x768xbf16> to vector<8x128xbf16>
    %260 = vector.extract_strided_slice %258 {offsets = [0, 128], sizes = [8, 128], strides = [1, 1]} : vector<8x768xbf16> to vector<8x128xbf16>
    %261 = vector.extract_strided_slice %258 {offsets = [0, 256], sizes = [8, 128], strides = [1, 1]} : vector<8x768xbf16> to vector<8x128xbf16>
    %cst_110 = arith.constant dense<0.000000e+00> : vector<8x8xf32>
    %262 = tpu.matmul %259, %260, %cst_110 {dimension_numbers = #tpu.dot_dimension_numbers<[1], [1], [0], [0], [0, 0, 1, 0], [], []>} : vector<8x128xbf16>, vector<8x128xbf16>, vector<8x8xf32> -> vector<8x8xf32>
    %cst_111 = arith.constant 1.250000e-01 : f32
    %263 = vector.broadcast %cst_111 : f32 to vector<8x8xf32>
    %264 = arith.mulf %262, %263 : vector<8x8xf32>
    %265 = arith.addf %264, %36 : vector<8x8xf32>
    %cst_112 = arith.constant dense<0xFF800000> : vector<8xf32>
    %266 = vector.multi_reduction <maximumf>, %265, %cst_112 [1] : vector<8x8xf32> to vector<8xf32>
    %267 = vector.shape_cast %266 : vector<8xf32> to vector<8x1xf32>
    %268 = vector.broadcast %267 : vector<8x1xf32> to vector<8x8xf32>
    %269 = arith.subf %265, %268 : vector<8x8xf32>
    %270 = math.exp %269 : vector<8x8xf32>
    %cst_113 = arith.constant dense<0.000000e+00> : vector<8xf32>
    %271 = vector.multi_reduction <add>, %270, %cst_113 [1] : vector<8x8xf32> to vector<8xf32>
    %272 = vector.shape_cast %271 : vector<8xf32> to vector<8x1xf32>
    %273 = tpu.reciprocal %272 {approx = true} : vector<8x1xf32> -> vector<8x1xf32>
    %274 = vector.broadcast %273 : vector<8x1xf32> to vector<8x8xf32>
    %275 = arith.mulf %270, %274 : vector<8x8xf32>
    %276 = arith.truncf %275 : vector<8x8xf32> to vector<8x8xbf16>
    %cst_114 = arith.constant dense<0.000000e+00> : vector<8x128xf32>
    %277 = tpu.matmul %276, %261, %cst_114 {dimension_numbers = #tpu.dot_dimension_numbers<[1], [0], [0], [1], [0, 0, 1, 1], [], []>} : vector<8x8xbf16>, vector<8x128xbf16>, vector<8x128xf32> -> vector<8x128xf32>
    %278 = vector.extract_strided_slice %258 {offsets = [0, 384], sizes = [8, 128], strides = [1, 1]} : vector<8x768xbf16> to vector<8x128xbf16>
    %279 = vector.extract_strided_slice %258 {offsets = [0, 512], sizes = [8, 128], strides = [1, 1]} : vector<8x768xbf16> to vector<8x128xbf16>
    %280 = vector.extract_strided_slice %258 {offsets = [0, 640], sizes = [8, 128], strides = [1, 1]} : vector<8x768xbf16> to vector<8x128xbf16>
    %cst_115 = arith.constant dense<0.000000e+00> : vector<8x8xf32>
    %281 = tpu.matmul %278, %279, %cst_115 {dimension_numbers = #tpu.dot_dimension_numbers<[1], [1], [0], [0], [0, 0, 1, 0], [], []>} : vector<8x128xbf16>, vector<8x128xbf16>, vector<8x8xf32> -> vector<8x8xf32>
    %cst_116 = arith.constant 1.250000e-01 : f32
    %282 = vector.broadcast %cst_116 : f32 to vector<8x8xf32>
    %283 = arith.mulf %281, %282 : vector<8x8xf32>
    %284 = arith.addf %283, %36 : vector<8x8xf32>
    %cst_117 = arith.constant dense<0xFF800000> : vector<8xf32>
    %285 = vector.multi_reduction <maximumf>, %284, %cst_117 [1] : vector<8x8xf32> to vector<8xf32>
    %286 = vector.shape_cast %285 : vector<8xf32> to vector<8x1xf32>
    %287 = vector.broadcast %286 : vector<8x1xf32> to vector<8x8xf32>
    %288 = arith.subf %284, %287 : vector<8x8xf32>
    %289 = math.exp %288 : vector<8x8xf32>
    %cst_118 = arith.constant dense<0.000000e+00> : vector<8xf32>
    %290 = vector.multi_reduction <add>, %289, %cst_118 [1] : vector<8x8xf32> to vector<8xf32>
    %291 = vector.shape_cast %290 : vector<8xf32> to vector<8x1xf32>
    %292 = tpu.reciprocal %291 {approx = true} : vector<8x1xf32> -> vector<8x1xf32>
    %293 = vector.broadcast %292 : vector<8x1xf32> to vector<8x8xf32>
    %294 = arith.mulf %289, %293 : vector<8x8xf32>
    %295 = arith.truncf %294 : vector<8x8xf32> to vector<8x8xbf16>
    %cst_119 = arith.constant dense<0.000000e+00> : vector<8x128xf32>
    %296 = tpu.matmul %295, %280, %cst_119 {dimension_numbers = #tpu.dot_dimension_numbers<[1], [0], [0], [1], [0, 0, 1, 1], [], []>} : vector<8x8xbf16>, vector<8x128xbf16>, vector<8x128xf32> -> vector<8x128xf32>
    %297 = tpu.concatenate %277, %296 in 1 : vector<8x128xf32>, vector<8x128xf32> -> vector<8x256xf32>
    %298 = vector.extract_strided_slice %256 {offsets = [8, 0], sizes = [8, 768], strides = [1, 1]} : vector<16x768xf32> to vector<8x768xf32>
    %299 = arith.truncf %298 : vector<8x768xf32> to vector<8x768xbf16>
    %300 = vector.extract_strided_slice %299 {offsets = [0, 0], sizes = [8, 128], strides = [1, 1]} : vector<8x768xbf16> to vector<8x128xbf16>
    %301 = vector.extract_strided_slice %299 {offsets = [0, 128], sizes = [8, 128], strides = [1, 1]} : vector<8x768xbf16> to vector<8x128xbf16>
    %302 = vector.extract_strided_slice %299 {offsets = [0, 256], sizes = [8, 128], strides = [1, 1]} : vector<8x768xbf16> to vector<8x128xbf16>
    %cst_120 = arith.constant dense<0.000000e+00> : vector<8x8xf32>
    %303 = tpu.matmul %300, %301, %cst_120 {dimension_numbers = #tpu.dot_dimension_numbers<[1], [1], [0], [0], [0, 0, 1, 0], [], []>} : vector<8x128xbf16>, vector<8x128xbf16>, vector<8x8xf32> -> vector<8x8xf32>
    %cst_121 = arith.constant 1.250000e-01 : f32
    %304 = vector.broadcast %cst_121 : f32 to vector<8x8xf32>
    %305 = arith.mulf %303, %304 : vector<8x8xf32>
    %306 = arith.addf %305, %43 : vector<8x8xf32>
    %cst_122 = arith.constant dense<0xFF800000> : vector<8xf32>
    %307 = vector.multi_reduction <maximumf>, %306, %cst_122 [1] : vector<8x8xf32> to vector<8xf32>
    %308 = vector.shape_cast %307 : vector<8xf32> to vector<8x1xf32>
    %309 = vector.broadcast %308 : vector<8x1xf32> to vector<8x8xf32>
    %310 = arith.subf %306, %309 : vector<8x8xf32>
    %311 = math.exp %310 : vector<8x8xf32>
    %cst_123 = arith.constant dense<0.000000e+00> : vector<8xf32>
    %312 = vector.multi_reduction <add>, %311, %cst_123 [1] : vector<8x8xf32> to vector<8xf32>
    %313 = vector.shape_cast %312 : vector<8xf32> to vector<8x1xf32>
    %314 = tpu.reciprocal %313 {approx = true} : vector<8x1xf32> -> vector<8x1xf32>
    %315 = vector.broadcast %314 : vector<8x1xf32> to vector<8x8xf32>
    %316 = arith.mulf %311, %315 : vector<8x8xf32>
    %317 = arith.truncf %316 : vector<8x8xf32> to vector<8x8xbf16>
    %cst_124 = arith.constant dense<0.000000e+00> : vector<8x128xf32>
    %318 = tpu.matmul %317, %302, %cst_124 {dimension_numbers = #tpu.dot_dimension_numbers<[1], [0], [0], [1], [0, 0, 1, 1], [], []>} : vector<8x8xbf16>, vector<8x128xbf16>, vector<8x128xf32> -> vector<8x128xf32>
    %319 = vector.extract_strided_slice %299 {offsets = [0, 384], sizes = [8, 128], strides = [1, 1]} : vector<8x768xbf16> to vector<8x128xbf16>
    %320 = vector.extract_strided_slice %299 {offsets = [0, 512], sizes = [8, 128], strides = [1, 1]} : vector<8x768xbf16> to vector<8x128xbf16>
    %321 = vector.extract_strided_slice %299 {offsets = [0, 640], sizes = [8, 128], strides = [1, 1]} : vector<8x768xbf16> to vector<8x128xbf16>
    %cst_125 = arith.constant dense<0.000000e+00> : vector<8x8xf32>
    %322 = tpu.matmul %319, %320, %cst_125 {dimension_numbers = #tpu.dot_dimension_numbers<[1], [1], [0], [0], [0, 0, 1, 0], [], []>} : vector<8x128xbf16>, vector<8x128xbf16>, vector<8x8xf32> -> vector<8x8xf32>
    %cst_126 = arith.constant 1.250000e-01 : f32
    %323 = vector.broadcast %cst_126 : f32 to vector<8x8xf32>
    %324 = arith.mulf %322, %323 : vector<8x8xf32>
    %325 = arith.addf %324, %43 : vector<8x8xf32>
    %cst_127 = arith.constant dense<0xFF800000> : vector<8xf32>
    %326 = vector.multi_reduction <maximumf>, %325, %cst_127 [1] : vector<8x8xf32> to vector<8xf32>
    %327 = vector.shape_cast %326 : vector<8xf32> to vector<8x1xf32>
    %328 = vector.broadcast %327 : vector<8x1xf32> to vector<8x8xf32>
    %329 = arith.subf %325, %328 : vector<8x8xf32>
    %330 = math.exp %329 : vector<8x8xf32>
    %cst_128 = arith.constant dense<0.000000e+00> : vector<8xf32>
    %331 = vector.multi_reduction <add>, %330, %cst_128 [1] : vector<8x8xf32> to vector<8xf32>
    %332 = vector.shape_cast %331 : vector<8xf32> to vector<8x1xf32>
    %333 = tpu.reciprocal %332 {approx = true} : vector<8x1xf32> -> vector<8x1xf32>
    %334 = vector.broadcast %333 : vector<8x1xf32> to vector<8x8xf32>
    %335 = arith.mulf %330, %334 : vector<8x8xf32>
    %336 = arith.truncf %335 : vector<8x8xf32> to vector<8x8xbf16>
    %cst_129 = arith.constant dense<0.000000e+00> : vector<8x128xf32>
    %337 = tpu.matmul %336, %321, %cst_129 {dimension_numbers = #tpu.dot_dimension_numbers<[1], [0], [0], [1], [0, 0, 1, 1], [], []>} : vector<8x8xbf16>, vector<8x128xbf16>, vector<8x128xf32> -> vector<8x128xf32>
    %338 = tpu.concatenate %318, %337 in 1 : vector<8x128xf32>, vector<8x128xf32> -> vector<8x256xf32>
    %339 = tpu.concatenate %297, %338 in 0 : vector<8x256xf32>, vector<8x256xf32> -> vector<16x256xf32>
    %c1_130 = arith.constant 1 : index
    %c0_131 = arith.constant 0 : index
    %c0_132 = arith.constant 0 : index
    %340 = vector.load %arg8[%c1_130, %c0_131, %c0_132] : memref<2x256x128xbf16, #tpu.memory_space<vmem>>, vector<1x256x128xbf16>
    %341 = vector.shape_cast %340 : vector<1x256x128xbf16> to vector<256x128xbf16>
    %c1_133 = arith.constant 1 : index
    %c0_134 = arith.constant 0 : index
    %c0_135 = arith.constant 0 : index
    %342 = vector.load %arg9[%c1_133, %c0_134, %c0_135] : memref<2x1x128xf32, #tpu.memory_space<vmem>>, vector<1x1x128xf32>
    %343 = vector.shape_cast %342 : vector<1x1x128xf32> to vector<1x128xf32>
    %344 = arith.truncf %339 : vector<16x256xf32> to vector<16x256xbf16>
    %cst_136 = arith.constant dense<0.000000e+00> : vector<16x128xf32>
    %345 = tpu.matmul %344, %341, %cst_136 {dimension_numbers = #tpu.dot_dimension_numbers<[1], [0], [0], [1], [0, 0, 1, 1], [], []>} : vector<16x256xbf16>, vector<256x128xbf16>, vector<16x128xf32> -> vector<16x128xf32>
    %346 = vector.broadcast %343 : vector<1x128xf32> to vector<16x128xf32>
    %347 = arith.addf %345, %346 : vector<16x128xf32>
    %348 = arith.addf %347, %248 : vector<16x128xf32>
    %c1_137 = arith.constant 1 : index
    %c0_138 = arith.constant 0 : index
    %c0_139 = arith.constant 0 : index
    %349 = vector.load %arg14[%c1_137, %c0_138, %c0_139] : memref<2x1x128xf32, #tpu.memory_space<vmem>>, vector<1x1x128xf32>
    %350 = vector.shape_cast %349 : vector<1x1x128xf32> to vector<1x128xf32>
    %c1_140 = arith.constant 1 : index
    %c0_141 = arith.constant 0 : index
    %c0_142 = arith.constant 0 : index
    %351 = vector.load %arg15[%c1_140, %c0_141, %c0_142] : memref<2x1x128xf32, #tpu.memory_space<vmem>>, vector<1x1x128xf32>
    %352 = vector.shape_cast %351 : vector<1x1x128xf32> to vector<1x128xf32>
    %cst_143 = arith.constant dense<0.000000e+00> : vector<16xf32>
    %353 = vector.multi_reduction <add>, %348, %cst_143 [1] : vector<16x128xf32> to vector<16xf32>
    %354 = vector.shape_cast %353 : vector<16xf32> to vector<16x1xf32>
    %cst_144 = arith.constant 1.280000e+02 : f32
    %355 = vector.broadcast %cst_144 : f32 to vector<16x1xf32>
    %356 = arith.divf %354, %355 : vector<16x1xf32>
    %357 = vector.broadcast %356 : vector<16x1xf32> to vector<16x128xf32>
    %358 = arith.subf %348, %357 : vector<16x128xf32>
    %359 = arith.mulf %358, %358 : vector<16x128xf32>
    %cst_145 = arith.constant dense<0.000000e+00> : vector<16xf32>
    %360 = vector.multi_reduction <add>, %359, %cst_145 [1] : vector<16x128xf32> to vector<16xf32>
    %361 = vector.shape_cast %360 : vector<16xf32> to vector<16x1xf32>
    %cst_146 = arith.constant 1.280000e+02 : f32
    %362 = vector.broadcast %cst_146 : f32 to vector<16x1xf32>
    %363 = arith.divf %361, %362 : vector<16x1xf32>
    %cst_147 = arith.constant 9.99999996E-13 : f32
    %364 = vector.broadcast %cst_147 : f32 to vector<16x1xf32>
    %365 = arith.addf %363, %364 : vector<16x1xf32>
    %366 = math.rsqrt %365 : vector<16x1xf32>
    %367 = vector.broadcast %366 : vector<16x1xf32> to vector<16x128xf32>
    %368 = arith.mulf %358, %367 : vector<16x128xf32>
    %369 = vector.broadcast %350 : vector<1x128xf32> to vector<16x128xf32>
    %370 = arith.mulf %368, %369 : vector<16x128xf32>
    %371 = vector.broadcast %352 : vector<1x128xf32> to vector<16x128xf32>
    %372 = arith.addf %370, %371 : vector<16x128xf32>
    %c1_148 = arith.constant 1 : index
    %c0_149 = arith.constant 0 : index
    %c0_150 = arith.constant 0 : index
    %373 = vector.load %arg10[%c1_148, %c0_149, %c0_150] : memref<2x128x512xbf16, #tpu.memory_space<vmem>>, vector<1x128x512xbf16>
    %374 = vector.shape_cast %373 : vector<1x128x512xbf16> to vector<128x512xbf16>
    %c1_151 = arith.constant 1 : index
    %c0_152 = arith.constant 0 : index
    %c0_153 = arith.constant 0 : index
    %375 = vector.load %arg11[%c1_151, %c0_152, %c0_153] : memref<2x1x512xf32, #tpu.memory_space<vmem>>, vector<1x1x512xf32>
    %376 = vector.shape_cast %375 : vector<1x1x512xf32> to vector<1x512xf32>
    %377 = arith.truncf %372 : vector<16x128xf32> to vector<16x128xbf16>
    %cst_154 = arith.constant dense<0.000000e+00> : vector<16x512xf32>
    %378 = tpu.matmul %377, %374, %cst_154 {dimension_numbers = #tpu.dot_dimension_numbers<[1], [0], [0], [1], [0, 0, 1, 1], [], []>} : vector<16x128xbf16>, vector<128x512xbf16>, vector<16x512xf32> -> vector<16x512xf32>
    %379 = vector.broadcast %376 : vector<1x512xf32> to vector<16x512xf32>
    %380 = arith.addf %378, %379 : vector<16x512xf32>
    %cst_155 = arith.constant 0.707106769 : f32
    %381 = vector.broadcast %cst_155 : f32 to vector<16x512xf32>
    %382 = arith.mulf %380, %381 : vector<16x512xf32>
    %383 = math.absf %382 : vector<16x512xf32>
    %cst_156 = arith.constant 0.327591091 : f32
    %384 = vector.broadcast %cst_156 : f32 to vector<16x512xf32>
    %385 = arith.mulf %384, %383 : vector<16x512xf32>
    %cst_157 = arith.constant 1.000000e+00 : f32
    %386 = vector.broadcast %cst_157 : f32 to vector<16x512xf32>
    %387 = arith.addf %386, %385 : vector<16x512xf32>
    %cst_158 = arith.constant 1.000000e+00 : f32
    %388 = vector.broadcast %cst_158 : f32 to vector<16x512xf32>
    %389 = arith.divf %388, %387 : vector<16x512xf32>
    %cst_159 = arith.constant 1.06140542 : f32
    %390 = vector.broadcast %cst_159 : f32 to vector<16x512xf32>
    %391 = arith.mulf %390, %389 : vector<16x512xf32>
    %cst_160 = arith.constant 1.45315206 : f32
    %392 = vector.broadcast %cst_160 : f32 to vector<16x512xf32>
    %393 = arith.subf %391, %392 : vector<16x512xf32>
    %394 = arith.mulf %393, %389 : vector<16x512xf32>
    %cst_161 = arith.constant 1.42141378 : f32
    %395 = vector.broadcast %cst_161 : f32 to vector<16x512xf32>
    %396 = arith.addf %394, %395 : vector<16x512xf32>
    %397 = arith.mulf %396, %389 : vector<16x512xf32>
    %cst_162 = arith.constant 0.284496725 : f32
    %398 = vector.broadcast %cst_162 : f32 to vector<16x512xf32>
    %399 = arith.subf %397, %398 : vector<16x512xf32>
    %400 = arith.mulf %399, %389 : vector<16x512xf32>
    %cst_163 = arith.constant 0.254829586 : f32
    %401 = vector.broadcast %cst_163 : f32 to vector<16x512xf32>
    %402 = arith.addf %400, %401 : vector<16x512xf32>
    %403 = arith.mulf %402, %389 : vector<16x512xf32>
    %cst_164 = arith.constant 0.000000e+00 : f32
    %404 = vector.broadcast %cst_164 : f32 to vector<16x512xf32>
    %405 = arith.subf %404, %383 : vector<16x512xf32>
    %406 = arith.mulf %405, %383 : vector<16x512xf32>
    %407 = math.exp %406 : vector<16x512xf32>
    %408 = arith.mulf %403, %407 : vector<16x512xf32>
    %cst_165 = arith.constant 1.000000e+00 : f32
    %409 = vector.broadcast %cst_165 : f32 to vector<16x512xf32>
    %410 = arith.subf %409, %408 : vector<16x512xf32>
    %cst_166 = arith.constant 0.000000e+00 : f32
    %411 = vector.broadcast %cst_166 : f32 to vector<16x512xf32>
    %412 = arith.cmpf oge, %382, %411 : vector<16x512xf32>
    %cst_167 = arith.constant 0.000000e+00 : f32
    %413 = vector.broadcast %cst_167 : f32 to vector<16x512xf32>
    %414 = arith.subf %413, %410 : vector<16x512xf32>
    %415 = arith.select %412, %410, %414 : vector<16x512xi1>, vector<16x512xf32>
    %cst_168 = arith.constant 5.000000e-01 : f32
    %416 = vector.broadcast %cst_168 : f32 to vector<16x512xf32>
    %417 = arith.mulf %416, %380 : vector<16x512xf32>
    %cst_169 = arith.constant 1.000000e+00 : f32
    %418 = vector.broadcast %cst_169 : f32 to vector<16x512xf32>
    %419 = arith.addf %418, %415 : vector<16x512xf32>
    %420 = arith.mulf %417, %419 : vector<16x512xf32>
    %c1_170 = arith.constant 1 : index
    %c0_171 = arith.constant 0 : index
    %c0_172 = arith.constant 0 : index
    %421 = vector.load %arg12[%c1_170, %c0_171, %c0_172] : memref<2x512x128xbf16, #tpu.memory_space<vmem>>, vector<1x512x128xbf16>
    %422 = vector.shape_cast %421 : vector<1x512x128xbf16> to vector<512x128xbf16>
    %c1_173 = arith.constant 1 : index
    %c0_174 = arith.constant 0 : index
    %c0_175 = arith.constant 0 : index
    %423 = vector.load %arg13[%c1_173, %c0_174, %c0_175] : memref<2x1x128xf32, #tpu.memory_space<vmem>>, vector<1x1x128xf32>
    %424 = vector.shape_cast %423 : vector<1x1x128xf32> to vector<1x128xf32>
    %425 = arith.truncf %420 : vector<16x512xf32> to vector<16x512xbf16>
    %cst_176 = arith.constant dense<0.000000e+00> : vector<16x128xf32>
    %426 = tpu.matmul %425, %422, %cst_176 {dimension_numbers = #tpu.dot_dimension_numbers<[1], [0], [0], [1], [0, 0, 1, 1], [], []>} : vector<16x512xbf16>, vector<512x128xbf16>, vector<16x128xf32> -> vector<16x128xf32>
    %427 = vector.broadcast %424 : vector<1x128xf32> to vector<16x128xf32>
    %428 = arith.addf %426, %427 : vector<16x128xf32>
    %429 = arith.addf %428, %372 : vector<16x128xf32>
    %c1_177 = arith.constant 1 : index
    %c0_178 = arith.constant 0 : index
    %c0_179 = arith.constant 0 : index
    %430 = vector.load %arg16[%c1_177, %c0_178, %c0_179] : memref<2x1x128xf32, #tpu.memory_space<vmem>>, vector<1x1x128xf32>
    %431 = vector.shape_cast %430 : vector<1x1x128xf32> to vector<1x128xf32>
    %c1_180 = arith.constant 1 : index
    %c0_181 = arith.constant 0 : index
    %c0_182 = arith.constant 0 : index
    %432 = vector.load %arg17[%c1_180, %c0_181, %c0_182] : memref<2x1x128xf32, #tpu.memory_space<vmem>>, vector<1x1x128xf32>
    %433 = vector.shape_cast %432 : vector<1x1x128xf32> to vector<1x128xf32>
    %cst_183 = arith.constant dense<0.000000e+00> : vector<16xf32>
    %434 = vector.multi_reduction <add>, %429, %cst_183 [1] : vector<16x128xf32> to vector<16xf32>
    %435 = vector.shape_cast %434 : vector<16xf32> to vector<16x1xf32>
    %cst_184 = arith.constant 1.280000e+02 : f32
    %436 = vector.broadcast %cst_184 : f32 to vector<16x1xf32>
    %437 = arith.divf %435, %436 : vector<16x1xf32>
    %438 = vector.broadcast %437 : vector<16x1xf32> to vector<16x128xf32>
    %439 = arith.subf %429, %438 : vector<16x128xf32>
    %440 = arith.mulf %439, %439 : vector<16x128xf32>
    %cst_185 = arith.constant dense<0.000000e+00> : vector<16xf32>
    %441 = vector.multi_reduction <add>, %440, %cst_185 [1] : vector<16x128xf32> to vector<16xf32>
    %442 = vector.shape_cast %441 : vector<16xf32> to vector<16x1xf32>
    %cst_186 = arith.constant 1.280000e+02 : f32
    %443 = vector.broadcast %cst_186 : f32 to vector<16x1xf32>
    %444 = arith.divf %442, %443 : vector<16x1xf32>
    %cst_187 = arith.constant 9.99999996E-13 : f32
    %445 = vector.broadcast %cst_187 : f32 to vector<16x1xf32>
    %446 = arith.addf %444, %445 : vector<16x1xf32>
    %447 = math.rsqrt %446 : vector<16x1xf32>
    %448 = vector.broadcast %447 : vector<16x1xf32> to vector<16x128xf32>
    %449 = arith.mulf %439, %448 : vector<16x128xf32>
    %450 = vector.broadcast %431 : vector<1x128xf32> to vector<16x128xf32>
    %451 = arith.mulf %449, %450 : vector<16x128xf32>
    %452 = vector.broadcast %433 : vector<1x128xf32> to vector<16x128xf32>
    %453 = arith.addf %451, %452 : vector<16x128xf32>
    %454 = vector.extract_strided_slice %453 {offsets = [0, 0], sizes = [1, 128], strides = [1, 1]} : vector<16x128xf32> to vector<1x128xf32>
    %455 = vector.extract_strided_slice %453 {offsets = [8, 0], sizes = [1, 128], strides = [1, 1]} : vector<16x128xf32> to vector<1x128xf32>
    %456 = tpu.concatenate %454, %455, %454, %454, %454, %454, %454, %454 in 0 : vector<1x128xf32>, vector<1x128xf32>, vector<1x128xf32>, vector<1x128xf32>, vector<1x128xf32>, vector<1x128xf32>, vector<1x128xf32>, vector<1x128xf32> -> vector<8x128xf32>
    %c0_188 = arith.constant 0 : index
    %c0_189 = arith.constant 0 : index
    %457 = vector.load %arg18[%c0_188, %c0_189] : memref<128x128xbf16, #tpu.memory_space<vmem>>, vector<128x128xbf16>
    %c0_190 = arith.constant 0 : index
    %c0_191 = arith.constant 0 : index
    %458 = vector.load %arg19[%c0_190, %c0_191] : memref<1x128xf32, #tpu.memory_space<vmem>>, vector<1x128xf32>
    %459 = arith.truncf %456 : vector<8x128xf32> to vector<8x128xbf16>
    %cst_192 = arith.constant dense<0.000000e+00> : vector<8x128xf32>
    %460 = tpu.matmul %459, %457, %cst_192 {dimension_numbers = #tpu.dot_dimension_numbers<[1], [0], [0], [1], [0, 0, 1, 1], [], []>} : vector<8x128xbf16>, vector<128x128xbf16>, vector<8x128xf32> -> vector<8x128xf32>
    %461 = vector.broadcast %458 : vector<1x128xf32> to vector<8x128xf32>
    %462 = arith.addf %460, %461 : vector<8x128xf32>
    %463 = math.tanh %462 : vector<8x128xf32>
    %c0_193 = arith.constant 0 : index
    %c0_194 = arith.constant 0 : index
    %464 = vector.load %arg20[%c0_193, %c0_194] : memref<128x128xbf16, #tpu.memory_space<vmem>>, vector<128x128xbf16>
    %c0_195 = arith.constant 0 : index
    %c0_196 = arith.constant 0 : index
    %465 = vector.load %arg21[%c0_195, %c0_196] : memref<1x128xf32, #tpu.memory_space<vmem>>, vector<1x128xf32>
    %466 = arith.truncf %463 : vector<8x128xf32> to vector<8x128xbf16>
    %cst_197 = arith.constant dense<0.000000e+00> : vector<8x128xf32>
    %467 = tpu.matmul %466, %464, %cst_197 {dimension_numbers = #tpu.dot_dimension_numbers<[1], [0], [0], [1], [0, 0, 1, 1], [], []>} : vector<8x128xbf16>, vector<128x128xbf16>, vector<8x128xf32> -> vector<8x128xf32>
    %468 = vector.broadcast %465 : vector<1x128xf32> to vector<8x128xf32>
    %469 = arith.addf %467, %468 : vector<8x128xf32>
    %c0_198 = arith.constant 0 : index
    %c0_199 = arith.constant 0 : index
    %470 = vector.load %arg22[%c0_198, %c0_199] : memref<8x128xf32, #tpu.memory_space<vmem>>, vector<8x128xf32>
    tpu.vector_store %arg22[%c0_198, %c0_199], %469 {strides = array<i32>} : memref<8x128xf32, #tpu.memory_space<vmem>>, vector<8x128xf32>,
    return
  }
}

</mosaic_0001>

<bundles_post_ra>
// kernel: classification_forward.1
= control target key start
LH: loop header
LB: loop body
LE: loop exit
PB: predicated region body
PF: predicated region fallthrough
CT: control target
= control target key end

     0   :  { %s7014_s0 = inlined_call_operand.vmem [shape: f32[16,128], index: 0, kind: input, shape index: {}]   ;;  %s7015_s1 = inlined_call_operand.vmem [shape: f32[8,128], index: 1, kind: input, shape index: {}]   ;;  %s7016_s2 = inlined_call_operand.vmem [shape: f32[1,128], index: 2, kind: input, shape index: {}]   ;;  %s7017_s3 = inlined_call_operand.vmem [shape: f32[2,8], index: 3, kind: input, shape index: {}]   ;;  %s7018_s4 = inlined_call_operand.hbm [shape: f32[1,128], index: 4, kind: input, shape index: {}]   ;;  %s7019_s5 = inlined_call_operand.hbm [shape: f32[1,128], index: 5, kind: input, shape index: {}]   ;;  %s7020_s6 = inlined_call_operand.hbm [shape: bf16[2,128,768], index: 6, kind: input, shape index: {}]   ;;  %s7021_s7 = inlined_call_operand.vmem [shape: f32[2,1,768], index: 7, kind: input, shape index: {}]   ;;  %s7022_s8 = inlined_call_operand.vmem [shape: bf16[2,256,128], index: 8, kind: input, shape index: {}]   ;;  %s7023_s9 = inlined_call_operand.vmem [shape: f32[2,1,128], index: 9, kind: input, shape index: {}]   ;;  %s7024_s10 = inlined_call_operand.hbm [shape: bf16[2,128,512], index: 10, kind: input, shape index: {}]   ;;  %s7025_s11 = inlined_call_operand.vmem [shape: f32[2,1,512], index: 11, kind: input, shape index: {}]   ;;  %s7026_s12 = inlined_call_operand.hbm [shape: bf16[2,512,128], index: 12, kind: input, shape index: {}]   ;;  %s7027_s13 = inlined_call_operand.vmem [shape: f32[2,1,128], index: 13, kind: input, shape index: {}]   ;;  %s7028_s14 = inlined_call_operand.vmem [shape: f32[2,1,128], index: 14, kind: input, shape index: {}]   ;;  %s7029_s15 = inlined_call_operand.hbm [shape: f32[2,1,128], index: 15, kind: input, shape index: {}]   ;;  %s7030_s16 = inlined_call_operand.hbm [shape: f32[2,1,128], index: 16, kind: input, shape index: {}]   ;;  %s7031_s17 = inlined_call_operand.hbm [shape: f32[2,1,128], index: 17, kind: input, shape index: {}]   ;;  %s7032_s18 = inlined_call_operand.hbm [shape: bf16[128,128], index: 18, kind: input, shape index: {}]   ;;  %s7033_s19 = inlined_call_operand.hbm [shape: f32[1,128], index: 19, kind: input, shape index: {}]   ;;  %s7034_s20 = inlined_call_operand.hbm [shape: bf16[128,128], index: 20, kind: input, shape index: {}]   ;;  %s7035_s21 = inlined_call_operand.hbm [shape: f32[1,128], index: 21, kind: input, shape index: {}]   ;;  %s7036_s22 = inlined_call_operand.vmem [shape: f32[8,128], index: 22, kind: output, shape index: {}]  }
   0x1   :  { %7041 = sst [smem:[#allocation28_spill]] %s7014_s0 }
   0x2   :  { %7042 = sst [smem:[#allocation29_spill]] %s7015_s1 }
   0x3   :  { %7043 = sst [smem:[#allocation30_spill]] %s7016_s2 }
   0x4   :  { %7044 = sst [smem:[#allocation31_spill]] %s7017_s3 }
   0x5   :  { %7045 = sst [smem:[#allocation32_spill]] %s7018_s4 }
   0x6   :  { %7046 = sst [smem:[#allocation33_spill]] %s7019_s5 }
   0x7   :  { %7047 = sst [smem:[#allocation34_spill]] %s7020_s6 }
   0x8   :  { %7048 = sst [smem:[#allocation35_spill]] %s7036_s22 }
   0x9   :  { %27 = vsyncpa [#allocation3], 0 }
   0xa   :  { %28 = vsyncpa [#allocation5], 0 }
   0xb   :  { %29 = vsyncpa [#allocation8], 0 }
   0xc   :  { %30 = vsyncpa [#allocation11], 0 }
   0xd   :  { %31 = vsyncpa [#allocation14], 0 }
   0xe   :  { %32 = vsyncpa [#allocation17], 0 }
   0xf   :  { %33 = vsyncpa [#allocation20], 0  ;;  %s6007_s3 = smov [#allocation4]   ;;  %s6008_s29 = smov [#allocation7]  }
  0x10   :  { %s58_s28 = sshll.u32 %s6007_s3, 4  ;;  %s85_s30 = sshll.u32 %s6008_s29, 4  ;;  %s59_s28 = int_to_ptr.vmem [resolvable:$true] %s58_s28  ;;  %s6144_s30 = int_to_ptr.vmem [resolvable:$true] %s85_s30 }
  0x11   :  { %s7049_s23 = sld [smem:[#allocation33_spill]] }
  0x17   :  { %s5729_s1 = scalar_lea.hbm %s7049_s23, 16 }
  0x18   :  { %p5730_p0 = scmp.ne.s32.totalorder %s7049_s23, %s5729_s1  ;;  %p5733_p1 = scmp.lt.u32.totalorder %s5729_s1, %s7049_s23 }
  0x1a   :  { %p5735_p2 = pnand %p5733_p1, %p5730_p0 }
  0x1c   :  { %5738 = shalt.err (!%p5735_p2)
}
  0x1d   :  { %s5739_s26 = scalar_lea.vmem %s59_s28, 16  ;;  %s5743_s2 = scalar_lea.vmem %s59_s28, 32 }
  0x1e   :  { %p5740_p3 = scmp.ne.s32.totalorder %s59_s28, %s5739_s26  ;;  %p5744_p4 = scmp.lt.s32.totalorder %s59_s28, %s59_s28 }
  0x1f   :  { %p5745_p5 = scmp.lt.s32.totalorder %s5743_s2, %s5739_s26 }
  0x21   :  { %p5746_p6 = por %p5745_p5, %p5744_p4 }
  0x23   :  { %p5747_p7 = pnand %p5746_p6, %p5740_p3 }
  0x25   :  { %5750 = shalt.err (!%p5747_p7)
}
  0x26   :  { %61 = dma.hbm_to_vmem [thread:$0]  %s7049_s23, 16, %s59_s28, [#allocation5]  }
  0x27   :  { %s5751_s0 = scalar_lea.hbm %s7024_s10, 8192 }
  0x28   :  { %p5752_p8 = scmp.ne.s32.totalorder %s7024_s10, %s5751_s0  ;;  %p5755_p9 = scmp.lt.u32.totalorder %s5751_s0, %s7024_s10 }
  0x2a   :  { %p5757_p10 = pnand %p5755_p9, %p5752_p8 }
  0x2c   :  { %5760 = shalt.err (!%p5757_p10)
}
  0x2d   :  { %s5761_s25 = scalar_lea.vmem %s6144_s30, 8192  ;;  %p5766_p12 = scmp.lt.s32.totalorder %s6144_s30, %s6144_s30 }
  0x2e   :  { %p5762_p11 = scmp.ne.s32.totalorder %s6144_s30, %s5761_s25  ;;  %p5767_p13 = scmp.lt.s32.totalorder %s5761_s25, %s5761_s25 }
  0x30   :  { %p5768_p0 = por %p5767_p13, %p5766_p12 }
  0x32   :  { %p5769_p1 = pnand %p5768_p0, %p5762_p11 }
  0x34   :  { %5772 = shalt.err (!%p5769_p1)
}
  0x35   :  { %s6009_s28 = smov 256   ;;  %s6010_s23 = smov 16  }
  0x36   :  { %91 = dma.hbm_to_vmem [thread:$0]  %s7024_s10, 8192, %s6144_s30, [#allocation8], %s6009_s28, %s6009_s28, %s6010_s23  }
  0x37   :  { %s6011_s27 = smov [#allocation10]   ;;  %s6012_s29 = smov [#allocation13]  }
  0x38   :  { %s115_s3 = sshll.u32 %s6011_s27, 4  ;;  %s139_s4 = sshll.u32 %s6012_s29, 4  ;;  %s116_s3 = int_to_ptr.vmem [resolvable:$true] %s115_s3  ;;  %s140_s4 = int_to_ptr.vmem [resolvable:$true] %s139_s4 }
  0x39   :  { %s5773_s1 = scalar_lea.hbm %s7029_s15, 32 }
  0x3a   :  { %p5774_p2 = scmp.ne.s32.totalorder %s7029_s15, %s5773_s1  ;;  %p5777_p3 = scmp.lt.u32.totalorder %s5773_s1, %s7029_s15 }
  0x3c   :  { %p5779_p4 = pnand %p5777_p3, %p5774_p2 }
  0x3e   :  { %5782 = shalt.err (!%p5779_p4)
}
  0x3f   :  { %s5783_s10 = scalar_lea.vmem %s116_s3, 32  ;;  %p5788_p6 = scmp.lt.s32.totalorder %s116_s3, %s116_s3 }
  0x40   :  { %p5784_p5 = scmp.ne.s32.totalorder %s116_s3, %s5783_s10  ;;  %p5789_p7 = scmp.lt.s32.totalorder %s5783_s10, %s5783_s10 }
  0x42   :  { %p5790_p8 = por %p5789_p7, %p5788_p6 }
  0x44   :  { %p5791_p9 = pnand %p5790_p8, %p5784_p5 }
  0x46   :  { %5794 = shalt.err (!%p5791_p9)
}
  0x47   :  { %s6013_s30 = smov 1   ;;  %s5795_s27 = scalar_lea.hbm %s7031_s17, 32 }
  0x48   :  { %121 = dma.hbm_to_vmem [thread:$0]  %s7029_s15, 32, %s116_s3, [#allocation11], %s6010_s23, %s6010_s23, %s6013_s30  }
  0x49   :  { %p5796_p10 = scmp.ne.s32.totalorder %s7031_s17, %s5795_s27  ;;  %p5799_p11 = scmp.lt.u32.totalorder %s5795_s27, %s7031_s17 }
  0x4b   :  { %p5801_p12 = pnand %p5799_p11, %p5796_p10 }
  0x4d   :  { %5804 = shalt.err (!%p5801_p12)
}
  0x4e   :  { %s5805_s24 = scalar_lea.vmem %s140_s4, 32  ;;  %p5810_p0 = scmp.lt.s32.totalorder %s140_s4, %s140_s4 }
  0x4f   :  { %p5806_p13 = scmp.ne.s32.totalorder %s140_s4, %s5805_s24  ;;  %p5811_p1 = scmp.lt.s32.totalorder %s5805_s24, %s5805_s24 }
  0x51   :  { %p5812_p2 = por %p5811_p1, %p5810_p0 }
  0x53   :  { %p5813_p3 = pnand %p5812_p2, %p5806_p13 }
  0x55   :  { %5816 = shalt.err (!%p5813_p3)
}
  0x56   :  { %145 = dma.hbm_to_vmem [thread:$0]  %s7031_s17, 32, %s140_s4, [#allocation14], %s6010_s23, %s6010_s23, %s6013_s30  }
  0x57   :  { %s6014_s6 = smov [#allocation16]   ;;  %s6015_s10 = smov [#allocation2]  }
  0x58   :  { %s164_s25 = sshll.u32 %s6014_s6, 4  ;;  %s48_s28 = sshll.u32 %s6015_s10, 4  ;;  %s165_s25 = int_to_ptr.vmem [resolvable:$true] %s164_s25  ;;  %s49_s28 = int_to_ptr.vmem [resolvable:$true] %s48_s28 }
  0x59   :  { %s5817_s2 = scalar_lea.hbm %s7033_s19, 16 }
  0x5a   :  { %p5818_p4 = scmp.ne.s32.totalorder %s7033_s19, %s5817_s2  ;;  %p5821_p5 = scmp.lt.u32.totalorder %s5817_s2, %s7033_s19 }
  0x5c   :  { %p5823_p6 = pnand %p5821_p5, %p5818_p4 }
  0x5e   :  { %5826 = shalt.err (!%p5823_p6)
}
  0x5f   :  { %s5827_s17 = scalar_lea.vmem %s165_s25, 16  ;;  %s5831_s4 = scalar_lea.vmem %s165_s25, 32 }
  0x60   :  { %p5828_p7 = scmp.ne.s32.totalorder %s165_s25, %s5827_s17  ;;  %p5832_p8 = scmp.lt.s32.totalorder %s165_s25, %s165_s25 }
  0x61   :  { %p5833_p9 = scmp.lt.s32.totalorder %s5831_s4, %s5827_s17 }
  0x63   :  { %p5834_p10 = por %p5833_p9, %p5832_p8 }
  0x65   :  { %p5835_p11 = pnand %p5834_p10, %p5828_p7 }
  0x67   :  { %5838 = shalt.err (!%p5835_p11)
}
  0x68   :  { %167 = dma.hbm_to_vmem [thread:$0]  %s7033_s19, 16, %s165_s25, [#allocation17]  }
  0x69   :  { %s7050_s6 = sld [smem:[#allocation32_spill]] }
  0x6f   :  { %s5839_s10 = scalar_lea.hbm %s7050_s6, 16 }
  0x70   :  { %p5840_p12 = scmp.ne.s32.totalorder %s7050_s6, %s5839_s10  ;;  %p5843_p13 = scmp.lt.u32.totalorder %s5839_s10, %s7050_s6 }
  0x72   :  { %p5845_p0 = pnand %p5843_p13, %p5840_p12 }
  0x74   :  { %5848 = shalt.err (!%p5845_p0)
}
  0x75   :  { %s5849_s29 = scalar_lea.vmem %s49_s28, 16  ;;  %s5853_s0 = scalar_lea.vmem %s49_s28, 32 }
  0x76   :  { %p5850_p1 = scmp.ne.s32.totalorder %s49_s28, %s5849_s29  ;;  %p5854_p2 = scmp.lt.s32.totalorder %s49_s28, %s49_s28 }
  0x77   :  { %p5855_p3 = scmp.lt.s32.totalorder %s5853_s0, %s5849_s29 }
  0x79   :  { %p5856_p4 = por %p5855_p3, %p5854_p2 }
  0x7b   :  { %p5857_p5 = pnand %p5856_p4, %p5850_p1 }
  0x7d   :  { %5860 = shalt.err (!%p5857_p5)
}
  0x7e   :  { %51 = dma.hbm_to_vmem [thread:$0]  %s7050_s6, 16, %s49_s28, [#allocation3]  }
  0x7f   :  { %s6016_s5 = smov [#allocation6]   ;;  %s7051_s24 = sld [smem:[#allocation34_spill]] }
  0x80   :  { %s67_s17 = sshll.u32 %s6016_s5, 4  ;;  %s68_s17 = int_to_ptr.vmem [resolvable:$true] %s67_s17 }
  0x85   :  { %s5861_s15 = scalar_lea.hbm %s7051_s24, 12288 }
  0x86   :  { %p5862_p6 = scmp.ne.s32.totalorder %s7051_s24, %s5861_s15  ;;  %p5865_p7 = scmp.lt.u32.totalorder %s5861_s15, %s7051_s24 }
  0x88   :  { %p5867_p8 = pnand %p5865_p7, %p5862_p6 }
  0x8a   :  { %5870 = shalt.err (!%p5867_p8)
}
  0x8b   :  { %s5871_s2 = scalar_lea.vmem %s68_s17, 12288  ;;  %p5876_p10 = scmp.lt.s32.totalorder %s68_s17, %s68_s17 }
  0x8c   :  { %p5872_p9 = scmp.ne.s32.totalorder %s68_s17, %s5871_s2  ;;  %p5877_p11 = scmp.lt.s32.totalorder %s5871_s2, %s5871_s2 }
  0x8e   :  { %p5878_p12 = por %p5877_p11, %p5876_p10 }
  0x90   :  { %p5879_p13 = pnand %p5878_p12, %p5872_p9 }
  0x92   :  { %5882 = shalt.err (!%p5879_p13)
}
  0x93   :  { %s6017_s28 = smov 384   ;;  %s6018_s6 = smov 24  }
  0x94   :  { %73 = dma.hbm_to_vmem [thread:$0]  %s7051_s24, 12288, %s68_s17, [#allocation5], %s6017_s28, %s6017_s28, %s6018_s6  }
  0x95   :  { %s6019_s0 = smov [#allocation9]   ;;  %s5883_s4 = scalar_lea.hbm %s7026_s12, 8192 }
  0x96   :  { %s99_s19 = sshll.u32 %s6019_s0, 4  ;;  %p5884_p0 = scmp.ne.s32.totalorder %s7026_s12, %s5883_s4  ;;  %s100_s19 = int_to_ptr.vmem [resolvable:$true] %s99_s19 }
  0x97   :  { %p5887_p1 = scmp.lt.u32.totalorder %s5883_s4, %s7026_s12 }
  0x99   :  { %p5889_p2 = pnand %p5887_p1, %p5884_p0 }
  0x9b   :  { %5892 = shalt.err (!%p5889_p2)
}
  0x9c   :  { %s5893_s26 = scalar_lea.vmem %s100_s19, 8192  ;;  %p5898_p4 = scmp.lt.s32.totalorder %s100_s19, %s100_s19 }
  0x9d   :  { %p5894_p3 = scmp.ne.s32.totalorder %s100_s19, %s5893_s26  ;;  %p5899_p5 = scmp.lt.s32.totalorder %s5893_s26, %s5893_s26 }
  0x9f   :  { %p5900_p6 = por %p5899_p5, %p5898_p4 }
  0xa1   :  { %p5901_p7 = pnand %p5900_p6, %p5894_p3 }
  0xa3   :  { %5904 = shalt.err (!%p5901_p7)
}
  0xa4   :  { %s6020_s17 = smov 64   ;;  %s6021_s24 = smov 4  }
  0xa5   :  { %105 = dma.hbm_to_vmem [thread:$0]  %s7026_s12, 8192, %s100_s19, [#allocation8], %s6020_s17, %s6020_s17, %s6021_s24  }
  0xa6   :  { %s6022_s28 = smov [#allocation12]   ;;  %s6023_s27 = smov [#allocation15]  }
  0xa7   :  { %s127_s6 = sshll.u32 %s6022_s28, 4  ;;  %s151_s29 = sshll.u32 %s6023_s27, 4  ;;  %s128_s6 = int_to_ptr.vmem [resolvable:$true] %s127_s6  ;;  %s152_s29 = int_to_ptr.vmem [resolvable:$true] %s151_s29 }
  0xa8   :  { %s5905_s5 = scalar_lea.hbm %s7030_s16, 32 }
  0xa9   :  { %p5906_p8 = scmp.ne.s32.totalorder %s7030_s16, %s5905_s5  ;;  %p5909_p9 = scmp.lt.u32.totalorder %s5905_s5, %s7030_s16 }
  0xab   :  { %p5911_p10 = pnand %p5909_p9, %p5906_p8 }
  0xad   :  { %5914 = shalt.err (!%p5911_p10)
}
  0xae   :  { %s5915_s12 = scalar_lea.vmem %s128_s6, 32  ;;  %p5920_p12 = scmp.lt.s32.totalorder %s128_s6, %s128_s6 }
  0xaf   :  { %p5916_p11 = scmp.ne.s32.totalorder %s128_s6, %s5915_s12  ;;  %p5921_p13 = scmp.lt.s32.totalorder %s5915_s12, %s5915_s12 }
  0xb1   :  { %p5922_p0 = por %p5921_p13, %p5920_p12 }
  0xb3   :  { %p5923_p1 = pnand %p5922_p0, %p5916_p11 }
  0xb5   :  { %5926 = shalt.err (!%p5923_p1)
}
  0xb6   :  { %133 = dma.hbm_to_vmem [thread:$0]  %s7030_s16, 32, %s128_s6, [#allocation11], %s6010_s23, %s6010_s23, %s6013_s30  }
  0xb7   :  { %s5927_s2 = scalar_lea.hbm %s7032_s18, 1024 }
  0xb8   :  { %p5928_p2 = scmp.ne.s32.totalorder %s7032_s18, %s5927_s2  ;;  %p5931_p3 = scmp.lt.u32.totalorder %s5927_s2, %s7032_s18 }
  0xba   :  { %p5933_p4 = pnand %p5931_p3, %p5928_p2 }
  0xbc   :  { %5936 = shalt.err (!%p5933_p4)
}
  0xbd   :  { %s5937_s5 = scalar_lea.vmem %s152_s29, 1024  ;;  %p5942_p6 = scmp.lt.s32.totalorder %s152_s29, %s152_s29 }
  0xbe   :  { %p5938_p5 = scmp.ne.s32.totalorder %s152_s29, %s5937_s5  ;;  %p5943_p7 = scmp.lt.s32.totalorder %s5937_s5, %s5937_s5 }
  0xc0   :  { %p5944_p8 = por %p5943_p7, %p5942_p6 }
  0xc2   :  { %p5945_p9 = pnand %p5944_p8, %p5938_p5 }
  0xc4   :  { %5948 = shalt.err (!%p5945_p9)
}
  0xc5   :  { %157 = dma.hbm_to_vmem [thread:$0]  %s7032_s18, 1024, %s152_s29, [#allocation14], %s6020_s17, %s6020_s17, %s6021_s24  }
  0xc6   :  { %s6024_s30 = smov [#allocation18]   ;;  %s6025_s4 = smov [#allocation19]  }
  0xc7   :  { %s173_s6 = sshll.u32 %s6024_s30, 4  ;;  %s186_s1 = sshll.u32 %s6025_s4, 4  ;;  %s174_s6 = int_to_ptr.vmem [resolvable:$true] %s173_s6  ;;  %s187_s1 = int_to_ptr.vmem [resolvable:$true] %s186_s1 }
  0xc8   :  { %s5949_s12 = scalar_lea.hbm %s7034_s20, 1024 }
  0xc9   :  { %p5950_p10 = scmp.ne.s32.totalorder %s7034_s20, %s5949_s12  ;;  %p5953_p11 = scmp.lt.u32.totalorder %s5949_s12, %s7034_s20 }
  0xcb   :  { %p5955_p12 = pnand %p5953_p11, %p5950_p10 }
  0xcd   :  { %5958 = shalt.err (!%p5955_p12)
}
  0xce   :  { %s5959_s18 = scalar_lea.vmem %s174_s6, 1024  ;;  %p5964_p0 = scmp.lt.s32.totalorder %s174_s6, %s174_s6 }
  0xcf   :  { %p5960_p13 = scmp.ne.s32.totalorder %s174_s6, %s5959_s18  ;;  %p5965_p1 = scmp.lt.s32.totalorder %s5959_s18, %s5959_s18 }
  0xd1   :  { %p5966_p2 = por %p5965_p1, %p5964_p0 }
  0xd3   :  { %p5967_p3 = pnand %p5966_p2, %p5960_p13 }
  0xd5   :  { %5970 = shalt.err (!%p5967_p3)
}
  0xd6   :  { %179 = dma.hbm_to_vmem [thread:$0]  %s7034_s20, 1024, %s174_s6, [#allocation17], %s6020_s17, %s6020_s17, %s6021_s24  }
  0xd7   :  { %s5971_s0 = scalar_lea.hbm %s7035_s21, 16 }
  0xd8   :  { %p5972_p4 = scmp.ne.s32.totalorder %s7035_s21, %s5971_s0  ;;  %p5975_p5 = scmp.lt.u32.totalorder %s5971_s0, %s7035_s21 }
  0xda   :  { %p5977_p6 = pnand %p5975_p5, %p5972_p4 }
  0xdc   :  { %5980 = shalt.err (!%p5977_p6)
}
  0xdd   :  { %s5981_s30 = scalar_lea.vmem %s187_s1, 16  ;;  %s5985_s4 = scalar_lea.vmem %s187_s1, 32 }
  0xde   :  { %p5982_p7 = scmp.ne.s32.totalorder %s187_s1, %s5981_s30  ;;  %p5986_p8 = scmp.lt.s32.totalorder %s187_s1, %s187_s1 }
  0xdf   :  { %p5987_p9 = scmp.lt.s32.totalorder %s5985_s4, %s5981_s30 }
  0xe1   :  { %p5988_p10 = por %p5987_p9, %p5986_p8 }
  0xe3   :  { %p5989_p11 = pnand %p5988_p10, %p5982_p7 }
  0xe5   :  { %5992 = shalt.err (!%p5989_p11)
}
  0xe6   :  { %189 = dma.hbm_to_vmem [thread:$0]  %s7035_s21, 16, %s187_s1, [#allocation20]  }
  0xe7   :  { %5993 = dma.done.wait [#allocation3], 16  }
  0xe8   :  { %5994 = vsyncadd [#allocation3], 4294967280 }
  0xe9   :  { %5995 = dma.done.wait [#allocation5], 12304  }
  0xea   :  { %5996 = vsyncadd [#allocation5], 4294954992 }
  0xeb   :  { %5997 = dma.done.wait [#allocation8], 16384  }
  0xec   :  { %5998 = vsyncadd [#allocation8], 4294950912 }
  0xed   :  { %5999 = dma.done.wait [#allocation11], 64  }
  0xee   :  { %6000 = vsyncadd [#allocation11], 4294967232 }
  0xef   :  { %6001 = dma.done.wait [#allocation14], 1056  }
  0xf0   :  { %6002 = vsyncadd [#allocation14], 4294966240 }
  0xf1   :  { %6003 = dma.done.wait [#allocation17], 1040  }
  0xf2   :  { %6004 = vsyncadd [#allocation17], 4294966256 }
  0xf3   :  { %6005 = dma.done.wait [#allocation20], 16  }
  0xf4   :  { %6006 = vsyncadd [#allocation20], 4294967280  ;;  %s7052_s15 = sld [smem:[#allocation29_spill]]  ;;  %s7053_s1 = sld [smem:[#allocation28_spill]]  ;;  %v5259_v8 = vld [vmem:[#allocation6 + $0x4] ss:$24 sps:$4 sm:$0xff]  }
  0xf5   :  { %s7054_s10 = sld [smem:[#allocation30_spill]]  ;;  %v5261_v9 = vld [vmem:[#allocation6] ss:$24 sps:$4 sm:$0xff]   ;;  %v5262_v10 = vld [vmem:[#allocation6 + $0xc] ss:$24 sps:$4 sm:$0xff]   ;;  %614 = vmatprep.subr.bf16.mxu0 %v5259_v8  ;;  %v6026_v42 = vmov 0  }
  0xf6   :  { %v5264_v11 = vld [vmem:[#allocation6 + $0x8] ss:$24 sps:$4 sm:$0xff]   ;;  %v5265_v12 = vld [vmem:[#allocation6 + $0x34] ss:$24 sps:$4 sm:$0xff]   ;;  %657 = vmatprep.subr.bf16.mxu1 %v5262_v10  ;;  %615 = vmatpush1.bf16.msra.mxu0 %v5261_v9  ;;  %v5270_v23 = vld [vmem:[#allocation6 + $0x38] ss:$24 sps:$4 sm:$0xff]  }
  0xf7   :  { %v5267_v13 = vld [vmem:[#allocation6 + $0x30] ss:$24 sps:$4 sm:$0xff]   ;;  %v5268_v14 = vld [vmem:[#allocation6 + $0x3c] ss:$24 sps:$4 sm:$0xff]   ;;  %658 = vmatpush1.bf16.msra.mxu1 %v5264_v11  ;;  %616 = vmatprep.subr.bf16.mxu0 %v5265_v12  ;;  %v5273_v25 = vld [vmem:[#allocation6 + $0x60] ss:$24 sps:$4 sm:$0xff]  }
  0xf8   :  { %659 = vmatprep.subr.bf16.mxu1 %v5268_v14  ;;  %v5271_v24 = vld [vmem:[#allocation6 + $0x64] ss:$24 sps:$4 sm:$0xff]   ;;  %v5276_v27 = vld [vmem:[#allocation6 + $0x68] ss:$24 sps:$4 sm:$0xff]   ;;  %v5277_v28 = vld [vmem:[#allocation6 + $0x94] ss:$24 sps:$4 sm:$0xff]   ;;  %646 = vmatprep.mubr.bf16.mxu0 %v6026_v42 }
  0xf9   :  { %v5274_v26 = vld [vmem:[#allocation6 + $0x6c] ss:$24 sps:$4 sm:$0xff]   ;;  %v5279_v29 = vld [vmem:[#allocation6 + $0x90] ss:$24 sps:$4 sm:$0xff]   ;;  %v5280_v30 = vld [vmem:[#allocation6 + $0x9c] ss:$24 sps:$4 sm:$0xff]   ;;  %689 = vmatprep.mubr.bf16.mxu1 %v6026_v42 }
  0xfa   :  { %v227_v0 = vld [vmem:[%s7052_s15] sm:$0xff]  ;;  %v229_v4 = vld [vmem:[%s7053_s1 + $0x8] sm:$0xff]  ;;  %617 = vmatpush1.bf16.msra.mxu0 %v5267_v13  ;;  %v5282_v31 = vld [vmem:[#allocation6 + $0x98] ss:$24 sps:$4 sm:$0xff]   ;;  %vm6028_vm0 = vmmov 0   ;;  %vm807_vm1 = vcmask 1043456  }
  0xfb   :  { %v228_v1 = vld [vmem:[%s7053_s1] sm:$0xff]  ;;  %v231_v5 = vadd.f32 %v229_v4, %v227_v0  ;;  %660 = vmatpush1.bf16.msra.mxu1 %v5270_v23  ;;  %618 = vmatprep.subr.bf16.mxu0 %v5271_v24  ;;  %v5286_v34 = vld [vmem:[#allocation6 + $0xcc] ss:$24 sps:$4 sm:$0xff]   ;;  %v5291_v38 = vld [vmem:[#allocation6 + $0xf0] ss:$24 sps:$4 sm:$0xff]   ;;  %s7055_s27 = sld [smem:[#allocation31_spill]] }
  0xfc   :  { %v4553_v2 = vld [vmem:[%s7054_s10] ss:$0 sm:$0xff]  ;;  %v230_v3 = vadd.f32 %v228_v1, %v227_v0  ;;  %661 = vmatprep.subr.bf16.mxu1 %v5274_v26  ;;  %v5285_v33 = vld [vmem:[#allocation6 + $0xc0] ss:$24 sps:$4 sm:$0xff]   ;;  %v5289_v36 = vld [vmem:[#allocation6 + $0xf4] ss:$24 sps:$4 sm:$0xff]  }
  0xfd   :  { %v240_v7 = vadd.f32 %v4553_v2, %v231_v5  ;;  %v5283_v32 = vld [vmem:[#allocation6 + $0xc4] ss:$24 sps:$4 sm:$0xff]   ;;  %v5288_v35 = vld [vmem:[#allocation6 + $0xc8] ss:$24 sps:$4 sm:$0xff]   ;;  %v5294_v39 = vld [vmem:[#allocation6 + $0xf8] ss:$24 sps:$4 sm:$0xff]  }
  0xfe   :  { %v239_v6 = vadd.f32 %v4553_v2, %v230_v3  ;;  %619 = vmatpush1.bf16.msra.mxu0 %v5273_v25  ;;  %v5292_v37 = vld [vmem:[#allocation6 + $0xfc] ss:$24 sps:$4 sm:$0xff]   ;;  %v5298_v41 = vld [vmem:[#allocation6 + $0x12c] ss:$24 sps:$4 sm:$0xff]   ;;  %v5297_v43 = vld [vmem:[#allocation6 + $0x120] ss:$24 sps:$4 sm:$0xff]  }
  0xff   :  { %662 = vmatpush1.bf16.msra.mxu1 %v5276_v27  ;;  %620 = vmatprep.subr.bf16.mxu0 %v5277_v28  ;;  %v5295_v40 = vld [vmem:[#allocation6 + $0x124] ss:$24 sps:$4 sm:$0xff]   ;;  %v5300_v44 = vld [vmem:[#allocation6 + $0x128] ss:$24 sps:$4 sm:$0xff]   ;;  %v5301_v45 = vld [vmem:[#allocation6 + $0x154] ss:$24 sps:$4 sm:$0xff]  }
 0x100   :  { %243 = vadd.xlane.f32.xlu0 %v239_v6  ;;  %663 = vmatprep.subr.bf16.mxu1 %v5280_v30  ;;  %v5304_v46 = vld [vmem:[#allocation6 + $0x15c] ss:$24 sps:$4 sm:$0xff]   ;;  %v5303_v47 = vld [vmem:[#allocation6 + $0x150] ss:$24 sps:$4 sm:$0xff]   ;;  %v5310_v5 = vld [vmem:[#allocation6 + $0x40] ss:$24 sps:$4 sm:$0xff]  }
 0x101   :  { %v5306_v48 = vld [vmem:[#allocation6 + $0x158] ss:$24 sps:$4 sm:$0xff]   ;;  %v5309_v49 = vld [vmem:[#allocation6 + $0x14] ss:$24 sps:$4 sm:$0xff]   ;;  %v4554_v58 = vld [vmem:[#allocation2] ss:$0 sm:$0xff] }
 0x102   :  { %621 = vmatpush1.bf16.msra.mxu0 %v5279_v29  ;;  %v4555_v62 = vld [vmem:[#allocation4] ss:$0 sm:$0xff]  ;;  %v5307_v2 = vld [vmem:[#allocation6 + $0x10] ss:$24 sps:$4 sm:$0xff]   ;;  %v5316_v9 = vld [vmem:[#allocation6 + $0xa0] ss:$24 sps:$4 sm:$0xff]  }
 0x103   :  { %664 = vmatpush1.bf16.msra.mxu1 %v5282_v31  ;;  %622 = vmatprep.subr.bf16.mxu0 %v5283_v32  ;;  %v5312_v4 = vld [vmem:[#allocation6 + $0x44] ss:$24 sps:$4 sm:$0xff]   ;;  %v5321_v10 = vld [vmem:[#allocation6 + $0xd4] ss:$24 sps:$4 sm:$0xff]   ;;  %v5319_v11 = vld [vmem:[#allocation6 + $0xd0] ss:$24 sps:$4 sm:$0xff]  }
 0x104   :  { %245 = vadd.xlane.f32.xlu0 %v240_v7  ;;  %665 = vmatprep.subr.bf16.mxu1 %v5286_v34  ;;  %v5318_v8 = vld [vmem:[#allocation6 + $0xa4] ss:$24 sps:$4 sm:$0xff]   ;;  %v5322_v13 = vld [vmem:[#allocation6 + $0x100] ss:$24 sps:$4 sm:$0xff]   ;;  %v5327_v14 = vld [vmem:[#allocation6 + $0x134] ss:$24 sps:$4 sm:$0xff]  }
 0x105   :  { %v5324_v12 = vld [vmem:[#allocation6 + $0x104] ss:$24 sps:$4 sm:$0xff]   ;;  %vm791_vm2 = vcmask 64512   ;;  %s7056_s5 = sld [smem:[#allocation35_spill]] }
 0x106   :  { %623 = vmatpush1.bf16.msra.mxu0 %v5285_v33 }
 0x107   :  { %666 = vmatpush1.bf16.msra.mxu1 %v5288_v35  ;;  %624 = vmatprep.subr.bf16.mxu0 %v5289_v36 }
 0x108   :  { %667 = vmatprep.subr.bf16.mxu1 %v5292_v37 }
 0x10a   :  { %625 = vmatpush1.bf16.msra.mxu0 %v5291_v38 }
 0x10b   :  { %668 = vmatpush1.bf16.msra.mxu1 %v5294_v39  ;;  %626 = vmatprep.subr.bf16.mxu0 %v5295_v40 }
 0x10c   :  { %669 = vmatprep.subr.bf16.mxu1 %v5298_v41 }
 0x10e   :  { %627 = vmatpush1.bf16.msra.mxu0 %v5297_v43 }
 0x10f   :  { %670 = vmatpush1.bf16.msra.mxu1 %v5300_v44  ;;  %628 = vmatprep.subr.bf16.mxu0 %v5301_v45 }
 0x110   :  { %671 = vmatprep.subr.bf16.mxu1 %v5304_v46 }
 0x112   :  { %629 = vmatpush1.bf16.msra.mxu0 %v5303_v47 }
 0x113   :  { %672 = vmatpush1.bf16.msra.mxu1 %v5306_v48  ;;  %700 = vmatprep.subr.bf16.mxu0 %v5309_v49 }
 0x18d   :  { %v244_v15 = vpop.xlane.xlu0 %243 }
 0x18e   :  { %v248_v16 = vmul.f32 0.0078125, %v244_v15  ;;  %v5325_v15 = vld [vmem:[#allocation6 + $0x130] ss:$24 sps:$4 sm:$0xff]  }
 0x190   :  { %v6326_v17 = vsub.f32 %v239_v6, %v248_v16  ;;  %v5315_v6 = vld [vmem:[#allocation6 + $0x74] ss:$24 sps:$4 sm:$0xff]   ;;  %v5330_v16 = vld [vmem:[#allocation6 + $0x164] ss:$24 sps:$4 sm:$0xff]  }
 0x191   :  { %v246_v18 = vpop.xlane.xlu0 %245 }
 0x192   :  { %v249_v19 = vmul.f32 0.0078125, %v246_v18  ;;  %v252_v20 = vmul.f32 %v6326_v17, %v6326_v17  ;;  %v6027_v18 = vmov 0.0  }
 0x193   :  { %5101 = vmatprep.subr.bf16.mxu1 %v6027_v18 }
 0x194   :  { %v6330_v21 = vsub.f32 %v240_v7, %v249_v19  ;;  %254 = vadd.xlane.f32.xlu1 %v252_v20  ;;  %v5313_v7 = vld [vmem:[#allocation6 + $0x70] ss:$24 sps:$4 sm:$0xff]   ;;  %v285_v19 = vlaneseq }
 0x196   :  { %v253_v22 = vmul.f32 %v6330_v21, %v6330_v21  ;;  %v6348_v20 = vshrl.u32 %v285_v19, 7 }
 0x198   :  { %256 = vadd.xlane.f32.xlu1 %v253_v22  ;;  %v341_v22 = vld [vmem:[%s7021_s7] sm:$0x3f]  ;;  %v6357_v23 = vsub.s32 0, %v6348_v20  ;;  %v6360_v24 = vsub.s32 2, %v6348_v20  ;;  %v6364_v26 = vsub.s32 3, %v6348_v20 }
 0x19a   :  { %v347_v29 = vrot.slane %v341_v22, %v6357_v23  ;;  %v355_v30 = vrot.slane %v341_v22, %v6360_v24  ;;  %v6371_v34 = vrot.slane %v341_v22, %v6364_v26 }
 0x221   :  { %v255_v50 = vpop.xlane.xlu1 %254 }
 0x222   :  { %v258_v51 = vmul.f32 0.0078125, %v255_v50  ;;  %v362_v50 = vsub.s32 4, %v6348_v20 }
 0x224   :  { %v260_v52 = vadd.f32 1e-12, %v258_v51  ;;  %v366_v51 = vsub.s32 5, %v6348_v20 }
 0x225   :  { %v257_v53 = vpop.xlane.xlu1 %256 }
 0x226   :  { %5611 = vrsqrt.f32 %v260_v52  ;;  %v259_v54 = vmul.f32 0.0078125, %v257_v53  ;;  %v363_v53 = vrot.slane %v341_v22, %v362_v50 }
 0x228   :  { %v261_v55 = vadd.f32 1e-12, %v259_v54 }
 0x22a   :  { %5613 = vrsqrt.f32 %v261_v55  ;;  %v367_v55 = vrot.slane %v341_v22, %v366_v51 }
 0x230   :  { %v5612_v56 = vpop.eup %5611 }
 0x231   :  { %v264_v57 = vmul.f32 %v5612_v56, %v6326_v17  ;;  %v5328_v17 = vld [vmem:[#allocation6 + $0x160] ss:$24 sps:$4 sm:$0xff]  }
 0x233   :  { %v272_v61 = vmul.f32 %v4554_v58, %v264_v57 }
 0x234   :  { %v5614_v59 = vpop.eup %5613 }
 0x235   :  { %v265_v60 = vmul.f32 %v5614_v59, %v6330_v21  ;;  %v6338_v0 = vadd.f32 %v4555_v62, %v272_v61  ;;  %v6351_v21 = vsub.s32 1, %v6348_v20 }
 0x237   :  { %v273_v63 = vmul.f32 %v4554_v58, %v265_v60  ;;  %v351_v25 = vrot.slane %v341_v22, %v6351_v21  ;;  %v282_v60 = vld [vmem:[%s7055_s27] sm:$0x3] }
 0x238   :  { %v283_v61 = vsub.f32 1.0, %v282_v60 }
 0x239   :  { %v6340_v1 = vadd.f32 %v4555_v62, %v273_v63 }
 0x23a   :  { %v6400_v62 = vmul.f32 -1e+09, %v283_v61 }
 0x23b   :  { %v342_v3 = vpack.c.bf16 %v6340_v1, %v6338_v0 }
 0x23c   :  { %v6404_v63 = vrot.slane %v6400_v62, %v6357_v23 }
 0x23d   :  { %647 = vmatmul.mubr.bf16.vlgmr.msra.gmra.mrb[0].mxu0 %v342_v3  ;;  %690 = vmatmul.mubr.bf16.vlgmr.msra.gmra.mrb[0].mxu1 %v342_v3 }
 0x23e   :  { %701 = vmatpush1.bf16.msra.mxu0 %v5307_v2  ;;  %732 = vmatprep.mubr.bf16.mxu0 %v6026_v42 }
 0x23f   :  { %702 = vmatprep.subr.bf16.mxu0 %v5312_v4  ;;  %5103 = vmatprep.mubr.msk.bf16.mxu1 %vm6028_vm0, %v6027_v18 }
 0x242   :  { %703 = vmatpush1.bf16.msra.mxu0 %v5310_v5 }
 0x243   :  { %704 = vmatprep.subr.bf16.mxu0 %v5315_v6 }
 0x246   :  { %705 = vmatpush1.bf16.msra.mxu0 %v5313_v7 }
 0x247   :  { %706 = vmatprep.subr.bf16.mxu0 %v5318_v8 }
 0x24a   :  { %707 = vmatpush1.bf16.msra.mxu0 %v5316_v9 }
 0x24b   :  { %708 = vmatprep.subr.bf16.mxu0 %v5321_v10 }
 0x24e   :  { %709 = vmatpush1.bf16.msra.mxu0 %v5319_v11 }
 0x24f   :  { %710 = vmatprep.subr.bf16.mxu0 %v5324_v12 }
 0x252   :  { %711 = vmatpush1.bf16.msra.mxu0 %v5322_v13 }
 0x253   :  { %712 = vmatprep.subr.bf16.mxu0 %v5327_v14 }
 0x256   :  { %713 = vmatpush1.bf16.msra.mxu0 %v5325_v15 }
 0x257   :  { %714 = vmatprep.subr.bf16.mxu0 %v5330_v16 }
 0x25a   :  { %715 = vmatpush1.bf16.msra.mxu0 %v5328_v17 }
 0x25d   :  { %733 = vmatmul.mubr.bf16.vlgmr.msra.gmra.mrb[4].mxu0 %v342_v3 }
 0x310   :  { %v648_v27 = vpop.f32.mrb[0].mxu0  ;;  %v691_v28 = vpop.f32.mrb[0].mxu1 }
 0x311   :  { %v650_v31 = vpop.f32.mrb[1].mxu0  ;;  %v6368_v32 = vpop.f32.mrb[1].mxu1  ;;  %v692_v45 = vadd.f32 %v691_v28, %v355_v30  ;;  %v649_v46 = vadd.f32 %v648_v27, %v347_v29 }
 0x312   :  { %v651_v33 = vadd.f32 %v650_v31, %v351_v25  ;;  %v652_v35 = vpop.f32.mrb[2].mxu0  ;;  %v695_v36 = vpop.f32.mrb[2].mxu1  ;;  %v694_v27 = vadd.f32 %v6368_v32, %v6371_v34 }
 0x313   :  { %v6373_v37 = vadd.f32 %v652_v35, %v347_v29  ;;  %v6375_v38 = vadd.f32 %v695_v36, %v355_v30  ;;  %v654_v39 = vpop.f32.mrb[3].mxu0  ;;  %v697_v40 = vpop.f32.mrb[3].mxu1  ;;  %v745_v47 = vpack.c.bf16 %v692_v45, %v692_v45  ;;  %v743_v48 = vpack.c.bf16 %v649_v46, %v649_v46 }
 0x314   :  { %v744_v41 = vpack.c.bf16 %v651_v33, %v651_v33  ;;  %v6377_v43 = vadd.f32 %v654_v39, %v351_v25  ;;  %v6380_v44 = vadd.f32 %v697_v40, %v6371_v34  ;;  %v746_v29 = vpack.c.bf16 %v694_v27, %v694_v27 }
 0x315   :  { %v809_v49 = vsel %vm807_vm1, %v745_v47, 0  ;;  %v953_v61 = vpack.c.bf16 %v6375_v38, %v6375_v38  ;;  %v6442_v38 = vrot.slane %v6400_v62, %v6351_v21 }
 0x316   :  { %5102 = vmatpush3.bf16.xpose.msra.mxu1 %v744_v41  ;;  %v952_v60 = vpack.c.bf16 %v6377_v43, %v6377_v43 }
 0x317   :  { %5107 = vmatprep.subr.bf16.mxu1 %v6027_v18 }
 0x31d   :  { %5104 = vmatmul.mubr.bf16.vlgmr.msra.gmra.mrb[4].mxu1 %v743_v48 }
 0x31e   :  { %5108 = vmatpush3.bf16.msra.mxu1 %v809_v49  ;;  %5109 = vmatprep.mubr.msk.bf16.mxu1 %vm6028_vm0, %v6027_v18 }
 0x31f   :  { %5113 = vmatprep.subr.bf16.mxu1 %v6027_v18 }
 0x330   :  { %v734_v52 = vpop.f32.mrb[4].mxu0 }
 0x331   :  { %v736_v54 = vpop.f32.mrb[5].mxu0  ;;  %v735_v16 = vadd.f32 %v734_v52, %v363_v53 }
 0x332   :  { %v738_v56 = vpop.f32.mrb[6].mxu0  ;;  %v737_v25 = vadd.f32 %v736_v54, %v367_v55 }
 0x333   :  { %v6393_v57 = vadd.f32 %v738_v56, %v363_v53  ;;  %v740_v58 = vpop.f32.mrb[7].mxu0  ;;  %v747_v22 = vpack.c.bf16 %v735_v16, %v735_v16 }
 0x334   :  { %v6395_v59 = vadd.f32 %v740_v58, %v367_v55  ;;  %v748_v28 = vpack.c.bf16 %v737_v25, %v737_v25 }
 0x335   :  { %v955_v27 = vpack.c.bf16 %v6393_v57, %v6393_v57 }
 0x336   :  { %v909_v30 = vsel %vm807_vm1, %v748_v28, 0  ;;  %v956_v28 = vpack.c.bf16 %v6395_v59, %v6395_v59 }
 0x3f0   :  { %v783_v2 = vpop.f32.mrb[4].mxu1 }
 0x3f1   :  { %v789_v3 = vmul.f32 0.125, %v783_v2  ;;  %v5105_v4 = vpop.f32.mrb[5].mxu1  ;;  %v951_v2 = vpack.c.bf16 %v6373_v37, %v6373_v37 }
 0x3f2   :  { %v786_v5 = vpop.f32.mrb[6].mxu1 }
 0x3f3   :  { %v5106_v6 = vpop.f32.mrb[7].mxu1  ;;  %v790_v7 = vadd.f32 %v789_v3, %v6404_v63  ;;  %v1015_v3 = vsel %vm807_vm1, %v953_v61, 0  ;;  %v5337_v61 = vld [vmem:[%s7022_s8 + $0x58] sm:$0xff]  }
 0x3f5   :  { %v792_v8 = vsel %vm791_vm2, %v790_v7, -inf }
 0x3f6   :  { %793 = vmax.xlane.f32.xlu0 %v792_v8 }
 0x483   :  { %v794_v9 = vpop.xlane.xlu0 %793 }
 0x484   :  { %v795_v10 = vsub.f32 %v790_v7, %v794_v9 }
 0x486   :  { %v796_v11 = vmul.f32 1.442695, %v795_v10 }
 0x488   :  { %5615 = vpow2.f32 %v796_v11 }
 0x492   :  { %v5616_v12 = vpop.eup %5615 }
 0x493   :  { %v798_v13 = vsel %vm791_vm2, %v5616_v12, 0.0 }
 0x494   :  { %799 = vadd.xlane.f32.xlu1 %v798_v13 }
 0x521   :  { %v800_v14 = vpop.xlane.xlu1 %799 }
 0x522   :  { %5617 = vrcp.f32 %v800_v14 }
 0x52c   :  { %v5618_v15 = vpop.eup %5617 }
 0x52d   :  { %v802_v17 = vmul.f32 %v5618_v15, %v5616_v12 }
 0x52f   :  { %v803_v19 = vpack.c.bf16 %v802_v17, %v802_v17 }
 0x531   :  { %5110 = vmatmul.mubr.msk.bf16.vlgmr.msra.gmra.mrb[8].mxu1 %vm791_vm2, %v803_v19 }
 0x532   :  { %5114 = vmatpush3.bf16.xpose.msra.mxu1 %v747_v22  ;;  %5115 = vmatprep.mubr.msk.bf16.mxu1 %vm6028_vm0, %v6027_v18 }
 0x533   :  { %5119 = vmatprep.subr.bf16.mxu1 %v6027_v18 }
 0x539   :  { %5116 = vmatmul.mubr.bf16.vlgmr.msra.gmra.mrb[12].mxu1 %v746_v29  ;;  %v954_v29 = vpack.c.bf16 %v6380_v44, %v6380_v44 }
 0x53a   :  { %5120 = vmatpush3.bf16.msra.mxu1 %v909_v30  ;;  %5121 = vmatprep.mubr.msk.bf16.mxu1 %vm6028_vm0, %v6027_v18  ;;  %v1115_v30 = vsel %vm807_vm1, %v956_v28, 0 }
 0x53b   :  { %5125 = vmatprep.subr.bf16.mxu1 %v6027_v18 }
 0x604   :  { %v6419_v31 = vpop.f32.mrb[8].mxu1 }
 0x605   :  { %v5111_v33 = vpop.f32.mrb[9].mxu1 }
 0x606   :  { %v848_v35 = vpop.f32.mrb[10].mxu1 }
 0x607   :  { %v5112_v36 = vpop.f32.mrb[11].mxu1 }
 0x60c   :  { %v885_v39 = vpop.f32.mrb[12].mxu1 }
 0x60d   :  { %v891_v32 = vmul.f32 0.125, %v885_v39  ;;  %v5117_v34 = vpop.f32.mrb[13].mxu1 }
 0x60e   :  { %v888_v40 = vpop.f32.mrb[14].mxu1 }
 0x60f   :  { %v5118_v41 = vpop.f32.mrb[15].mxu1  ;;  %v892_v45 = vadd.f32 %v891_v32, %v6404_v63 }
 0x611   :  { %v893_v46 = vsel %vm791_vm2, %v892_v45, -inf }
 0x612   :  { %894 = vmax.xlane.f32.xlu0 %v893_v46 }
 0x69f   :  { %v895_v47 = vpop.xlane.xlu0 %894 }
 0x6a0   :  { %v896_v48 = vsub.f32 %v892_v45, %v895_v47 }
 0x6a2   :  { %v897_v49 = vmul.f32 1.442695, %v896_v48 }
 0x6a4   :  { %5619 = vpow2.f32 %v897_v49 }
 0x6ae   :  { %v5620_v52 = vpop.eup %5619 }
 0x6af   :  { %v899_v53 = vsel %vm791_vm2, %v5620_v52, 0.0 }
 0x6b0   :  { %900 = vadd.xlane.f32.xlu1 %v899_v53  ;;  %v5331_v53 = vld [vmem:[%s7022_s8 + $0x40] sm:$0xff]  }
 0x6b1   :  { %4935 = vmatprep.subr.bf16.mxu0 %v5331_v53  ;;  %v5364_v53 = vld [vmem:[#allocation7 + $0x4c] ss:$16 sps:$4 sm:$0xff]  }
 0x73d   :  { %v901_v54 = vpop.xlane.xlu1 %900 }
 0x73e   :  { %5621 = vrcp.f32 %v901_v54  ;;  %v5332_v54 = vld [vmem:[%s7022_s8] sm:$0xff]  }
 0x73f   :  { %4936 = vmatpush3.bf16.msra.mxu0 %v5332_v54  ;;  %v5359_v54 = vld [vmem:[#allocation7 + $0x40] ss:$16 sps:$4 sm:$0xff]  }
 0x748   :  { %v5622_v55 = vpop.eup %5621 }
 0x749   :  { %v903_v56 = vmul.f32 %v5622_v55, %v5620_v52  ;;  %v5333_v55 = vld [vmem:[%s7022_s8 + $0x48] sm:$0xff]  }
 0x74a   :  { %4937 = vmatprep.subr.bf16.mxu0 %v5333_v55  ;;  %v5362_v55 = vld [vmem:[#allocation7 + $0x48] ss:$16 sps:$4 sm:$0xff]  }
 0x74b   :  { %v904_v58 = vpack.c.bf16 %v903_v56, %v903_v56  ;;  %v5334_v56 = vld [vmem:[%s7022_s8 + $0x8] sm:$0xff]  }
 0x74c   :  { %4938 = vmatpush3.bf16.msra.mxu0 %v5334_v56  ;;  %v5367_v56 = vld [vmem:[#allocation7 + $0x64] ss:$16 sps:$4 sm:$0xff]  }
 0x74d   :  { %5122 = vmatmul.mubr.msk.bf16.vlgmr.msra.gmra.mrb[16].mxu1 %vm791_vm2, %v904_v58  ;;  %v5335_v58 = vld [vmem:[%s7022_s8 + $0x50] sm:$0xff]  }
 0x74e   :  { %5126 = vmatpush3.bf16.xpose.msra.mxu1 %v952_v60  ;;  %5127 = vmatprep.mubr.msk.bf16.mxu1 %vm6028_vm0, %v6027_v18  ;;  %v5336_v60 = vld [vmem:[%s7022_s8 + $0x10] sm:$0xff]  }
 0x74f   :  { %5131 = vmatprep.subr.bf16.mxu1 %v6027_v18  ;;  %4939 = vmatprep.subr.bf16.mxu0 %v5335_v58  ;;  %v5370_v58 = vld [vmem:[#allocation7 + $0x6c] ss:$16 sps:$4 sm:$0xff]  }
 0x750   :  { %4940 = vmatpush3.bf16.msra.mxu0 %v5336_v60  ;;  %v5365_v60 = vld [vmem:[#allocation7 + $0x60] ss:$16 sps:$4 sm:$0xff]  }
 0x751   :  { %4941 = vmatprep.subr.bf16.mxu0 %v5337_v61  ;;  %v5368_v61 = vld [vmem:[#allocation7 + $0x68] ss:$16 sps:$4 sm:$0xff]  }
 0x755   :  { %5128 = vmatmul.mubr.bf16.vlgmr.msra.gmra.mrb[20].mxu1 %v951_v2  ;;  %v5338_v2 = vld [vmem:[%s7022_s8 + $0x18] sm:$0xff]  }
 0x756   :  { %5132 = vmatpush3.bf16.msra.mxu1 %v1015_v3  ;;  %5133 = vmatprep.mubr.msk.bf16.mxu1 %vm6028_vm0, %v6027_v18  ;;  %v5339_v3 = vld [vmem:[%s7022_s8 + $0x60] sm:$0xff]  }
 0x757   :  { %5137 = vmatprep.subr.bf16.mxu1 %v6027_v18  ;;  %4942 = vmatpush3.bf16.msra.mxu0 %v5338_v2  ;;  %v5373_v2 = vld [vmem:[#allocation7 + $0x84] ss:$16 sps:$4 sm:$0xff]  }
 0x758   :  { %4943 = vmatprep.subr.bf16.mxu0 %v5339_v3  ;;  %v5376_v3 = vld [vmem:[#allocation7 + $0x8c] ss:$16 sps:$4 sm:$0xff]  }
 0x820   :  { %v6438_v43 = vpop.f32.mrb[16].mxu1 }
 0x821   :  { %v5123_v4 = vpop.f32.mrb[17].mxu1 }
 0x822   :  { %v948_v5 = vpop.f32.mrb[18].mxu1  ;;  %v5340_v4 = vld [vmem:[%s7022_s8 + $0x20] sm:$0xff]  }
 0x823   :  { %v5124_v6 = vpop.f32.mrb[19].mxu1  ;;  %v5341_v5 = vld [vmem:[%s7022_s8 + $0x68] sm:$0xff]   ;;  %4944 = vmatpush3.bf16.msra.mxu0 %v5340_v4  ;;  %v5371_v4 = vld [vmem:[#allocation7 + $0x80] ss:$16 sps:$4 sm:$0xff]  }
 0x824   :  { %v5342_v6 = vld [vmem:[%s7022_s8 + $0x28] sm:$0xff]   ;;  %4945 = vmatprep.subr.bf16.mxu0 %v5341_v5 }
 0x825   :  { %v5374_v5 = vld [vmem:[#allocation7 + $0x88] ss:$16 sps:$4 sm:$0xff]  }
 0x827   :  { %4946 = vmatpush3.bf16.msra.mxu0 %v5342_v6  ;;  %v5379_v6 = vld [vmem:[#allocation7 + $0xa4] ss:$16 sps:$4 sm:$0xff]  }
 0x828   :  { %v991_v7 = vpop.f32.mrb[20].mxu1 }
 0x829   :  { %v997_v37 = vmul.f32 0.125, %v991_v7  ;;  %v5129_v8 = vpop.f32.mrb[21].mxu1  ;;  %v5343_v7 = vld [vmem:[%s7022_s8 + $0x70] sm:$0xff]  }
 0x82a   :  { %v994_v9 = vpop.f32.mrb[22].mxu1  ;;  %4947 = vmatprep.subr.bf16.mxu0 %v5343_v7  ;;  %v5382_v7 = vld [vmem:[#allocation7 + $0xac] ss:$16 sps:$4 sm:$0xff]  }
 0x82b   :  { %v5130_v10 = vpop.f32.mrb[23].mxu1  ;;  %v998_v11 = vadd.f32 %v997_v37, %v6442_v38  ;;  %v5344_v37 = vld [vmem:[%s7022_s8 + $0x30] sm:$0xff]  }
 0x82c   :  { %4948 = vmatpush3.bf16.msra.mxu0 %v5344_v37  ;;  %v5377_v37 = vld [vmem:[#allocation7 + $0xa0] ss:$16 sps:$4 sm:$0xff]  }
 0x82d   :  { %v999_v12 = vsel %vm791_vm2, %v998_v11, -inf }
 0x82e   :  { %1000 = vmax.xlane.f32.xlu0 %v999_v12  ;;  %v5345_v12 = vld [vmem:[%s7022_s8 + $0x78] sm:$0xff]  }
 0x82f   :  { %4949 = vmatprep.subr.bf16.mxu0 %v5345_v12  ;;  %v5386_v12 = vld [vmem:[#allocation7 + $0xc8] ss:$16 sps:$4 sm:$0xff]  }
 0x8bb   :  { %v1001_v13 = vpop.xlane.xlu0 %1000 }
 0x8bc   :  { %v1002_v14 = vsub.f32 %v998_v11, %v1001_v13  ;;  %v5346_v13 = vld [vmem:[%s7022_s8 + $0x38] sm:$0xff]  }
 0x8bd   :  { %4950 = vmatpush3.bf16.msra.mxu0 %v5346_v13  ;;  %v5391_v13 = vld [vmem:[#allocation7 + $0xe4] ss:$16 sps:$4 sm:$0xff]  }
 0x8be   :  { %v1003_v15 = vmul.f32 1.442695, %v1002_v14 }
 0x8c0   :  { %5623 = vpow2.f32 %v1003_v15 }
 0x8ca   :  { %v5624_v16 = vpop.eup %5623 }
 0x8cb   :  { %v1005_v17 = vsel %vm791_vm2, %v5624_v16, 0.0 }
 0x8cc   :  { %1006 = vadd.xlane.f32.xlu1 %v1005_v17 }
 0x959   :  { %v1007_v62 = vpop.xlane.xlu1 %1006 }
 0x95a   :  { %5625 = vrcp.f32 %v1007_v62 }
 0x964   :  { %v5626_v19 = vpop.eup %5625 }
 0x965   :  { %v1009_v22 = vmul.f32 %v5626_v19, %v5624_v16 }
 0x967   :  { %v1010_v25 = vpack.c.bf16 %v1009_v22, %v1009_v22  ;;  %v4608_v22 = vld [vmem:[%s7023_s9] ss:$0 sm:$0xff] }
 0x969   :  { %5134 = vmatmul.mubr.msk.bf16.vlgmr.msra.gmra.mrb[24].mxu1 %vm791_vm2, %v1010_v25 }
 0x96a   :  { %5138 = vmatpush3.bf16.xpose.msra.mxu1 %v955_v27  ;;  %5139 = vmatprep.mubr.msk.bf16.mxu1 %vm6028_vm0, %v6027_v18 }
 0x96b   :  { %5143 = vmatprep.subr.bf16.mxu1 %v6027_v18 }
 0x971   :  { %5140 = vmatmul.mubr.bf16.vlgmr.msra.gmra.mrb[28].mxu1 %v954_v29 }
 0x972   :  { %5144 = vmatpush3.bf16.msra.mxu1 %v1115_v30  ;;  %5145 = vmatprep.mubr.msk.bf16.mxu1 %vm6028_vm0, %v6027_v18 }
 0xa3c   :  { %v6460_v57 = vpop.f32.mrb[24].mxu1 }
 0xa3d   :  { %v1190_v33 = vpack.c.bf16 %v6460_v57, %v6419_v31  ;;  %v5135_v35 = vpop.f32.mrb[25].mxu1  ;;  %v5347_v57 = vld [vmem:[#allocation7] ss:$16 sps:$4 sm:$0xff]  }
 0xa3e   :  { %v1054_v36 = vpop.f32.mrb[26].mxu1 }
 0xa3f   :  { %v5136_v39 = vpop.f32.mrb[27].mxu1 }
 0xa40   :  { %v5350_v39 = vld [vmem:[#allocation7 + $0x8] ss:$16 sps:$4 sm:$0xff]  }
 0xa44   :  { %v1091_v32 = vpop.f32.mrb[28].mxu1 }
 0xa45   :  { %v1097_v59 = vmul.f32 0.125, %v1091_v32  ;;  %v5141_v34 = vpop.f32.mrb[29].mxu1  ;;  %v5352_v32 = vld [vmem:[#allocation7 + $0xc] ss:$16 sps:$4 sm:$0xff]  }
 0xa46   :  { %v1094_v40 = vpop.f32.mrb[30].mxu1  ;;  %v5358_v34 = vld [vmem:[#allocation7 + $0x2c] ss:$16 sps:$4 sm:$0xff]   ;;  %1635 = vmatprep.subr.bf16.mxu0 %v5352_v32 }
 0xa47   :  { %v5142_v44 = vpop.f32.mrb[31].mxu1  ;;  %v1098_v41 = vadd.f32 %v1097_v59, %v6442_v38  ;;  %v5355_v59 = vld [vmem:[#allocation7 + $0x24] ss:$16 sps:$4 sm:$0xff]   ;;  %v5353_v40 = vld [vmem:[#allocation7 + $0x20] ss:$16 sps:$4 sm:$0xff]  }
 0xa48   :  { %v5356_v44 = vld [vmem:[#allocation7 + $0x28] ss:$16 sps:$4 sm:$0xff]  }
 0xa49   :  { %v1099_v45 = vsel %vm791_vm2, %v1098_v41, -inf }
 0xa4a   :  { %1100 = vmax.xlane.f32.xlu0 %v1099_v45 }
 0xad7   :  { %v1101_v46 = vpop.xlane.xlu0 %1100 }
 0xad8   :  { %v1102_v47 = vsub.f32 %v1098_v41, %v1101_v46 }
 0xada   :  { %v1103_v48 = vmul.f32 1.442695, %v1102_v47 }
 0xadc   :  { %5627 = vpow2.f32 %v1103_v48 }
 0xae6   :  { %v5628_v49 = vpop.eup %5627 }
 0xae7   :  { %v1105_v52 = vsel %vm791_vm2, %v5628_v49, 0.0 }
 0xae8   :  { %1106 = vadd.xlane.f32.xlu1 %v1105_v52  ;;  %v5361_v52 = vld [vmem:[#allocation7 + $0x44] ss:$16 sps:$4 sm:$0xff]  }
 0xb75   :  { %v1107_v8 = vpop.xlane.xlu1 %1106 }
 0xb76   :  { %5629 = vrcp.f32 %v1107_v8  ;;  %v5380_v8 = vld [vmem:[#allocation7 + $0xa8] ss:$16 sps:$4 sm:$0xff]  }
 0xb80   :  { %v5630_v9 = vpop.eup %5629 }
 0xb81   :  { %v1109_v10 = vmul.f32 %v5630_v9, %v5628_v49  ;;  %v5385_v9 = vld [vmem:[#allocation7 + $0xc4] ss:$16 sps:$4 sm:$0xff]  }
 0xb83   :  { %v1110_v11 = vpack.c.bf16 %v1109_v10, %v1109_v10  ;;  %v5388_v10 = vld [vmem:[#allocation7 + $0xcc] ss:$16 sps:$4 sm:$0xff]  }
 0xb85   :  { %5146 = vmatmul.mubr.msk.bf16.vlgmr.msra.gmra.mrb[32].mxu1 %vm791_vm2, %v1110_v11  ;;  %v5383_v11 = vld [vmem:[#allocation7 + $0xc0] ss:$16 sps:$4 sm:$0xff]  }
 0xb86   :  { %1624 = vmatprep.mubr.bf16.mxu1 %v6026_v42 }
 0xc58   :  { %v1151_v14 = vpop.f32.mrb[32].mxu1 }
 0xc59   :  { %v1191_v15 = vpack.c.bf16 %v1151_v14, %v6438_v43  ;;  %v5147_v16 = vpop.f32.mrb[33].mxu1  ;;  %v5394_v14 = vld [vmem:[#allocation7 + $0xec] ss:$16 sps:$4 sm:$0xff]  }
 0xc5a   :  { %v1154_v17 = vpop.f32.mrb[34].mxu1  ;;  %v5392_v16 = vld [vmem:[#allocation7 + $0xe8] ss:$16 sps:$4 sm:$0xff]  }
 0xc5b   :  { %v5148_v62 = vpop.f32.mrb[35].mxu1  ;;  %1326 = vmatprep.mubr.bf16.mxu0 %v1191_v15  ;;  %v5389_v15 = vld [vmem:[#allocation7 + $0xe0] ss:$16 sps:$4 sm:$0xff]  }
 0xc5c   :  { %1327 = vmatmul.mubr.bf16.vlgmr.msra.gmra.mrb[8].mxu0 %v1190_v33  ;;  %v5349_v33 = vld [vmem:[#allocation7 + $0x4] ss:$16 sps:$4 sm:$0xff]  }
 0xc5d   :  { %1667 = vmatprep.mubr.bf16.mxu0 %v6026_v42  ;;  %1592 = vmatprep.subr.bf16.mxu1 %v5349_v33 }
 0xc5e   :  { %1593 = vmatpush1.bf16.msra.mxu1 %v5347_v57  ;;  %1636 = vmatpush1.bf16.msra.mxu0 %v5350_v39 }
 0xc5f   :  { %1594 = vmatprep.subr.bf16.mxu1 %v5355_v59  ;;  %1637 = vmatprep.subr.bf16.mxu0 %v5358_v34  ;;  %v5395_v59 = vld [vmem:[#allocation9 + $0x40] sm:$0xff]  }
 0xc60   :  { %v5396_v34 = vld [vmem:[#allocation9 + $0xc0] sm:$0xff]  }
 0xc62   :  { %1595 = vmatpush1.bf16.msra.mxu1 %v5353_v40  ;;  %1638 = vmatpush1.bf16.msra.mxu0 %v5356_v44  ;;  %v5397_v40 = vld [vmem:[#allocation9] sm:$0xff]  }
 0xc63   :  { %1596 = vmatprep.subr.bf16.mxu1 %v5361_v52  ;;  %1639 = vmatprep.subr.bf16.mxu0 %v5364_v53  ;;  %v5398_v44 = vld [vmem:[#allocation9 + $0x80] sm:$0xff]   ;;  %v5407_v52 = vld [vmem:[#allocation9 + $0x58] sm:$0xff]  }
 0xc64   :  { %v5408_v53 = vld [vmem:[#allocation9 + $0xd8] sm:$0xff]  }
 0xc66   :  { %1597 = vmatpush1.bf16.msra.mxu1 %v5359_v54  ;;  %1640 = vmatpush1.bf16.msra.mxu0 %v5362_v55  ;;  %v5409_v54 = vld [vmem:[#allocation9 + $0x18] sm:$0xff]  }
 0xc67   :  { %1598 = vmatprep.subr.bf16.mxu1 %v5367_v56  ;;  %1641 = vmatprep.subr.bf16.mxu0 %v5370_v58  ;;  %v5410_v55 = vld [vmem:[#allocation9 + $0x98] sm:$0xff]   ;;  %v5411_v56 = vld [vmem:[#allocation9 + $0x60] sm:$0xff]  }
 0xc68   :  { %v5412_v58 = vld [vmem:[#allocation9 + $0xe0] sm:$0xff]  }
 0xc6a   :  { %1599 = vmatpush1.bf16.msra.mxu1 %v5365_v60  ;;  %1642 = vmatpush1.bf16.msra.mxu0 %v5368_v61  ;;  %v5413_v60 = vld [vmem:[#allocation9 + $0x20] sm:$0xff]  }
 0xc6b   :  { %1600 = vmatprep.subr.bf16.mxu1 %v5373_v2  ;;  %1643 = vmatprep.subr.bf16.mxu0 %v5376_v3  ;;  %v5414_v61 = vld [vmem:[#allocation9 + $0xa0] sm:$0xff]   ;;  %v5415_v2 = vld [vmem:[#allocation9 + $0x68] sm:$0xff]  }
 0xc6c   :  { %v5416_v3 = vld [vmem:[#allocation9 + $0xe8] sm:$0xff]  }
 0xc6e   :  { %1601 = vmatpush1.bf16.msra.mxu1 %v5371_v4  ;;  %1644 = vmatpush1.bf16.msra.mxu0 %v5374_v5  ;;  %v5417_v4 = vld [vmem:[#allocation9 + $0x28] sm:$0xff]  }
 0xc6f   :  { %1602 = vmatprep.subr.bf16.mxu1 %v5379_v6  ;;  %1645 = vmatprep.subr.bf16.mxu0 %v5382_v7  ;;  %v5418_v5 = vld [vmem:[#allocation9 + $0xa8] sm:$0xff]   ;;  %v5419_v6 = vld [vmem:[#allocation9 + $0x70] sm:$0xff]  }
 0xc70   :  { %v5420_v7 = vld [vmem:[#allocation9 + $0xf0] sm:$0xff]  }
 0xc72   :  { %1603 = vmatpush1.bf16.msra.mxu1 %v5377_v37  ;;  %1646 = vmatpush1.bf16.msra.mxu0 %v5380_v8  ;;  %v5421_v37 = vld [vmem:[#allocation9 + $0x30] sm:$0xff]  }
 0xc73   :  { %1604 = vmatprep.subr.bf16.mxu1 %v5385_v9  ;;  %1647 = vmatprep.subr.bf16.mxu0 %v5388_v10  ;;  %v5422_v8 = vld [vmem:[#allocation9 + $0xb0] sm:$0xff]   ;;  %v5423_v9 = vld [vmem:[#allocation9 + $0x78] sm:$0xff]  }
 0xc74   :  { %v5424_v10 = vld [vmem:[#allocation9 + $0xf8] sm:$0xff]  }
 0xc76   :  { %1605 = vmatpush1.bf16.msra.mxu1 %v5383_v11  ;;  %1648 = vmatpush1.bf16.msra.mxu0 %v5386_v12  ;;  %v5425_v11 = vld [vmem:[#allocation9 + $0x38] sm:$0xff]  }
 0xc77   :  { %1606 = vmatprep.subr.bf16.mxu1 %v5391_v13  ;;  %1649 = vmatprep.subr.bf16.mxu0 %v5394_v14  ;;  %v5426_v12 = vld [vmem:[#allocation9 + $0xb8] sm:$0xff]  }
 0xc78   :  { %v1409_v13 = vld [vmem:[%s7025_s11] sm:$0xf] }
 0xc79   :  { %v1415_v14 = vrot.slane %v1409_v13, %v6357_v23 }
 0xc7a   :  { %1607 = vmatpush1.bf16.msra.mxu1 %v5389_v15  ;;  %1650 = vmatpush1.bf16.msra.mxu0 %v5392_v16  ;;  %v1423_v15 = vrot.slane %v1409_v13, %v6360_v24  ;;  %v1419_v16 = vrot.slane %v1409_v13, %v6351_v21 }
 0xc7b   :  { %4957 = vmatprep.subr.bf16.mxu1 %v5395_v59  ;;  %4979 = vmatprep.subr.bf16.mxu0 %v5396_v34 }
 0xd2f   :  { %v4951_v19 = vpop.f32.mrb[8].mxu0 }
 0xd30   :  { %v4952_v25 = vpop.f32.mrb[9].mxu0 }
 0xd31   :  { %v4953_v27 = vadd.f32 %v4952_v25, %v4951_v19  ;;  %v4954_v28 = vpop.f32.mrb[10].mxu0 }
 0xd32   :  { %v4955_v29 = vpop.f32.mrb[11].mxu0 }
 0xd33   :  { %v1329_v43 = vadd.f32 %v4953_v27, %v4608_v22  ;;  %v4956_v30 = vadd.f32 %v4955_v29, %v4954_v28  ;;  %v4625_v29 = vld [vmem:[%s7028_s14] ss:$0 sm:$0xff] }
 0xd35   :  { %v1332_v35 = vadd.f32 %v4956_v30, %v4608_v22  ;;  %v1335_v36 = vadd.f32 %v1329_v43, %v6338_v0 }
 0xd37   :  { %1339 = vadd.xlane.f32.xlu0 %v1335_v36  ;;  %v1336_v31 = vadd.f32 %v1332_v35, %v6340_v1 }
 0xd39   :  { %1341 = vadd.xlane.f32.xlu1 %v1336_v31 }
 0xdc4   :  { %v1340_v0 = vpop.xlane.xlu0 %1339 }
 0xdc5   :  { %v1343_v41 = vmul.f32 0.0078125, %v1340_v0  ;;  %v5399_v0 = vld [vmem:[#allocation9 + $0x48] sm:$0xff]  }
 0xdc6   :  { %v1342_v1 = vpop.xlane.xlu1 %1341 }
 0xdc7   :  { %v6527_v45 = vsub.f32 %v1335_v36, %v1343_v41  ;;  %v1344_v46 = vmul.f32 0.0078125, %v1342_v1  ;;  %v5400_v41 = vld [vmem:[#allocation9 + $0xc8] sm:$0xff]  }
 0xdc8   :  { %v5401_v1 = vld [vmem:[#allocation9 + $0x8] sm:$0xff]  }
 0xdc9   :  { %v6529_v47 = vsub.f32 %v1336_v31, %v1344_v46  ;;  %v1347_v48 = vmul.f32 %v6527_v45, %v6527_v45  ;;  %v4626_v31 = vld [vmem:[#allocation10] ss:$0 sm:$0xff]  ;;  %v5403_v46 = vld [vmem:[#allocation9 + $0x50] sm:$0xff]  }
 0xdcb   :  { %1349 = vadd.xlane.f32.xlu0 %v1347_v48  ;;  %v1348_v49 = vmul.f32 %v6529_v47, %v6529_v47  ;;  %v5405_v48 = vld [vmem:[#allocation9 + $0x10] sm:$0xff]  }
 0xdcd   :  { %1351 = vadd.xlane.f32.xlu1 %v1348_v49  ;;  %v5406_v49 = vld [vmem:[#allocation9 + $0x90] sm:$0xff]  }
 0xe58   :  { %v1350_v17 = vpop.xlane.xlu0 %1349 }
 0xe59   :  { %v1353_v62 = vmul.f32 0.0078125, %v1350_v17  ;;  %v1427_v17 = vrot.slane %v1409_v13, %v6364_v26 }
 0xe5a   :  { %v1352_v19 = vpop.xlane.xlu1 %1351 }
 0xe5b   :  { %v1355_v22 = vadd.f32 1e-12, %v1353_v62  ;;  %v1354_v25 = vmul.f32 0.0078125, %v1352_v19 }
 0xe5d   :  { %5631 = vrsqrt.f32 %v1355_v22  ;;  %v1356_v27 = vadd.f32 1e-12, %v1354_v25 }
 0xe5f   :  { %5633 = vrsqrt.f32 %v1356_v27 }
 0xe67   :  { %v5632_v28 = vpop.eup %5631 }
 0xe68   :  { %v1359_v43 = vmul.f32 %v5632_v28, %v6527_v45  ;;  %v5402_v45 = vld [vmem:[#allocation9 + $0x88] sm:$0xff]  }
 0xe69   :  { %v5634_v30 = vpop.eup %5633 }
 0xe6a   :  { %v1360_v35 = vmul.f32 %v5634_v30, %v6529_v47  ;;  %v1367_v36 = vmul.f32 %v4625_v29, %v1359_v43  ;;  %v5404_v47 = vld [vmem:[#allocation9 + $0xd0] sm:$0xff]  }
 0xe6c   :  { %v1368_v57 = vmul.f32 %v4625_v29, %v1360_v35  ;;  %v6540_v33 = vadd.f32 %v4626_v31, %v1367_v36 }
 0xe6e   :  { %v6542_v39 = vadd.f32 %v4626_v31, %v1368_v57 }
 0xe70   :  { %v1410_v32 = vpack.c.bf16 %v6542_v39, %v6540_v33 }
 0xe72   :  { %1625 = vmatmul.mubr.bf16.vlgmr.msra.gmra.mrb[36].mxu1 %v1410_v32  ;;  %1668 = vmatmul.mubr.bf16.vlgmr.msra.gmra.mrb[12].mxu0 %v1410_v32 }
 0xe73   :  { %4958 = vmatpush3.bf16.msra.mxu1 %v5397_v40  ;;  %4980 = vmatpush3.bf16.msra.mxu0 %v5398_v44 }
 0xe74   :  { %4959 = vmatprep.subr.bf16.mxu1 %v5399_v0  ;;  %4981 = vmatprep.subr.bf16.mxu0 %v5400_v41 }
 0xe77   :  { %4960 = vmatpush3.bf16.msra.mxu1 %v5401_v1  ;;  %4982 = vmatpush3.bf16.msra.mxu0 %v5402_v45 }
 0xe78   :  { %4961 = vmatprep.subr.bf16.mxu1 %v5403_v46  ;;  %4983 = vmatprep.subr.bf16.mxu0 %v5404_v47 }
 0xe7b   :  { %4962 = vmatpush3.bf16.msra.mxu1 %v5405_v48  ;;  %4984 = vmatpush3.bf16.msra.mxu0 %v5406_v49 }
 0xe7c   :  { %4963 = vmatprep.subr.bf16.mxu1 %v5407_v52  ;;  %4985 = vmatprep.subr.bf16.mxu0 %v5408_v53 }
 0xe7f   :  { %4964 = vmatpush3.bf16.msra.mxu1 %v5409_v54  ;;  %4986 = vmatpush3.bf16.msra.mxu0 %v5410_v55 }
 0xe80   :  { %4965 = vmatprep.subr.bf16.mxu1 %v5411_v56  ;;  %4987 = vmatprep.subr.bf16.mxu0 %v5412_v58 }
 0xe83   :  { %4966 = vmatpush3.bf16.msra.mxu1 %v5413_v60  ;;  %4988 = vmatpush3.bf16.msra.mxu0 %v5414_v61 }
 0xe84   :  { %4967 = vmatprep.subr.bf16.mxu1 %v5415_v2  ;;  %4989 = vmatprep.subr.bf16.mxu0 %v5416_v3 }
 0xe87   :  { %4968 = vmatpush3.bf16.msra.mxu1 %v5417_v4  ;;  %4990 = vmatpush3.bf16.msra.mxu0 %v5418_v5 }
 0xe88   :  { %4969 = vmatprep.subr.bf16.mxu1 %v5419_v6  ;;  %4991 = vmatprep.subr.bf16.mxu0 %v5420_v7 }
 0xe8b   :  { %4970 = vmatpush3.bf16.msra.mxu1 %v5421_v37  ;;  %4992 = vmatpush3.bf16.msra.mxu0 %v5422_v8 }
 0xe8c   :  { %4971 = vmatprep.subr.bf16.mxu1 %v5423_v9  ;;  %4993 = vmatprep.subr.bf16.mxu0 %v5424_v10 }
 0xe8f   :  { %4972 = vmatpush3.bf16.msra.mxu1 %v5425_v11  ;;  %4994 = vmatpush3.bf16.msra.mxu0 %v5426_v12 }
 0xf45   :  { %v1626_v62 = vpop.f32.mrb[36].mxu1  ;;  %v1669_v19 = vpop.f32.mrb[12].mxu0 }
 0xf46   :  { %v6553_v22 = vadd.f32 %v1626_v62, %v1415_v14  ;;  %v6555_v25 = vadd.f32 %v1669_v19, %v1423_v15  ;;  %v1628_v27 = vpop.f32.mrb[37].mxu1  ;;  %v1671_v28 = vpop.f32.mrb[13].mxu0 }
 0xf47   :  { %v6557_v29 = vadd.f32 %v1628_v27, %v1419_v16  ;;  %v6559_v43 = vadd.f32 %v1671_v28, %v1427_v17  ;;  %v1630_v30 = vpop.f32.mrb[38].mxu1  ;;  %v1673_v35 = vpop.f32.mrb[14].mxu0 }
 0xf48   :  { %v6562_v36 = vmul.f32 0.70710677, %v6553_v22  ;;  %v6565_v31 = vmul.f32 0.70710677, %v6555_v25  ;;  %v1632_v48 = vpop.f32.mrb[39].mxu1  ;;  %v1675_v49 = vpop.f32.mrb[15].mxu0  ;;  %v6577_v53 = vadd.f32 %v1630_v30, %v1415_v14  ;;  %v6579_v54 = vadd.f32 %v1673_v35, %v1423_v15 }
 0xf49   :  { %v6568_v57 = vmul.f32 0.70710677, %v6557_v29  ;;  %v6571_v32 = vmul.f32 0.70710677, %v6559_v43  ;;  %v6584_v58 = vadd.f32 %v1632_v48, %v1419_v16  ;;  %v6594_v6 = vadd.f32 %v1675_v49, %v1427_v17 }
 0xf4a   :  { %v1686_v59 = vand.u32 2147483647, %v6562_v36  ;;  %v1688_v34 = vand.u32 2147483647, %v6565_v31  ;;  %v6582_v56 = vmul.f32 0.70710677, %v6577_v53 }
 0xf4b   :  { %v1687_v40 = vand.u32 2147483647, %v6568_v57  ;;  %v1689_v44 = vand.u32 2147483647, %v6571_v32  ;;  %v6587_v60 = vmul.f32 0.70710677, %v6579_v54 }
 0xf4c   :  { %v1694_v0 = vmul.f32 0.3275911, %v1686_v59  ;;  %v1696_v41 = vmul.f32 0.3275911, %v1688_v34  ;;  %v1798_v61 = vsub.f32 0.0, %v1686_v59  ;;  %v1800_v4 = vsub.f32 0.0, %v1688_v34 }
 0xf4d   :  { %v1695_v1 = vmul.f32 0.3275911, %v1687_v40  ;;  %v1697_v47 = vmul.f32 0.3275911, %v1689_v44  ;;  %v1690_v2 = vand.u32 2147483647, %v6582_v56 }
 0xf4e   :  { %v1702_v45 = vadd.f32 1.0, %v1694_v0  ;;  %v1704_v46 = vadd.f32 1.0, %v1696_v41  ;;  %v6591_v3 = vmul.f32 0.70710677, %v6584_v58  ;;  %v1692_v5 = vand.u32 2147483647, %v6587_v60 }
 0xf4f   :  { %v1703_v52 = vadd.f32 1.0, %v1695_v1  ;;  %v1705_v55 = vadd.f32 1.0, %v1697_v47  ;;  %v1799_v7 = vsub.f32 0.0, %v1687_v40  ;;  %v1698_v37 = vmul.f32 0.3275911, %v1690_v2 }
 0xf50   :  { %5635 = vrcp.f32 %v1702_v45  ;;  %v1691_v8 = vand.u32 2147483647, %v6591_v3  ;;  %v1801_v9 = vsub.f32 0.0, %v1689_v44  ;;  %v1700_v10 = vmul.f32 0.3275911, %v1692_v5 }
 0xf51   :  { %5637 = vrcp.f32 %v1704_v46  ;;  %v1806_v11 = vmul.f32 %v1798_v61, %v1686_v59  ;;  %v1706_v12 = vadd.f32 1.0, %v1698_v37  ;;  %v1808_v14 = vmul.f32 %v1800_v4, %v1688_v34 }
 0xf52   :  { %5639 = vrcp.f32 %v1703_v52  ;;  %v1699_v13 = vmul.f32 0.3275911, %v1691_v8  ;;  %v1708_v15 = vadd.f32 1.0, %v1700_v10  ;;  %v6598_v16 = vmul.f32 0.70710677, %v6594_v6 }
 0xf53   :  { %5641 = vrcp.f32 %v1705_v55  ;;  %v1807_v19 = vmul.f32 %v1799_v7, %v1687_v40  ;;  %v1802_v17 = vsub.f32 0.0, %v1690_v2  ;;  %v1809_v35 = vmul.f32 %v1801_v9, %v1689_v44 }
 0xf54   :  { %5643 = vrcp.f32 %v1706_v12  ;;  %v1707_v27 = vadd.f32 1.0, %v1699_v13  ;;  %v6606_v59 = vand.u32 2147483647, %v6598_v16  ;;  %v1814_v34 = vmul.f32 1.442695, %v1806_v11 }
 0xf55   :  { %5645 = vrcp.f32 %v1708_v15  ;;  %v1804_v41 = vsub.f32 0.0, %v1692_v5  ;;  %v1818_v45 = vmul.f32 1.442695, %v1808_v14  ;;  %v1816_v48 = vmul.f32 1.442695, %v1807_v19 }
 0xf56   :  { %v1701_v40 = vmul.f32 0.3275911, %v6606_v59  ;;  %v1810_v49 = vmul.f32 %v1802_v17, %v1690_v2  ;;  %5647 = vrcp.f32 %v1707_v27  ;;  %v1820_v55 = vmul.f32 1.442695, %v1809_v35 }
 0xf57   :  { %5649 = vpow2.f32 %v1814_v34  ;;  %v1812_v37 = vmul.f32 %v1804_v41, %v1692_v5  ;;  %v1803_v9 = vsub.f32 0.0, %v1691_v8  ;;  %vm1846_vm3 = vcmp.ge.f32.partialorder %v6562_v36, 0.0 }
 0xf58   :  { %v1709_v61 = vadd.f32 1.0, %v1701_v40  ;;  %v1822_v13 = vmul.f32 1.442695, %v1810_v49  ;;  %vm1848_vm4 = vcmp.ge.f32.partialorder %v6565_v31, 0.0  ;;  %vm1847_vm5 = vcmp.ge.f32.partialorder %v6568_v57, 0.0 }
 0xf59   :  { %v1826_v5 = vmul.f32 1.442695, %v1812_v37  ;;  %vm1850_vm6 = vcmp.ge.f32.partialorder %v6582_v56, 0.0  ;;  %vm1852_vm7 = vcmp.ge.f32.partialorder %v6587_v60, 0.0  ;;  %vm1851_vm8 = vcmp.ge.f32.partialorder %v6591_v3, 0.0 }
 0xf5a   :  { %v6600_v62 = vpop.eup %5635  ;;  %5651 = vrcp.f32 %v1709_v61  ;;  %vm1849_vm9 = vcmp.ge.f32.partialorder %v6571_v32, 0.0  ;;  %vm1853_vm10 = vcmp.ge.f32.partialorder %v6598_v16, 0.0  ;;  %v1877_v32 = vmul.f32 0.5, %v6594_v6 }
 0xf5b   :  { %v6602_v28 = vpop.eup %5637  ;;  %v1726_v30 = vmul.f32 1.0614054, %v6600_v62  ;;  %5653 = vpow2.f32 %v1818_v45 }
 0xf5c   :  { %v1728_v0 = vmul.f32 1.0614054, %v6602_v28  ;;  %v6610_v46 = vpop.eup %5639  ;;  %5655 = vpow2.f32 %v1816_v48 }
 0xf5d   :  { %v4659_v1 = vadd.f32 -1.4531521, %v1726_v30  ;;  %v1727_v52 = vmul.f32 1.0614054, %v6610_v46  ;;  %v6614_v4 = vpop.eup %5641  ;;  %5657 = vpow2.f32 %v1820_v55  ;;  %v1811_v30 = vmul.f32 %v1803_v9, %v1691_v8 }
 0xf5e   :  { %v4661_v47 = vadd.f32 -1.4531521, %v1728_v0  ;;  %v1729_v12 = vmul.f32 1.0614054, %v6614_v4  ;;  %v6620_v17 = vpop.eup %5643  ;;  %5659 = vpow2.f32 %v1822_v13 }
 0xf5f   :  { %v1742_v44 = vmul.f32 %v6600_v62, %v4659_v1  ;;  %v4660_v11 = vadd.f32 -1.4531521, %v1727_v52  ;;  %v6623_v35 = vpop.eup %5645  ;;  %v1730_v1 = vmul.f32 1.0614054, %v6620_v17  ;;  %5661 = vpow2.f32 %v1826_v5 }
 0xf60   :  { %v1744_v7 = vmul.f32 %v6602_v28, %v4661_v47  ;;  %v4662_v19 = vadd.f32 -1.4531521, %v1729_v12  ;;  %v1732_v40 = vmul.f32 1.0614054, %v6623_v35  ;;  %v1805_v47 = vsub.f32 0.0, %v6606_v59  ;;  %v6631_v52 = vpop.eup %5647 }
 0xf61   :  { %v1750_v10 = vadd.f32 1.4214138, %v1742_v44  ;;  %v1743_v15 = vmul.f32 %v6610_v46, %v4660_v11  ;;  %v4663_v8 = vadd.f32 -1.4531521, %v1730_v1  ;;  %v5650_v12 = vpop.eup %5649 }
 0xf62   :  { %v1752_v2 = vadd.f32 1.4214138, %v1744_v7  ;;  %v1745_v41 = vmul.f32 %v6614_v4, %v4662_v19  ;;  %v4665_v61 = vadd.f32 -1.4531521, %v1732_v40  ;;  %v1824_v7 = vmul.f32 1.442695, %v1811_v30 }
 0xf63   :  { %v1758_v14 = vmul.f32 %v6600_v62, %v1750_v10  ;;  %v1751_v0 = vadd.f32 1.4214138, %v1743_v15  ;;  %v1746_v11 = vmul.f32 %v6620_v17, %v4663_v8  ;;  %v1813_v15 = vmul.f32 %v1805_v47, %v6606_v59 }
 0xf64   :  { %v1760_v27 = vmul.f32 %v6602_v28, %v1752_v2  ;;  %v1753_v44 = vadd.f32 1.4214138, %v1745_v41  ;;  %v1748_v13 = vmul.f32 %v6623_v35, %v4665_v61  ;;  %v6639_v19 = vpop.eup %5651  ;;  %5663 = vpow2.f32 %v1824_v7 }
 0xf65   :  { %v4667_v34 = vadd.f32 -0.28449672, %v1758_v14  ;;  %v1759_v49 = vmul.f32 %v6610_v46, %v1751_v0  ;;  %v1731_v14 = vmul.f32 1.0614054, %v6631_v52  ;;  %v5654_v0 = vpop.eup %5653  ;;  %v1733_v40 = vmul.f32 1.0614054, %v6639_v19 }
 0xf66   :  { %v4669_v45 = vadd.f32 -0.28449672, %v1760_v27  ;;  %v1761_v10 = vmul.f32 %v6614_v4, %v1753_v44  ;;  %v1756_v1 = vadd.f32 1.4214138, %v1748_v13 }
 0xf67   :  { %v1774_v48 = vmul.f32 %v6600_v62, %v4667_v34  ;;  %v4668_v9 = vadd.f32 -0.28449672, %v1759_v49  ;;  %v1754_v34 = vadd.f32 1.4214138, %v1746_v11 }
 0xf68   :  { %v1776_v55 = vmul.f32 %v6602_v28, %v4669_v45  ;;  %v4670_v30 = vadd.f32 -0.28449672, %v1761_v10  ;;  %v4664_v45 = vadd.f32 -1.4531521, %v1731_v14 }
 0xf69   :  { %v1782_v37 = vadd.f32 0.2548296, %v1774_v48  ;;  %v1775_v5 = vmul.f32 %v6610_v46, %v4668_v9  ;;  %v5656_v48 = vpop.eup %5655  ;;  %v1762_v47 = vmul.f32 %v6620_v17, %v1754_v34 }
 0xf6a   :  { %v1784_v2 = vadd.f32 0.2548296, %v1776_v55  ;;  %v1777_v59 = vmul.f32 %v6614_v4, %v4670_v30  ;;  %v5658_v8 = vpop.eup %5657  ;;  %v1764_v55 = vmul.f32 %v6623_v35, %v1756_v1  ;;  %v1747_v61 = vmul.f32 %v6631_v52, %v4664_v45 }
 0xf6b   :  { %v1790_v27 = vmul.f32 %v6600_v62, %v1782_v37  ;;  %v1783_v44 = vadd.f32 0.2548296, %v1775_v5  ;;  %v4666_v37 = vadd.f32 -1.4531521, %v1733_v40  ;;  %v4671_v10 = vadd.f32 -0.28449672, %v1762_v47  ;;  %v5660_v11 = vpop.eup %5659 }
 0xf6c   :  { %v1792_v41 = vmul.f32 %v6602_v28, %v1784_v2  ;;  %v1785_v9 = vadd.f32 0.2548296, %v1777_v59  ;;  %v4673_v2 = vadd.f32 -0.28449672, %v1764_v55  ;;  %v1755_v13 = vadd.f32 1.4214138, %v1747_v61  ;;  %v5662_v34 = vpop.eup %5661 }
 0xf6d   :  { %v1830_v49 = vmul.f32 %v5650_v12, %v1790_v27  ;;  %v1791_v28 = vmul.f32 %v6610_v46, %v1783_v44  ;;  %v1749_v12 = vmul.f32 %v6639_v19, %v4666_v37  ;;  %v1778_v5 = vmul.f32 %v6620_v17, %v4671_v10 }
 0xf6e   :  { %v1832_v62 = vmul.f32 %v5654_v0, %v1792_v41  ;;  %v1828_v30 = vmul.f32 1.442695, %v1813_v15  ;;  %v1780_v41 = vmul.f32 %v6623_v35, %v4673_v2  ;;  %v1763_v1 = vmul.f32 %v6631_v52, %v1755_v13  ;;  %v5664_v13 = vpop.eup %5663 }
 0xf6f   :  { %v1838_v14 = vsub.f32 1.0, %v1830_v49  ;;  %v1831_v0 = vmul.f32 %v5656_v48, %v1791_v28  ;;  %v1757_v46 = vadd.f32 1.4214138, %v1749_v12  ;;  %v1793_v45 = vmul.f32 %v6614_v4, %v1785_v9 }
 0xf70   :  { %v1840_v27 = vsub.f32 1.0, %v1832_v62  ;;  %v1786_v40 = vadd.f32 0.2548296, %v1778_v5  ;;  %v1870_v44 = vmul.f32 0.5, %v6553_v22  ;;  %v1788_v7 = vadd.f32 0.2548296, %v1780_v41 }
 0xf71   :  { %v4672_v59 = vadd.f32 -0.28449672, %v1763_v1  ;;  %v1854_v47 = vsub.f32 0.0, %v1838_v14  ;;  %5665 = vpow2.f32 %v1828_v30  ;;  %v1839_v15 = vsub.f32 1.0, %v1831_v0 }
 0xf72   :  { %v1856_v49 = vsub.f32 0.0, %v1840_v27  ;;  %v1794_v62 = vmul.f32 %v6620_v17, %v1786_v40  ;;  %v1796_v48 = vmul.f32 %v6623_v35, %v1788_v7  ;;  %v1765_v61 = vmul.f32 %v6639_v19, %v1757_v46 }
 0xf73   :  { %v1779_v55 = vmul.f32 %v6631_v52, %v4672_v59  ;;  %v1872_v37 = vmul.f32 0.5, %v6555_v25  ;;  %v1871_v4 = vmul.f32 0.5, %v6557_v29  ;;  %v1833_v28 = vmul.f32 %v5658_v8, %v1793_v45 }
 0xf74   :  { %v1834_v22 = vmul.f32 %v5660_v11, %v1794_v62  ;;  %v1836_v9 = vmul.f32 %v5662_v34, %v1796_v48  ;;  %v4674_v2 = vadd.f32 -0.28449672, %v1765_v61  ;;  %v1862_v17 = vsel %vm1846_vm3, %v1838_v14, %v1854_v47 }
 0xf75   :  { %v1787_v10 = vadd.f32 0.2548296, %v1779_v55  ;;  %v1864_v12 = vsel %vm1848_vm4, %v1840_v27, %v1856_v49  ;;  %v1855_v5 = vsub.f32 0.0, %v1839_v15  ;;  %v1841_v29 = vsub.f32 1.0, %v1833_v28 }
 0xf76   :  { %v1842_v35 = vsub.f32 1.0, %v1834_v22  ;;  %v1844_v30 = vsub.f32 1.0, %v1836_v9  ;;  %v1874_v11 = vmul.f32 0.5, %v6577_v53  ;;  %v1781_v36 = vmul.f32 %v6639_v19, %v4674_v2 }
 0xf77   :  { %v1795_v25 = vmul.f32 %v6631_v52, %v1787_v10  ;;  %v1878_v34 = vadd.f32 1.0, %v1862_v17  ;;  %v1880_v0 = vadd.f32 1.0, %v1864_v12  ;;  %v1863_v1 = vsel %vm1847_vm5, %v1839_v15, %v1855_v5 }
 0xf78   :  { %v1858_v8 = vsub.f32 0.0, %v1842_v35  ;;  %v1860_v14 = vsub.f32 0.0, %v1844_v30  ;;  %v1789_v27 = vadd.f32 0.2548296, %v1781_v36  ;;  %v1857_v53 = vsub.f32 0.0, %v1841_v29 }
 0xf79   :  { %v1835_v31 = vmul.f32 %v5664_v13, %v1795_v25  ;;  %v1876_v7 = vmul.f32 0.5, %v6579_v54  ;;  %v1886_v47 = vmul.f32 %v1878_v34, %v1870_v44  ;;  %v1888_v60 = vmul.f32 %v1880_v0, %v1872_v37 }
 0xf7a   :  { %v1866_v41 = vsel %vm1850_vm6, %v1842_v35, %v1858_v8  ;;  %v1868_v46 = vsel %vm1852_vm7, %v1844_v30, %v1860_v14  ;;  %v1797_v56 = vmul.f32 %v6639_v19, %v1789_v27  ;;  %v1879_v48 = vadd.f32 1.0, %v1863_v1 }
 0xf7b   :  { %v1882_v52 = vadd.f32 1.0, %v1866_v41  ;;  %v1843_v45 = vsub.f32 1.0, %v1835_v31  ;;  %v5666_v40 = vpop.eup %5665  ;;  %v1884_v59 = vadd.f32 1.0, %v1868_v46  ;;  %v1875_v28 = vmul.f32 0.5, %v6584_v58 }
 0xf7c   :  { %v1837_v57 = vmul.f32 %v5666_v40, %v1797_v56  ;;  %v1865_v22 = vsel %vm1849_vm9, %v1841_v29, %v1857_v53  ;;  %v1887_v19 = vmul.f32 %v1879_v48, %v1871_v4  ;;  %v1873_v35 = vmul.f32 0.5, %v6559_v43  ;;  %v4675_v43 = vld [vmem:[%s7027_s13] ss:$0 sm:$0xff]  ;;  %v5430_v53 = vld [vmem:[#allocation6 + $0x188] ss:$24 sps:$4 sm:$0xff]  }
 0xf7d   :  { %v1890_v49 = vmul.f32 %v1882_v52, %v1874_v11  ;;  %v1859_v62 = vsub.f32 0.0, %v1843_v45  ;;  %v1892_v55 = vmul.f32 %v1884_v59, %v1876_v7  ;;  %v1881_v17 = vadd.f32 1.0, %v1865_v22  ;;  %v5429_v40 = vld [vmem:[#allocation6 + $0x184] ss:$24 sps:$4 sm:$0xff]   ;;  %v5435_v59 = vld [vmem:[#allocation6 + $0x1b4] ss:$24 sps:$4 sm:$0xff]  }
 0xf7e   :  { %v1845_v10 = vsub.f32 1.0, %v1837_v57  ;;  %v5432_v7 = vld [vmem:[#allocation6 + $0x18c] ss:$24 sps:$4 sm:$0xff]   ;;  %2608 = vmatprep.subr.bf16.mxu1 %v5429_v40  ;;  %v5438_v56 = vld [vmem:[#allocation6 + $0x1bc] ss:$24 sps:$4 sm:$0xff]   ;;  %vm4305_vm5 = vcmask 1041408  }
 0xf7f   :  { %v1959_v15 = vpack.c.bf16 %v1890_v49, %v1886_v47  ;;  %v1867_v61 = vsel %vm1851_vm8, %v1843_v45, %v1859_v62  ;;  %v1961_v54 = vpack.c.bf16 %v1892_v55, %v1888_v60  ;;  %v1889_v12 = vmul.f32 %v1881_v17, %v1873_v35  ;;  %v5427_v45 = vld [vmem:[#allocation6 + $0x180] ss:$24 sps:$4 sm:$0xff]   ;;  %2651 = vmatprep.subr.bf16.mxu0 %v5432_v7  ;;  %v5433_v47 = vld [vmem:[#allocation6 + $0x1b0] ss:$24 sps:$4 sm:$0xff]   ;;  %v5444_v22 = vld [vmem:[#allocation6 + $0x1ec] ss:$24 sps:$4 sm:$0xff]  }
 0xf80   :  { %v1883_v9 = vadd.f32 1.0, %v1867_v61  ;;  %v1861_v2 = vsub.f32 0.0, %v1845_v10  ;;  %v5436_v49 = vld [vmem:[#allocation6 + $0x1b8] ss:$24 sps:$4 sm:$0xff]   ;;  %v5441_v61 = vld [vmem:[#allocation6 + $0x1e4] ss:$24 sps:$4 sm:$0xff]  }
 0xf81   :  { %v5451_v17 = vld [vmem:[#allocation6 + $0x240] ss:$24 sps:$4 sm:$0xff]   ;;  %v5459_v35 = vld [vmem:[#allocation6 + $0x274] ss:$24 sps:$4 sm:$0xff]   ;;  %vm4307_vm6 = vcmask 1042432   ;;  %vm4310_vm7 = vcmask 1044480  }
 0xf82   :  { %v1891_v44 = vmul.f32 %v1883_v9, %v1875_v28  ;;  %v1869_v3 = vsel %vm1853_vm10, %v1845_v10, %v1861_v2  ;;  %v5439_v28 = vld [vmem:[#allocation6 + $0x1e0] ss:$24 sps:$4 sm:$0xff]   ;;  %v5447_v9 = vld [vmem:[#allocation6 + $0x214] ss:$24 sps:$4 sm:$0xff]   ;;  %v5445_v10 = vld [vmem:[#allocation6 + $0x210] ss:$24 sps:$4 sm:$0xff]  }
 0xf83   :  { %v1885_v13 = vadd.f32 1.0, %v1869_v3  ;;  %v5453_v2 = vld [vmem:[#allocation6 + $0x244] ss:$24 sps:$4 sm:$0xff]   ;;  %vm4312_vm8 = vcmask 1045504   ;;  %vm4314_vm9 = vcmask 1046528  }
 0xf84   :  { %v1960_v37 = vpack.c.bf16 %v1891_v44, %v1887_v19  ;;  %v5450_v19 = vld [vmem:[#allocation6 + $0x21c] ss:$24 sps:$4 sm:$0xff]   ;;  %v5448_v44 = vld [vmem:[#allocation6 + $0x218] ss:$24 sps:$4 sm:$0xff]   ;;  %v5456_v3 = vld [vmem:[#allocation6 + $0x24c] ss:$24 sps:$4 sm:$0xff]  }
 0xf85   :  { %v1893_v58 = vmul.f32 %v1885_v13, %v1877_v32  ;;  %v5457_v32 = vld [vmem:[#allocation6 + $0x270] ss:$24 sps:$4 sm:$0xff]   ;;  %v5462_v13 = vld [vmem:[#allocation6 + $0x27c] ss:$24 sps:$4 sm:$0xff]  }
 0xf86   :  { %2193 = vmatprep.mubr.bf16.mxu1 %v1960_v37  ;;  %v5454_v37 = vld [vmem:[#allocation6 + $0x248] ss:$24 sps:$4 sm:$0xff]  }
 0xf87   :  { %2194 = vmatmul.mubr.bf16.vlgmr.msra.gmra.mrb[40].mxu1 %v1959_v15  ;;  %v1962_v5 = vpack.c.bf16 %v1893_v58, %v1889_v12  ;;  %v5460_v12 = vld [vmem:[#allocation6 + $0x278] ss:$24 sps:$4 sm:$0xff]   ;;  %v5465_v58 = vld [vmem:[#allocation6 + $0x2a4] ss:$24 sps:$4 sm:$0xff]  }
 0xf88   :  { %2640 = vmatprep.mubr.bf16.mxu1 %v6026_v42  ;;  %2609 = vmatpush1.bf16.msra.mxu1 %v5427_v45  ;;  %v4709_v45 = vld [vmem:[#allocation13] ss:$0 sm:$0xff] }
 0xf89   :  { %2234 = vmatprep.mubr.bf16.mxu0 %v1962_v5  ;;  %2610 = vmatprep.subr.bf16.mxu1 %v5435_v59  ;;  %v5463_v5 = vld [vmem:[#allocation6 + $0x2a0] ss:$24 sps:$4 sm:$0xff]   ;;  %v5475_v59 = vld [vmem:[#allocation6 + $0x190] ss:$24 sps:$4 sm:$0xff]  }
 0xf8a   :  { %2235 = vmatmul.mubr.bf16.vlgmr.msra.gmra.mrb[16].mxu0 %v1961_v54  ;;  %v5442_v54 = vld [vmem:[#allocation6 + $0x1e8] ss:$24 sps:$4 sm:$0xff]  }
 0xf8b   :  { %2683 = vmatprep.mubr.bf16.mxu0 %v6026_v42  ;;  %2652 = vmatpush1.bf16.msra.mxu0 %v5430_v53 }
 0xf8c   :  { %2653 = vmatprep.subr.bf16.mxu0 %v5438_v56  ;;  %2611 = vmatpush1.bf16.msra.mxu1 %v5433_v47  ;;  %v5480_v47 = vld [vmem:[#allocation6 + $0x1c4] ss:$24 sps:$4 sm:$0xff]  }
 0xf8d   :  { %2612 = vmatprep.subr.bf16.mxu1 %v5441_v61  ;;  %v5495_v61 = vld [vmem:[#allocation6 + $0x2b4] ss:$24 sps:$4 sm:$0xff]  }
 0xf8f   :  { %2654 = vmatpush1.bf16.msra.mxu0 %v5436_v49  ;;  %v5478_v49 = vld [vmem:[#allocation6 + $0x1c0] ss:$24 sps:$4 sm:$0xff]  }
 0xf90   :  { %2613 = vmatpush1.bf16.msra.mxu1 %v5439_v28  ;;  %2655 = vmatprep.subr.bf16.mxu0 %v5444_v22  ;;  %v5493_v28 = vld [vmem:[#allocation6 + $0x2b0] ss:$24 sps:$4 sm:$0xff]   ;;  %v5498_v22 = vld [vmem:[#allocation6 + $0x2e4] ss:$24 sps:$4 sm:$0xff]  }
 0xf91   :  { %2614 = vmatprep.subr.bf16.mxu1 %v5447_v9  ;;  %v6713_v9 = vld [vmem:[%s7021_s7 + $0x6] sm:$0x3f] }
 0xf93   :  { %2656 = vmatpush1.bf16.msra.mxu0 %v5442_v54  ;;  %v5496_v54 = vld [vmem:[#allocation6 + $0x2e0] ss:$24 sps:$4 sm:$0xff]  }
 0xf94   :  { %2615 = vmatpush1.bf16.msra.mxu1 %v5445_v10  ;;  %2657 = vmatprep.subr.bf16.mxu0 %v5450_v19  ;;  %v2349_v10 = vrot.slane %v6713_v9, %v6360_v24  ;;  %v2345_v19 = vrot.slane %v6713_v9, %v6351_v21 }
 0xf95   :  { %2616 = vmatprep.subr.bf16.mxu1 %v5453_v2 }
 0xf97   :  { %2658 = vmatpush1.bf16.msra.mxu0 %v5448_v44 }
 0xf98   :  { %2617 = vmatpush1.bf16.msra.mxu1 %v5451_v17  ;;  %2659 = vmatprep.subr.bf16.mxu0 %v5456_v3 }
 0xf99   :  { %2618 = vmatprep.subr.bf16.mxu1 %v5459_v35 }
 0xf9b   :  { %2660 = vmatpush1.bf16.msra.mxu0 %v5454_v37 }
 0xf9c   :  { %2619 = vmatpush1.bf16.msra.mxu1 %v5457_v32  ;;  %2661 = vmatprep.subr.bf16.mxu0 %v5462_v13 }
 0xf9d   :  { %2620 = vmatprep.subr.bf16.mxu1 %v5465_v58 }
 0xf9f   :  { %2662 = vmatpush1.bf16.msra.mxu0 %v5460_v12  ;;  %v2341_v12 = vrot.slane %v6713_v9, %v6357_v23 }
 0xfa0   :  { %2621 = vmatpush1.bf16.msra.mxu1 %v5463_v5 }
0x105a   :  { %v4973_v4 = vpop.f32.mrb[40].mxu1 }
0x105b   :  { %v4974_v16 = vpop.f32.mrb[41].mxu1 }
0x105c   :  { %v4975_v30 = vadd.f32 %v4974_v16, %v4973_v4  ;;  %v4976_v6 = vpop.f32.mrb[42].mxu1  ;;  %v5466_v4 = vld [vmem:[#allocation6 + $0x2a8] ss:$24 sps:$4 sm:$0xff]   ;;  %v5468_v16 = vld [vmem:[#allocation6 + $0x2ac] ss:$24 sps:$4 sm:$0xff]  }
0x105d   :  { %v4977_v25 = vpop.f32.mrb[43].mxu1  ;;  %v4995_v8 = vpop.f32.mrb[16].mxu0  ;;  %2663 = vmatprep.subr.bf16.mxu0 %v5468_v16 }
0x105e   :  { %v4978_v29 = vadd.f32 %v4977_v25, %v4976_v6  ;;  %v2196_v11 = vadd.f32 %v4975_v30, %v4675_v43  ;;  %v4996_v36 = vpop.f32.mrb[17].mxu0  ;;  %v5469_v30 = vld [vmem:[#allocation6 + $0x2d0] ss:$24 sps:$4 sm:$0xff]   ;;  %v5474_v6 = vld [vmem:[#allocation6 + $0x2dc] ss:$24 sps:$4 sm:$0xff]   ;;  %2664 = vmatpush1.bf16.msra.mxu0 %v5466_v4 }
0x105f   :  { %v4997_v34 = vadd.f32 %v4996_v36, %v4995_v8  ;;  %v4998_v14 = vpop.f32.mrb[18].mxu0  ;;  %v5472_v25 = vld [vmem:[#allocation6 + $0x2d8] ss:$24 sps:$4 sm:$0xff]   ;;  %2665 = vmatprep.subr.bf16.mxu0 %v5474_v6 }
0x1060   :  { %v2199_v31 = vadd.f32 %v4978_v29, %v4675_v43  ;;  %v4999_v0 = vpop.f32.mrb[19].mxu0  ;;  %v5471_v43 = vld [vmem:[#allocation6 + $0x2d4] ss:$24 sps:$4 sm:$0xff]  }
0x1061   :  { %v2237_v41 = vadd.f32 %v4997_v34, %v2196_v11  ;;  %v5000_v27 = vadd.f32 %v4999_v0, %v4998_v14  ;;  %2622 = vmatprep.subr.bf16.mxu1 %v5471_v43  ;;  %v5477_v29 = vld [vmem:[#allocation6 + $0x194] ss:$24 sps:$4 sm:$0xff]  }
0x1062   :  { %2623 = vmatpush1.bf16.msra.mxu1 %v5469_v30  ;;  %2666 = vmatpush1.bf16.msra.mxu0 %v5472_v25 }
0x1063   :  { %v2240_v1 = vadd.f32 %v5000_v27, %v2199_v31  ;;  %v2243_v52 = vadd.f32 %v2237_v41, %v6540_v33  ;;  %2694 = vmatprep.subr.bf16.mxu1 %v5477_v29  ;;  %5149 = vmatprep.subr.bf16.mxu0 %v6027_v18  ;;  %v4708_v41 = vld [vmem:[#allocation12] ss:$0 sm:$0xff]  ;;  %v2357_v29 = vrot.slane %v6713_v9, %v362_v50 }
0x1065   :  { %2247 = vadd.xlane.f32.xlu0 %v2243_v52  ;;  %v2244_v46 = vadd.f32 %v2240_v1, %v6542_v39 }
0x1067   :  { %2249 = vadd.xlane.f32.xlu1 %v2244_v46 }
0x10f2   :  { %v2248_v33 = vpop.xlane.xlu0 %2247 }
0x10f3   :  { %v2251_v62 = vmul.f32 0.0078125, %v2248_v33  ;;  %v5483_v33 = vld [vmem:[#allocation6 + $0x1f4] ss:$24 sps:$4 sm:$0xff]  }
0x10f4   :  { %v2250_v39 = vpop.xlane.xlu1 %2249 }
0x10f5   :  { %v6687_v60 = vsub.f32 %v2243_v52, %v2251_v62  ;;  %v2252_v48 = vmul.f32 0.0078125, %v2250_v39  ;;  %v5481_v62 = vld [vmem:[#allocation6 + $0x1f0] ss:$24 sps:$4 sm:$0xff]   ;;  %v5486_v39 = vld [vmem:[#allocation6 + $0x224] ss:$24 sps:$4 sm:$0xff]  }
0x10f7   :  { %v6689_v55 = vsub.f32 %v2244_v46, %v2252_v48  ;;  %v2255_v57 = vmul.f32 %v6687_v60, %v6687_v60  ;;  %v5489_v48 = vld [vmem:[#allocation6 + $0x254] ss:$24 sps:$4 sm:$0xff]  }
0x10f9   :  { %2257 = vadd.xlane.f32.xlu0 %v2255_v57  ;;  %v2256_v15 = vmul.f32 %v6689_v55, %v6689_v55  ;;  %v5492_v57 = vld [vmem:[#allocation6 + $0x284] ss:$24 sps:$4 sm:$0xff]  }
0x10fb   :  { %2259 = vadd.xlane.f32.xlu1 %v2256_v15  ;;  %v5490_v15 = vld [vmem:[#allocation6 + $0x280] ss:$24 sps:$4 sm:$0xff]  }
0x1186   :  { %v2258_v8 = vpop.xlane.xlu0 %2257 }
0x1187   :  { %v2261_v11 = vmul.f32 0.0078125, %v2258_v8 }
0x1188   :  { %v2260_v36 = vpop.xlane.xlu1 %2259 }
0x1189   :  { %v2263_v34 = vadd.f32 1e-12, %v2261_v11  ;;  %v2262_v14 = vmul.f32 0.0078125, %v2260_v36 }
0x118b   :  { %5667 = vrsqrt.f32 %v2263_v34  ;;  %v2264_v31 = vadd.f32 1e-12, %v2262_v14  ;;  %v2353_v34 = vrot.slane %v6713_v9, %v6364_v26 }
0x118d   :  { %5669 = vrsqrt.f32 %v2264_v31 }
0x1195   :  { %v5668_v0 = vpop.eup %5667 }
0x1196   :  { %v2267_v27 = vmul.f32 %v5668_v0, %v6687_v60  ;;  %v5484_v60 = vld [vmem:[#allocation6 + $0x220] ss:$24 sps:$4 sm:$0xff]  }
0x1197   :  { %v5670_v1 = vpop.eup %5669 }
0x1198   :  { %v2268_v52 = vmul.f32 %v5670_v1, %v6689_v55  ;;  %v2275_v46 = vmul.f32 %v4708_v41, %v2267_v27  ;;  %v5487_v55 = vld [vmem:[#allocation6 + $0x250] ss:$24 sps:$4 sm:$0xff]  }
0x119a   :  { %v2276_v40 = vmul.f32 %v4708_v41, %v2268_v52  ;;  %v6698_v53 = vadd.f32 %v4709_v45, %v2275_v46 }
0x119c   :  { %v6700_v7 = vadd.f32 %v4709_v45, %v2276_v40 }
0x119e   :  { %v2336_v56 = vpack.c.bf16 %v6700_v7, %v6698_v53 }
0x11a0   :  { %2641 = vmatmul.mubr.bf16.vlgmr.msra.gmra.mrb[44].mxu1 %v2336_v56  ;;  %2684 = vmatmul.mubr.bf16.vlgmr.msra.gmra.mrb[20].mxu0 %v2336_v56 }
0x11a1   :  { %2695 = vmatpush1.bf16.msra.mxu1 %v5475_v59  ;;  %2726 = vmatprep.mubr.bf16.mxu1 %v6026_v42 }
0x11a2   :  { %2696 = vmatprep.subr.bf16.mxu1 %v5480_v47  ;;  %5151 = vmatprep.mubr.msk.bf16.mxu0 %vm6028_vm0, %v6027_v18 }
0x11a5   :  { %2697 = vmatpush1.bf16.msra.mxu1 %v5478_v49 }
0x11a6   :  { %2698 = vmatprep.subr.bf16.mxu1 %v5483_v33 }
0x11a9   :  { %2699 = vmatpush1.bf16.msra.mxu1 %v5481_v62 }
0x11aa   :  { %2700 = vmatprep.subr.bf16.mxu1 %v5486_v39 }
0x11ad   :  { %2701 = vmatpush1.bf16.msra.mxu1 %v5484_v60 }
0x11ae   :  { %2702 = vmatprep.subr.bf16.mxu1 %v5489_v48 }
0x11b1   :  { %2703 = vmatpush1.bf16.msra.mxu1 %v5487_v55 }
0x11b2   :  { %2704 = vmatprep.subr.bf16.mxu1 %v5492_v57 }
0x11b5   :  { %2705 = vmatpush1.bf16.msra.mxu1 %v5490_v15 }
0x11b6   :  { %2706 = vmatprep.subr.bf16.mxu1 %v5495_v61 }
0x11b9   :  { %2707 = vmatpush1.bf16.msra.mxu1 %v5493_v28 }
0x11ba   :  { %2708 = vmatprep.subr.bf16.mxu1 %v5498_v22 }
0x11bd   :  { %2709 = vmatpush1.bf16.msra.mxu1 %v5496_v54 }
0x11be   :  { %5155 = vmatprep.subr.bf16.mxu1 %v6027_v18 }
0x11c0   :  { %2727 = vmatmul.mubr.bf16.vlgmr.msra.gmra.mrb[48].mxu1 %v2336_v56 }
0x11c1   :  { %5157 = vmatprep.mubr.msk.bf16.mxu1 %vm6028_vm0, %v6027_v18 }
0x1273   :  { %v2642_v44 = vpop.f32.mrb[44].mxu1  ;;  %v2685_v2 = vpop.f32.mrb[20].mxu0 }
0x1274   :  { %v2686_v17 = vadd.f32 %v2685_v2, %v2349_v10  ;;  %v2644_v3 = vpop.f32.mrb[45].mxu1  ;;  %v2687_v37 = vpop.f32.mrb[21].mxu0  ;;  %v2643_v6 = vadd.f32 %v2642_v44, %v2341_v12 }
0x1275   :  { %v2645_v35 = vadd.f32 %v2644_v3, %v2345_v19  ;;  %v2646_v32 = vpop.f32.mrb[46].mxu1  ;;  %v2689_v13 = vpop.f32.mrb[22].mxu0  ;;  %v2688_v41 = vadd.f32 %v2687_v37, %v2353_v34 }
0x1276   :  { %v2739_v58 = vpack.c.bf16 %v2686_v17, %v2686_v17  ;;  %v6721_v5 = vadd.f32 %v2689_v13, %v2349_v10  ;;  %v2648_v4 = vpop.f32.mrb[47].mxu1  ;;  %v2691_v16 = vpop.f32.mrb[23].mxu0  ;;  %v2737_v25 = vpack.c.bf16 %v2643_v6, %v2643_v6  ;;  %v2647_v50 = vadd.f32 %v2646_v32, %v2341_v12 }
0x1277   :  { %v2738_v43 = vpack.c.bf16 %v2645_v35, %v2645_v35  ;;  %v2649_v27 = vadd.f32 %v2648_v4, %v2345_v19  ;;  %v2740_v1 = vpack.c.bf16 %v2688_v41, %v2688_v41  ;;  %v2692_v59 = vadd.f32 %v2691_v16, %v2353_v34 }
0x1278   :  { %v2801_v30 = vsel %vm807_vm1, %v2739_v58, 0  ;;  %v2943_v45 = vpack.c.bf16 %v2647_v50, %v2647_v50 }
0x1279   :  { %5150 = vmatpush3.bf16.xpose.msra.mxu0 %v2738_v43  ;;  %5156 = vmatpush3.bf16.msra.mxu1 %v2801_v30  ;;  %v2944_v52 = vpack.c.bf16 %v2649_v27, %v2649_v27  ;;  %v2946_v56 = vpack.c.bf16 %v2692_v59, %v2692_v59 }
0x127a   :  { %5161 = vmatprep.subr.bf16.mxu0 %v6027_v18  ;;  %5167 = vmatprep.subr.bf16.mxu1 %v6027_v18 }
0x1280   :  { %5152 = vmatmul.mubr.bf16.vlgmr.msra.gmra.mrb[24].mxu0 %v2737_v25 }
0x1281   :  { %5163 = vmatprep.mubr.msk.bf16.mxu0 %vm6028_vm0, %v6027_v18 }
0x1293   :  { %v2728_v8 = vpop.f32.mrb[48].mxu1 }
0x1294   :  { %v2729_v11 = vadd.f32 %v2728_v8, %v2357_v29  ;;  %v6731_v36 = vpop.f32.mrb[49].mxu1 }
0x1295   :  { %v2732_v14 = vpop.f32.mrb[50].mxu1 }
0x1296   :  { %v2741_v31 = vpack.c.bf16 %v2729_v11, %v2729_v11  ;;  %v6735_v0 = vpop.f32.mrb[51].mxu1  ;;  %v2733_v46 = vadd.f32 %v2732_v14, %v2357_v29 }
0x1298   :  { %5162 = vmatpush3.bf16.xpose.msra.mxu0 %v2741_v31  ;;  %v2947_v40 = vpack.c.bf16 %v2733_v46, %v2733_v46 }
0x1299   :  { %5173 = vmatprep.subr.bf16.mxu0 %v6027_v18 }
0x129f   :  { %5164 = vmatmul.mubr.bf16.vlgmr.msra.gmra.mrb[28].mxu0 %v2740_v1 }
0x12a0   :  { %5174 = vmatpush3.bf16.xpose.msra.mxu0 %v2944_v52  ;;  %5175 = vmatprep.mubr.msk.bf16.mxu0 %vm6028_vm0, %v6027_v18 }
0x12a1   :  { %5185 = vmatprep.subr.bf16.mxu0 %v6027_v18 }
0x12a7   :  { %5176 = vmatmul.mubr.bf16.vlgmr.msra.gmra.mrb[32].mxu0 %v2943_v45 }
0x12a8   :  { %5186 = vmatpush3.bf16.xpose.msra.mxu0 %v2947_v40  ;;  %5187 = vmatprep.mubr.msk.bf16.mxu0 %vm6028_vm0, %v6027_v18 }
0x12af   :  { %5188 = vmatmul.mubr.bf16.vlgmr.msra.gmra.mrb[36].mxu0 %v2946_v56  ;;  %v2361_v56 = vrot.slane %v6713_v9, %v366_v51  ;;  %v2945_v9 = vpack.c.bf16 %v6721_v5, %v6721_v5 }
0x1353   :  { %v2777_v47 = vpop.f32.mrb[24].mxu0 }
0x1354   :  { %v2783_v49 = vmul.f32 0.125, %v2777_v47  ;;  %v5153_v33 = vpop.f32.mrb[25].mxu0  ;;  %v2731_v47 = vadd.f32 %v6731_v36, %v2361_v56 }
0x1355   :  { %v2780_v62 = vpop.f32.mrb[26].mxu0 }
0x1356   :  { %v5154_v39 = vpop.f32.mrb[27].mxu0  ;;  %v2784_v60 = vadd.f32 %v2783_v49, %v6404_v63  ;;  %v2742_v33 = vpack.c.bf16 %v2731_v47, %v2731_v47 }
0x1358   :  { %v2785_v48 = vsel %vm791_vm2, %v2784_v60, -inf }
0x1359   :  { %2786 = vmax.xlane.f32.xlu0 %v2785_v48 }
0x1372   :  { %v2877_v55 = vpop.f32.mrb[28].mxu0 }
0x1373   :  { %v2883_v57 = vmul.f32 0.125, %v2877_v55  ;;  %v5165_v15 = vpop.f32.mrb[29].mxu0 }
0x1374   :  { %v2880_v61 = vpop.f32.mrb[30].mxu0  ;;  %v2735_v15 = vadd.f32 %v6735_v0, %v2361_v56 }
0x1375   :  { %v5166_v28 = vpop.f32.mrb[31].mxu0  ;;  %v2884_v22 = vadd.f32 %v2883_v57, %v6404_v63  ;;  %v3007_v57 = vsel %vm807_vm1, %v2945_v9, 0 }
0x1377   :  { %v2885_v54 = vsel %vm791_vm2, %v2884_v22, -inf }
0x1378   :  { %2886 = vmax.xlane.f32.xlu1 %v2885_v54 }
0x137a   :  { %v2983_v10 = vpop.f32.mrb[32].mxu0 }
0x137b   :  { %v2989_v19 = vmul.f32 0.125, %v2983_v10  ;;  %v5177_v44 = vpop.f32.mrb[33].mxu0 }
0x137c   :  { %v2986_v2 = vpop.f32.mrb[34].mxu0 }
0x137d   :  { %v5178_v17 = vpop.f32.mrb[35].mxu0  ;;  %v2990_v3 = vadd.f32 %v2989_v19, %v6442_v38  ;;  %v5499_v2 = vld [vmem:[%s7022_s8 + $0xc0] sm:$0xff]  }
0x137e   :  { %v5500_v17 = vld [vmem:[%s7022_s8 + $0x80] sm:$0xff]   ;;  %5017 = vmatprep.subr.bf16.mxu0 %v5499_v2 }
0x137f   :  { %v2991_v37 = vsel %vm791_vm2, %v2990_v3, -inf  ;;  %5018 = vmatpush3.bf16.msra.mxu0 %v5500_v17 }
0x1380   :  { %2992 = vmax.xlane.f32.xlu0 %v2991_v37  ;;  %v5502_v37 = vld [vmem:[%s7022_s8 + $0x88] sm:$0xff]  }
0x1382   :  { %v3083_v35 = vpop.f32.mrb[36].mxu0 }
0x1383   :  { %v3089_v32 = vmul.f32 0.125, %v3083_v35  ;;  %v5189_v13 = vpop.f32.mrb[37].mxu0  ;;  %v5503_v35 = vld [vmem:[%s7022_s8 + $0xd0] sm:$0xff]  }
0x1384   :  { %v3086_v12 = vpop.f32.mrb[38].mxu0  ;;  %v5505_v13 = vld [vmem:[%s7022_s8 + $0xd8] sm:$0xff]  }
0x1385   :  { %v5190_v58 = vpop.f32.mrb[39].mxu0  ;;  %v3090_v63 = vadd.f32 %v3089_v32, %v6442_v38  ;;  %v5504_v32 = vld [vmem:[%s7022_s8 + $0x90] sm:$0xff]   ;;  %v5506_v12 = vld [vmem:[%s7022_s8 + $0x98] sm:$0xff]  }
0x1386   :  { %v5507_v58 = vld [vmem:[%s7022_s8 + $0xe0] sm:$0xff]  }
0x1387   :  { %v3091_v4 = vsel %vm791_vm2, %v3090_v63, -inf }
0x1388   :  { %3092 = vmax.xlane.f32.xlu1 %v3091_v4  ;;  %v5509_v4 = vld [vmem:[%s7022_s8 + $0xe8] sm:$0xff]  }
0x13e6   :  { %v2787_v16 = vpop.xlane.xlu0 %2786 }
0x13e7   :  { %v2788_v43 = vsub.f32 %v2784_v60, %v2787_v16  ;;  %v2901_v60 = vsel %vm807_vm1, %v2742_v33, 0  ;;  %v5510_v16 = vld [vmem:[%s7022_s8 + $0xa8] sm:$0xff]   ;;  %v4796_v33 = vld [vmem:[%s7023_s9 + $0x1] ss:$0 sm:$0xff] }
0x13e9   :  { %v2789_v30 = vmul.f32 1.442695, %v2788_v43  ;;  %v5511_v43 = vld [vmem:[%s7022_s8 + $0xf0] sm:$0xff]  }
0x13eb   :  { %5671 = vpow2.f32 %v2789_v30  ;;  %v5512_v30 = vld [vmem:[%s7022_s8 + $0xb0] sm:$0xff]  }
0x13f5   :  { %v5672_v6 = vpop.eup %5671 }
0x13f6   :  { %v2791_v25 = vsel %vm791_vm2, %v5672_v6, 0.0 }
0x13f7   :  { %2792 = vadd.xlane.f32.xlu0 %v2791_v25  ;;  %v5514_v25 = vld [vmem:[%s7022_s8 + $0xb8] sm:$0xff]  }
0x1405   :  { %v2887_v29 = vpop.xlane.xlu1 %2886 }
0x1406   :  { %v2888_v8 = vsub.f32 %v2884_v22, %v2887_v29  ;;  %v2948_v22 = vpack.c.bf16 %v2735_v15, %v2735_v15  ;;  %v5518_v15 = vld [vmem:[#allocation7 + $0x108] ss:$16 sps:$4 sm:$0xff]  }
0x1408   :  { %v2889_v11 = vmul.f32 1.442695, %v2888_v8  ;;  %v3107_v10 = vsel %vm807_vm1, %v2948_v22, 0  ;;  %v5526_v22 = vld [vmem:[#allocation7 + $0x12c] ss:$16 sps:$4 sm:$0xff]  }
0x140a   :  { %5673 = vpow2.f32 %v2889_v11 }
0x140d   :  { %v2993_v34 = vpop.xlane.xlu0 %2992 }
0x140e   :  { %v2994_v14 = vsub.f32 %v2990_v3, %v2993_v34  ;;  %v5501_v3 = vld [vmem:[%s7022_s8 + $0xc8] sm:$0xff]  }
0x140f   :  { %5019 = vmatprep.subr.bf16.mxu0 %v5501_v3  ;;  %v5529_v3 = vld [vmem:[#allocation7 + $0x144] ss:$16 sps:$4 sm:$0xff]  }
0x1410   :  { %v2995_v31 = vmul.f32 1.442695, %v2994_v14  ;;  %5020 = vmatpush3.bf16.msra.mxu0 %v5502_v37  ;;  %v5532_v37 = vld [vmem:[#allocation7 + $0x14c] ss:$16 sps:$4 sm:$0xff]  }
0x1411   :  { %5021 = vmatprep.subr.bf16.mxu0 %v5503_v35  ;;  %v5527_v35 = vld [vmem:[#allocation7 + $0x140] ss:$16 sps:$4 sm:$0xff]  }
0x1412   :  { %5675 = vpow2.f32 %v2995_v31 }
0x1414   :  { %v5674_v38 = vpop.eup %5673  ;;  %5022 = vmatpush3.bf16.msra.mxu0 %v5504_v32  ;;  %v5530_v32 = vld [vmem:[#allocation7 + $0x148] ss:$16 sps:$4 sm:$0xff]  }
0x1415   :  { %v3093_v41 = vpop.xlane.xlu1 %3092  ;;  %v2891_v27 = vsel %vm791_vm2, %v5674_v38, 0.0  ;;  %5023 = vmatprep.subr.bf16.mxu0 %v5505_v13  ;;  %v5535_v13 = vld [vmem:[#allocation7 + $0x164] ss:$16 sps:$4 sm:$0xff]  }
0x1416   :  { %v3094_v1 = vsub.f32 %v3090_v63, %v3093_v41  ;;  %2892 = vadd.xlane.f32.xlu1 %v2891_v27  ;;  %v5508_v63 = vld [vmem:[%s7022_s8 + $0xa0] sm:$0xff]  }
0x1418   :  { %v3095_v52 = vmul.f32 1.442695, %v3094_v1  ;;  %5024 = vmatpush3.bf16.msra.mxu0 %v5506_v12  ;;  %v5538_v12 = vld [vmem:[#allocation7 + $0x16c] ss:$16 sps:$4 sm:$0xff]  }
0x1419   :  { %5025 = vmatprep.subr.bf16.mxu0 %v5507_v58  ;;  %v5533_v58 = vld [vmem:[#allocation7 + $0x160] ss:$16 sps:$4 sm:$0xff]  }
0x141a   :  { %5677 = vpow2.f32 %v3095_v52 }
0x141c   :  { %v5676_v50 = vpop.eup %5675  ;;  %5026 = vmatpush3.bf16.msra.mxu0 %v5508_v63  ;;  %v5536_v63 = vld [vmem:[#allocation7 + $0x168] ss:$16 sps:$4 sm:$0xff]  }
0x141d   :  { %v2997_v46 = vsel %vm791_vm2, %v5676_v50, 0.0  ;;  %5027 = vmatprep.subr.bf16.mxu0 %v5509_v4  ;;  %v5541_v4 = vld [vmem:[#allocation7 + $0x184] ss:$16 sps:$4 sm:$0xff]  }
0x141e   :  { %2998 = vadd.xlane.f32.xlu0 %v2997_v46 }
0x1420   :  { %5028 = vmatpush3.bf16.msra.mxu0 %v5510_v16  ;;  %v5544_v16 = vld [vmem:[#allocation7 + $0x18c] ss:$16 sps:$4 sm:$0xff]  }
0x1421   :  { %5029 = vmatprep.subr.bf16.mxu0 %v5511_v43  ;;  %v5539_v43 = vld [vmem:[#allocation7 + $0x180] ss:$16 sps:$4 sm:$0xff]  }
0x1424   :  { %v5678_v45 = vpop.eup %5677  ;;  %5030 = vmatpush3.bf16.msra.mxu0 %v5512_v30  ;;  %v5542_v30 = vld [vmem:[#allocation7 + $0x188] ss:$16 sps:$4 sm:$0xff]  }
0x1425   :  { %v3097_v40 = vsel %vm791_vm2, %v5678_v45, 0.0 }
0x1426   :  { %3098 = vadd.xlane.f32.xlu1 %v3097_v40 }
0x1484   :  { %v2793_v59 = vpop.xlane.xlu0 %2792 }
0x1485   :  { %5679 = vrcp.f32 %v2793_v59 }
0x148f   :  { %v5680_v49 = vpop.eup %5679 }
0x1490   :  { %v2795_v62 = vmul.f32 %v5680_v49, %v5672_v6  ;;  %v5513_v6 = vld [vmem:[%s7022_s8 + $0xf8] sm:$0xff]  }
0x1491   :  { %5031 = vmatprep.subr.bf16.mxu0 %v5513_v6  ;;  %v5547_v6 = vld [vmem:[#allocation7 + $0x1a4] ss:$16 sps:$4 sm:$0xff]  }
0x1492   :  { %v2796_v39 = vpack.c.bf16 %v2795_v62, %v2795_v62  ;;  %5032 = vmatpush3.bf16.msra.mxu0 %v5514_v25  ;;  %v5550_v25 = vld [vmem:[#allocation7 + $0x1ac] ss:$16 sps:$4 sm:$0xff]  }
0x1494   :  { %5158 = vmatmul.mubr.msk.bf16.vlgmr.msra.gmra.mrb[52].mxu1 %vm791_vm2, %v2796_v39 }
0x1495   :  { %5168 = vmatpush3.bf16.msra.mxu1 %v2901_v60  ;;  %5169 = vmatprep.mubr.msk.bf16.mxu1 %vm6028_vm0, %v6027_v18 }
0x1496   :  { %5179 = vmatprep.subr.bf16.mxu1 %v6027_v18 }
0x14a3   :  { %v2893_v48 = vpop.xlane.xlu1 %2892 }
0x14a4   :  { %5681 = vrcp.f32 %v2893_v48 }
0x14ab   :  { %v2999_v20 = vpop.xlane.xlu0 %2998 }
0x14ac   :  { %5683 = vrcp.f32 %v2999_v20 }
0x14ae   :  { %v5682_v51 = vpop.eup %5681 }
0x14af   :  { %v2895_v36 = vmul.f32 %v5682_v51, %v5674_v38 }
0x14b1   :  { %v2896_v55 = vpack.c.bf16 %v2895_v36, %v2895_v36 }
0x14b3   :  { %5170 = vmatmul.mubr.msk.bf16.vlgmr.msra.gmra.mrb[56].mxu1 %vm791_vm2, %v2896_v55  ;;  %v3099_v61 = vpop.xlane.xlu1 %3098 }
0x14b4   :  { %5180 = vmatpush3.bf16.msra.mxu1 %v3007_v57  ;;  %5685 = vrcp.f32 %v3099_v61  ;;  %5181 = vmatprep.mubr.msk.bf16.mxu1 %vm6028_vm0, %v6027_v18  ;;  %v5515_v57 = vld [vmem:[#allocation7 + $0x100] ss:$16 sps:$4 sm:$0xff]   ;;  %v5520_v61 = vld [vmem:[#allocation7 + $0x10c] ss:$16 sps:$4 sm:$0xff]  }
0x14b5   :  { %5191 = vmatprep.subr.bf16.mxu1 %v6027_v18  ;;  %3633 = vmatprep.subr.bf16.mxu0 %v5520_v61  ;;  %v5568_v61 = vld [vmem:[#allocation9 + $0x1c8] sm:$0xff]  }
0x14b6   :  { %v5684_v28 = vpop.eup %5683 }
0x14b7   :  { %v3001_v54 = vmul.f32 %v5684_v28, %v5676_v50  ;;  %v5523_v28 = vld [vmem:[#allocation7 + $0x124] ss:$16 sps:$4 sm:$0xff]  }
0x14b9   :  { %v3002_v5 = vpack.c.bf16 %v3001_v54, %v3001_v54  ;;  %v5521_v54 = vld [vmem:[#allocation7 + $0x120] ss:$16 sps:$4 sm:$0xff]  }
0x14bb   :  { %5182 = vmatmul.mubr.msk.bf16.vlgmr.msra.gmra.mrb[60].mxu1 %vm791_vm2, %v3002_v5  ;;  %v5524_v5 = vld [vmem:[#allocation7 + $0x128] ss:$16 sps:$4 sm:$0xff]  }
0x14bc   :  { %5192 = vmatpush3.bf16.msra.mxu1 %v3107_v10  ;;  %5193 = vmatprep.mubr.msk.bf16.mxu1 %vm6028_vm0, %v6027_v18 }
0x14be   :  { %v5686_v0 = vpop.eup %5685 }
0x14bf   :  { %v3101_v19 = vmul.f32 %v5686_v0, %v5678_v45 }
0x14c1   :  { %v3102_v44 = vpack.c.bf16 %v3101_v19, %v3101_v19 }
0x14c3   :  { %5194 = vmatmul.mubr.msk.bf16.vlgmr.msra.gmra.mrb[64].mxu1 %vm791_vm2, %v3102_v44 }
0x14c4   :  { %3622 = vmatprep.mubr.bf16.mxu1 %v6026_v42 }
0x1567   :  { %v2837_v29 = vpop.f32.mrb[52].mxu1 }
0x1568   :  { %v5159_v8 = vpop.f32.mrb[53].mxu1 }
0x1569   :  { %v2840_v11 = vpop.f32.mrb[54].mxu1  ;;  %v5548_v8 = vld [vmem:[#allocation7 + $0x1a8] ss:$16 sps:$4 sm:$0xff]  }
0x156a   :  { %v5160_v34 = vpop.f32.mrb[55].mxu1  ;;  %v5553_v11 = vld [vmem:[#allocation7 + $0x1c4] ss:$16 sps:$4 sm:$0xff]  }
0x156b   :  { %v5556_v34 = vld [vmem:[#allocation7 + $0x1cc] ss:$16 sps:$4 sm:$0xff]  }
0x1586   :  { %v2937_v14 = vpop.f32.mrb[56].mxu1 }
0x1587   :  { %v5171_v31 = vpop.f32.mrb[57].mxu1 }
0x1588   :  { %v2940_v38 = vpop.f32.mrb[58].mxu1  ;;  %v5554_v31 = vld [vmem:[#allocation7 + $0x1c8] ss:$16 sps:$4 sm:$0xff]  }
0x1589   :  { %v5172_v41 = vpop.f32.mrb[59].mxu1  ;;  %v5559_v38 = vld [vmem:[#allocation7 + $0x1e4] ss:$16 sps:$4 sm:$0xff]  }
0x158a   :  { %v5562_v41 = vld [vmem:[#allocation7 + $0x1ec] ss:$16 sps:$4 sm:$0xff]  }
0x158e   :  { %v3043_v27 = vpop.f32.mrb[60].mxu1 }
0x158f   :  { %v3184_v1 = vpack.c.bf16 %v3043_v27, %v2837_v29  ;;  %v5183_v52 = vpop.f32.mrb[61].mxu1  ;;  %v5545_v29 = vld [vmem:[#allocation7 + $0x1a0] ss:$16 sps:$4 sm:$0xff]  }
0x1590   :  { %v3046_v50 = vpop.f32.mrb[62].mxu1  ;;  %v5557_v27 = vld [vmem:[#allocation7 + $0x1e0] ss:$16 sps:$4 sm:$0xff]  }
0x1591   :  { %v5184_v46 = vpop.f32.mrb[63].mxu1 }
0x1596   :  { %v3143_v45 = vpop.f32.mrb[64].mxu1 }
0x1597   :  { %v3185_v40 = vpack.c.bf16 %v3143_v45, %v2937_v14  ;;  %v5195_v59 = vpop.f32.mrb[65].mxu1  ;;  %v5551_v14 = vld [vmem:[#allocation7 + $0x1c0] ss:$16 sps:$4 sm:$0xff]  }
0x1598   :  { %v3146_v56 = vpop.f32.mrb[66].mxu1 }
0x1599   :  { %v5196_v47 = vpop.f32.mrb[67].mxu1  ;;  %3320 = vmatprep.mubr.bf16.mxu0 %v3185_v40 }
0x159a   :  { %3321 = vmatmul.mubr.bf16.vlgmr.msra.gmra.mrb[40].mxu0 %v3184_v1  ;;  %v5560_v1 = vld [vmem:[#allocation7 + $0x1e8] ss:$16 sps:$4 sm:$0xff]   ;;  %v4814_v47 = vld [vmem:[%s7028_s14 + $0x1] ss:$0 sm:$0xff] }
0x159b   :  { %3665 = vmatprep.mubr.bf16.mxu0 %v6026_v42  ;;  %v5517_v42 = vld [vmem:[#allocation7 + $0x104] ss:$16 sps:$4 sm:$0xff]   ;;  %3634 = vmatpush1.bf16.msra.mxu0 %v5518_v15  ;;  %v5567_v15 = vld [vmem:[#allocation9 + $0x148] sm:$0xff]  }
0x159c   :  { %3590 = vmatprep.subr.bf16.mxu1 %v5517_v42  ;;  %3635 = vmatprep.subr.bf16.mxu0 %v5526_v22  ;;  %v5566_v42 = vld [vmem:[#allocation9 + $0x180] sm:$0xff]   ;;  %v5570_v22 = vld [vmem:[#allocation9 + $0x188] sm:$0xff]  }
0x159d   :  { %3591 = vmatpush1.bf16.msra.mxu1 %v5515_v57  ;;  %v5565_v57 = vld [vmem:[#allocation9 + $0x100] sm:$0xff]  }
0x159e   :  { %3592 = vmatprep.subr.bf16.mxu1 %v5523_v28  ;;  %v5569_v28 = vld [vmem:[#allocation9 + $0x108] sm:$0xff]  }
0x159f   :  { %3636 = vmatpush1.bf16.msra.mxu0 %v5524_v5  ;;  %v5572_v5 = vld [vmem:[#allocation9 + $0x1d0] sm:$0xff]  }
0x15a0   :  { %3637 = vmatprep.subr.bf16.mxu0 %v5532_v37  ;;  %v5582_v37 = vld [vmem:[#allocation9 + $0x1a0] sm:$0xff]  }
0x15a1   :  { %3593 = vmatpush1.bf16.msra.mxu1 %v5521_v54  ;;  %v5571_v54 = vld [vmem:[#allocation9 + $0x150] sm:$0xff]  }
0x15a2   :  { %3594 = vmatprep.subr.bf16.mxu1 %v5529_v3  ;;  %v5581_v3 = vld [vmem:[#allocation9 + $0x120] sm:$0xff]  }
0x15a3   :  { %3638 = vmatpush1.bf16.msra.mxu0 %v5530_v32  ;;  %v5584_v32 = vld [vmem:[#allocation9 + $0x1e8] sm:$0xff]  }
0x15a4   :  { %3639 = vmatprep.subr.bf16.mxu0 %v5538_v12  ;;  %v5586_v12 = vld [vmem:[#allocation9 + $0x1a8] sm:$0xff]  }
0x15a5   :  { %3595 = vmatpush1.bf16.msra.mxu1 %v5527_v35  ;;  %v5583_v35 = vld [vmem:[#allocation9 + $0x168] sm:$0xff]  }
0x15a6   :  { %3596 = vmatprep.subr.bf16.mxu1 %v5535_v13  ;;  %v5585_v13 = vld [vmem:[#allocation9 + $0x128] sm:$0xff]  }
0x15a7   :  { %3640 = vmatpush1.bf16.msra.mxu0 %v5536_v63  ;;  %v5588_v63 = vld [vmem:[#allocation9 + $0x1f0] sm:$0xff]  }
0x15a8   :  { %3641 = vmatprep.subr.bf16.mxu0 %v5544_v16  ;;  %v5590_v16 = vld [vmem:[#allocation9 + $0x1b0] sm:$0xff]  }
0x15a9   :  { %3597 = vmatpush1.bf16.msra.mxu1 %v5533_v58  ;;  %v5587_v58 = vld [vmem:[#allocation9 + $0x170] sm:$0xff]  }
0x15aa   :  { %3598 = vmatprep.subr.bf16.mxu1 %v5541_v4  ;;  %v5589_v4 = vld [vmem:[#allocation9 + $0x130] sm:$0xff]  }
0x15ab   :  { %3642 = vmatpush1.bf16.msra.mxu0 %v5542_v30  ;;  %v5592_v30 = vld [vmem:[#allocation9 + $0x1f8] sm:$0xff]  }
0x15ac   :  { %3643 = vmatprep.subr.bf16.mxu0 %v5550_v25  ;;  %v5594_v25 = vld [vmem:[#allocation9 + $0x1b8] sm:$0xff]  }
0x15ad   :  { %3599 = vmatpush1.bf16.msra.mxu1 %v5539_v43  ;;  %v5591_v43 = vld [vmem:[#allocation9 + $0x178] sm:$0xff]  }
0x15ae   :  { %3600 = vmatprep.subr.bf16.mxu1 %v5547_v6  ;;  %v5593_v6 = vld [vmem:[#allocation9 + $0x138] sm:$0xff]  }
0x15af   :  { %3644 = vmatpush1.bf16.msra.mxu0 %v5548_v8 }
0x15b0   :  { %3645 = vmatprep.subr.bf16.mxu0 %v5556_v34 }
0x15b1   :  { %3601 = vmatpush1.bf16.msra.mxu1 %v5545_v29  ;;  %v4816_v29 = vld [vmem:[%s7025_s11 + $0x4] sm:$0xf] }
0x15b2   :  { %3602 = vmatprep.subr.bf16.mxu1 %v5553_v11  ;;  %v3413_v8 = vrot.slane %v4816_v29, %v6357_v23  ;;  %v3421_v11 = vrot.slane %v4816_v29, %v6360_v24  ;;  %v3417_v34 = vrot.slane %v4816_v29, %v6351_v21 }
0x15b3   :  { %3646 = vmatpush1.bf16.msra.mxu0 %v5554_v31 }
0x15b4   :  { %3647 = vmatprep.subr.bf16.mxu0 %v5562_v41 }
0x15b5   :  { %3603 = vmatpush1.bf16.msra.mxu1 %v5551_v14  ;;  %v3425_v14 = vrot.slane %v4816_v29, %v6364_v26 }
0x15b6   :  { %3604 = vmatprep.subr.bf16.mxu1 %v5559_v38 }
0x15b7   :  { %3648 = vmatpush1.bf16.msra.mxu0 %v5560_v1 }
0x15b9   :  { %3605 = vmatpush1.bf16.msra.mxu1 %v5557_v27 }
0x166d   :  { %v5033_v49 = vpop.f32.mrb[40].mxu0 }
0x166e   :  { %v5034_v62 = vpop.f32.mrb[41].mxu0 }
0x166f   :  { %v5035_v39 = vadd.f32 %v5034_v62, %v5033_v49  ;;  %v5036_v60 = vpop.f32.mrb[42].mxu0 }
0x1670   :  { %v5037_v48 = vpop.f32.mrb[43].mxu0 }
0x1671   :  { %v3323_v20 = vadd.f32 %v5035_v39, %v4796_v33  ;;  %v5038_v51 = vadd.f32 %v5037_v48, %v5036_v60  ;;  %v4815_v60 = vld [vmem:[#allocation10 + $0x1] ss:$0 sm:$0xff] }
0x1673   :  { %v3326_v9 = vadd.f32 %v5038_v51, %v4796_v33  ;;  %v3329_v36 = vadd.f32 %v3323_v20, %v6698_v53 }
0x1675   :  { %3335 = vadd.xlane.f32.xlu0 %v3329_v36  ;;  %v3330_v55 = vadd.f32 %v3326_v9, %v6700_v7 }
0x1677   :  { %3337 = vadd.xlane.f32.xlu1 %v3330_v55 }
0x1702   :  { %v3336_v53 = vpop.xlane.xlu0 %3335 }
0x1703   :  { %v3339_v10 = vmul.f32 0.0078125, %v3336_v53  ;;  %v5573_v53 = vld [vmem:[#allocation9 + $0x110] sm:$0xff]  }
0x1704   :  { %v3338_v7 = vpop.xlane.xlu1 %3337 }
0x1705   :  { %v6832_v0 = vsub.f32 %v3329_v36, %v3339_v10  ;;  %v3340_v19 = vmul.f32 0.0078125, %v3338_v7  ;;  %v5563_v36 = vld [vmem:[#allocation9 + $0x140] sm:$0xff]   ;;  %v5574_v10 = vld [vmem:[#allocation9 + $0x190] sm:$0xff]   ;;  %v5575_v7 = vld [vmem:[#allocation9 + $0x158] sm:$0xff]  }
0x1706   :  { %5039 = vmatprep.subr.bf16.mxu1 %v5563_v36 }
0x1707   :  { %v6834_v44 = vsub.f32 %v3330_v55, %v3340_v19  ;;  %v3343_v2 = vmul.f32 %v6832_v0, %v6832_v0  ;;  %v5564_v55 = vld [vmem:[#allocation9 + $0x1c0] sm:$0xff]   ;;  %v5577_v19 = vld [vmem:[#allocation9 + $0x118] sm:$0xff]  }
0x1708   :  { %5061 = vmatprep.subr.bf16.mxu0 %v5564_v55 }
0x1709   :  { %3345 = vadd.xlane.f32.xlu0 %v3343_v2  ;;  %v3344_v17 = vmul.f32 %v6834_v44, %v6834_v44  ;;  %v5579_v2 = vld [vmem:[#allocation9 + $0x160] sm:$0xff]  }
0x170b   :  { %3347 = vadd.xlane.f32.xlu1 %v3344_v17  ;;  %v5580_v17 = vld [vmem:[#allocation9 + $0x1e0] sm:$0xff]  }
0x1796   :  { %v3346_v52 = vpop.xlane.xlu0 %3345 }
0x1797   :  { %v3349_v50 = vmul.f32 0.0078125, %v3346_v52 }
0x1798   :  { %v3348_v46 = vpop.xlane.xlu1 %3347 }
0x1799   :  { %v3351_v45 = vadd.f32 1e-12, %v3349_v50  ;;  %v3350_v40 = vmul.f32 0.0078125, %v3348_v46 }
0x179b   :  { %5687 = vrsqrt.f32 %v3351_v45  ;;  %v3352_v59 = vadd.f32 1e-12, %v3350_v40 }
0x179d   :  { %5689 = vrsqrt.f32 %v3352_v59 }
0x17a5   :  { %v5688_v56 = vpop.eup %5687 }
0x17a6   :  { %v3355_v49 = vmul.f32 %v5688_v56, %v6832_v0  ;;  %v5576_v0 = vld [vmem:[#allocation9 + $0x1d8] sm:$0xff]  }
0x17a7   :  { %v5690_v33 = vpop.eup %5689 }
0x17a8   :  { %v3356_v62 = vmul.f32 %v5690_v33, %v6834_v44  ;;  %v3363_v39 = vmul.f32 %v4814_v47, %v3355_v49  ;;  %v5578_v44 = vld [vmem:[#allocation9 + $0x198] sm:$0xff]  }
0x17aa   :  { %v3364_v48 = vmul.f32 %v4814_v47, %v3356_v62  ;;  %v6845_v20 = vadd.f32 %v4815_v60, %v3363_v39 }
0x17ac   :  { %v6847_v51 = vadd.f32 %v4815_v60, %v3364_v48 }
0x17ae   :  { %v3408_v9 = vpack.c.bf16 %v6847_v51, %v6845_v20 }
0x17b0   :  { %3623 = vmatmul.mubr.bf16.vlgmr.msra.gmra.mrb[68].mxu1 %v3408_v9  ;;  %3666 = vmatmul.mubr.bf16.vlgmr.msra.gmra.mrb[44].mxu0 %v3408_v9 }
0x17b1   :  { %5040 = vmatpush3.bf16.msra.mxu1 %v5565_v57  ;;  %5062 = vmatpush3.bf16.msra.mxu0 %v5566_v42 }
0x17b2   :  { %5041 = vmatprep.subr.bf16.mxu1 %v5567_v15  ;;  %5063 = vmatprep.subr.bf16.mxu0 %v5568_v61 }
0x17b5   :  { %5042 = vmatpush3.bf16.msra.mxu1 %v5569_v28  ;;  %5064 = vmatpush3.bf16.msra.mxu0 %v5570_v22 }
0x17b6   :  { %5043 = vmatprep.subr.bf16.mxu1 %v5571_v54  ;;  %5065 = vmatprep.subr.bf16.mxu0 %v5572_v5 }
0x17b9   :  { %5044 = vmatpush3.bf16.msra.mxu1 %v5573_v53  ;;  %5066 = vmatpush3.bf16.msra.mxu0 %v5574_v10 }
0x17ba   :  { %5045 = vmatprep.subr.bf16.mxu1 %v5575_v7  ;;  %5067 = vmatprep.subr.bf16.mxu0 %v5576_v0 }
0x17bd   :  { %5046 = vmatpush3.bf16.msra.mxu1 %v5577_v19  ;;  %5068 = vmatpush3.bf16.msra.mxu0 %v5578_v44 }
0x17be   :  { %5047 = vmatprep.subr.bf16.mxu1 %v5579_v2  ;;  %5069 = vmatprep.subr.bf16.mxu0 %v5580_v17 }
0x17c1   :  { %5048 = vmatpush3.bf16.msra.mxu1 %v5581_v3  ;;  %5070 = vmatpush3.bf16.msra.mxu0 %v5582_v37 }
0x17c2   :  { %5049 = vmatprep.subr.bf16.mxu1 %v5583_v35  ;;  %5071 = vmatprep.subr.bf16.mxu0 %v5584_v32 }
0x17c5   :  { %5050 = vmatpush3.bf16.msra.mxu1 %v5585_v13  ;;  %5072 = vmatpush3.bf16.msra.mxu0 %v5586_v12 }
0x17c6   :  { %5051 = vmatprep.subr.bf16.mxu1 %v5587_v58  ;;  %5073 = vmatprep.subr.bf16.mxu0 %v5588_v63 }
0x17c9   :  { %5052 = vmatpush3.bf16.msra.mxu1 %v5589_v4  ;;  %5074 = vmatpush3.bf16.msra.mxu0 %v5590_v16 }
0x17ca   :  { %5053 = vmatprep.subr.bf16.mxu1 %v5591_v43  ;;  %5075 = vmatprep.subr.bf16.mxu0 %v5592_v30 }
0x17cd   :  { %5054 = vmatpush3.bf16.msra.mxu1 %v5593_v6  ;;  %5076 = vmatpush3.bf16.msra.mxu0 %v5594_v25 }
0x17ce   :  { %5197 = vmatprep.subr.bf16.mxu1 %v6027_v18  ;;  %5217 = vmatprep.subr.bf16.mxu0 %v6027_v18 }
0x1883   :  { %v3624_v31 = vpop.f32.mrb[68].mxu1  ;;  %v3667_v38 = vpop.f32.mrb[44].mxu0 }
0x1884   :  { %v6860_v41 = vadd.f32 %v3624_v31, %v3413_v8  ;;  %v6862_v27 = vadd.f32 %v3667_v38, %v3421_v11  ;;  %v3626_v1 = vpop.f32.mrb[69].mxu1  ;;  %v3669_v52 = vpop.f32.mrb[45].mxu0 }
0x1885   :  { %v6864_v50 = vadd.f32 %v3626_v1, %v3417_v34  ;;  %v6866_v46 = vadd.f32 %v3669_v52, %v3425_v14  ;;  %v3628_v45 = vpop.f32.mrb[70].mxu1  ;;  %v3671_v23 = vpop.f32.mrb[46].mxu0 }
0x1886   :  { %v6869_v24 = vmul.f32 0.70710677, %v6860_v41  ;;  %v6872_v21 = vmul.f32 0.70710677, %v6862_v27  ;;  %v3630_v36 = vpop.f32.mrb[71].mxu1  ;;  %v3673_v55 = vpop.f32.mrb[47].mxu0  ;;  %v6884_v42 = vadd.f32 %v3628_v45, %v3413_v8  ;;  %v6886_v15 = vadd.f32 %v3671_v23, %v3421_v11 }
0x1887   :  { %v6875_v26 = vmul.f32 0.70710677, %v6864_v50  ;;  %v6878_v40 = vmul.f32 0.70710677, %v6866_v46  ;;  %v6891_v22 = vadd.f32 %v3630_v36, %v3417_v34  ;;  %v6901_v19 = vadd.f32 %v3673_v55, %v3425_v14 }
0x1888   :  { %v3684_v59 = vand.u32 2147483647, %v6869_v24  ;;  %v3686_v56 = vand.u32 2147483647, %v6872_v21  ;;  %v6889_v28 = vmul.f32 0.70710677, %v6884_v42 }
0x1889   :  { %v3685_v47 = vand.u32 2147483647, %v6875_v26  ;;  %v3687_v49 = vand.u32 2147483647, %v6878_v40  ;;  %v6894_v54 = vmul.f32 0.70710677, %v6886_v15 }
0x188a   :  { %v3692_v33 = vmul.f32 0.3275911, %v3684_v59  ;;  %v3694_v62 = vmul.f32 0.3275911, %v3686_v56  ;;  %v3796_v5 = vsub.f32 0.0, %v3684_v59  ;;  %v3798_v7 = vsub.f32 0.0, %v3686_v56 }
0x188b   :  { %v3693_v39 = vmul.f32 0.3275911, %v3685_v47  ;;  %v3695_v9 = vmul.f32 0.3275911, %v3687_v49  ;;  %v3688_v53 = vand.u32 2147483647, %v6889_v28 }
0x188c   :  { %v3700_v60 = vadd.f32 1.0, %v3692_v33  ;;  %v3702_v48 = vadd.f32 1.0, %v3694_v62  ;;  %v6898_v10 = vmul.f32 0.70710677, %v6891_v22  ;;  %v3690_v0 = vand.u32 2147483647, %v6894_v54 }
0x188d   :  { %v3701_v57 = vadd.f32 1.0, %v3693_v39  ;;  %v3703_v61 = vadd.f32 1.0, %v3695_v9  ;;  %v3797_v44 = vsub.f32 0.0, %v3685_v47  ;;  %v3696_v2 = vmul.f32 0.3275911, %v3688_v53 }
0x188e   :  { %5691 = vrcp.f32 %v3700_v60  ;;  %v3689_v17 = vand.u32 2147483647, %v6898_v10  ;;  %v3799_v3 = vsub.f32 0.0, %v3687_v49  ;;  %v3698_v37 = vmul.f32 0.3275911, %v3690_v0 }
0x188f   :  { %5693 = vrcp.f32 %v3702_v48  ;;  %v3804_v35 = vmul.f32 %v3796_v5, %v3684_v59  ;;  %v3704_v32 = vadd.f32 1.0, %v3696_v2  ;;  %v3806_v12 = vmul.f32 %v3798_v7, %v3686_v56 }
0x1890   :  { %5695 = vrcp.f32 %v3701_v57  ;;  %v3697_v13 = vmul.f32 0.3275911, %v3689_v17  ;;  %v3706_v58 = vadd.f32 1.0, %v3698_v37  ;;  %v6905_v63 = vmul.f32 0.70710677, %v6901_v19 }
0x1891   :  { %5697 = vrcp.f32 %v3703_v61  ;;  %v3805_v16 = vmul.f32 %v3797_v44, %v3685_v47  ;;  %v3800_v43 = vsub.f32 0.0, %v3688_v53  ;;  %v3807_v29 = vmul.f32 %v3799_v3, %v3687_v49 }
0x1892   :  { %5699 = vrcp.f32 %v3704_v32  ;;  %v3705_v30 = vadd.f32 1.0, %v3697_v13  ;;  %v6913_v8 = vand.u32 2147483647, %v6905_v63  ;;  %v3812_v11 = vmul.f32 1.442695, %v3804_v35 }
0x1893   :  { %5701 = vrcp.f32 %v3706_v58  ;;  %v3802_v14 = vsub.f32 0.0, %v3690_v0  ;;  %v3816_v38 = vmul.f32 1.442695, %v3806_v12  ;;  %v3814_v23 = vmul.f32 1.442695, %v3805_v16 }
0x1894   :  { %v3699_v1 = vmul.f32 0.3275911, %v6913_v8  ;;  %v3808_v59 = vmul.f32 %v3800_v43, %v3688_v53  ;;  %5703 = vrcp.f32 %v3705_v30  ;;  %v3818_v49 = vmul.f32 1.442695, %v3807_v29 }
0x1895   :  { %5705 = vpow2.f32 %v3812_v11  ;;  %v3810_v60 = vmul.f32 %v3802_v14, %v3690_v0  ;;  %v3801_v48 = vsub.f32 0.0, %v3689_v17  ;;  %v3803_v43 = vsub.f32 0.0, %v6913_v8 }
0x1896   :  { %v3707_v33 = vadd.f32 1.0, %v3699_v1  ;;  %v3820_v61 = vmul.f32 1.442695, %v3808_v59  ;;  %vm3844_vm11 = vcmp.ge.f32.partialorder %v6869_v24, 0.0  ;;  %vm3846_vm12 = vcmp.ge.f32.partialorder %v6872_v21, 0.0 }
0x1897   :  { %v3824_v0 = vmul.f32 1.442695, %v3810_v60  ;;  %v3809_v3 = vmul.f32 %v3801_v48, %v3689_v17  ;;  %vm3845_vm13 = vcmp.ge.f32.partialorder %v6875_v26, 0.0  ;;  %vm3848_vm14 = vcmp.ge.f32.partialorder %v6889_v28, 0.0 }
0x1898   :  { %v6907_v4 = vpop.eup %5691  ;;  %5707 = vrcp.f32 %v3707_v33  ;;  %v3811_v33 = vmul.f32 %v3803_v43, %v6913_v8  ;;  %vm3850_vm15 = vcmp.ge.f32.partialorder %v6894_v54, 0.0  ;;  %vm3849_vm2 = vcmp.ge.f32.partialorder %v6898_v10, 0.0 }
0x1899   :  { %v6909_v6 = vpop.eup %5693  ;;  %v3724_v25 = vmul.f32 1.0614054, %v6907_v4  ;;  %5709 = vpow2.f32 %v3816_v38  ;;  %vm3847_vm3 = vcmp.ge.f32.partialorder %v6878_v40, 0.0  ;;  %vm3851_vm4 = vcmp.ge.f32.partialorder %v6905_v63, 0.0 }
0x189a   :  { %v3726_v34 = vmul.f32 1.0614054, %v6909_v6  ;;  %v6917_v52 = vpop.eup %5695  ;;  %5711 = vpow2.f32 %v3814_v23  ;;  %v3875_v40 = vmul.f32 0.5, %v6901_v19 }
0x189b   :  { %v4849_v31 = vadd.f32 -1.4531521, %v3724_v25  ;;  %v3725_v47 = vmul.f32 1.0614054, %v6917_v52  ;;  %v6921_v62 = vpop.eup %5697  ;;  %5713 = vpow2.f32 %v3818_v49 }
0x189c   :  { %v4851_v45 = vadd.f32 -1.4531521, %v3726_v34  ;;  %v3727_v55 = vmul.f32 1.0614054, %v6921_v62  ;;  %v6927_v44 = vpop.eup %5699  ;;  %5715 = vpow2.f32 %v3820_v61 }
0x189d   :  { %v3740_v56 = vmul.f32 %v6907_v4, %v4849_v31  ;;  %v4850_v36 = vadd.f32 -1.4531521, %v3725_v47  ;;  %v6930_v37 = vpop.eup %5701  ;;  %v3728_v12 = vmul.f32 1.0614054, %v6927_v44  ;;  %5717 = vpow2.f32 %v3824_v0 }
0x189e   :  { %v3742_v39 = vmul.f32 %v6909_v6, %v4851_v45  ;;  %v4852_v7 = vadd.f32 -1.4531521, %v3727_v55  ;;  %v3730_v16 = vmul.f32 1.0614054, %v6930_v37  ;;  %v6938_v11 = vpop.eup %5703  ;;  %v3822_v31 = vmul.f32 1.442695, %v3809_v3 }
0x189f   :  { %v3748_v9 = vadd.f32 1.4214138, %v3740_v56  ;;  %v3741_v53 = vmul.f32 %v6917_v52, %v4850_v36  ;;  %v4853_v17 = vadd.f32 -1.4531521, %v3728_v12  ;;  %v5706_v59 = vpop.eup %5705  ;;  %v3729_v49 = vmul.f32 1.0614054, %v6938_v11 }
0x18a0   :  { %v3750_v57 = vadd.f32 1.4214138, %v3742_v39  ;;  %v3743_v13 = vmul.f32 %v6921_v62, %v4852_v7  ;;  %v4855_v14 = vadd.f32 -1.4531521, %v3730_v16  ;;  %5719 = vpow2.f32 %v3822_v31 }
0x18a1   :  { %v3756_v5 = vmul.f32 %v6907_v4, %v3748_v9  ;;  %v3749_v32 = vadd.f32 1.4214138, %v3741_v53  ;;  %v3744_v23 = vmul.f32 %v6927_v44, %v4853_v17 }
0x18a2   :  { %v3758_v2 = vmul.f32 %v6909_v6, %v3750_v57  ;;  %v3751_v29 = vadd.f32 1.4214138, %v3743_v13  ;;  %v3746_v47 = vmul.f32 %v6930_v37, %v4855_v14  ;;  %v6946_v39 = vpop.eup %5707 }
0x18a3   :  { %v4857_v35 = vadd.f32 -0.28449672, %v3756_v5  ;;  %v3757_v25 = vmul.f32 %v6917_v52, %v3749_v32  ;;  %v3752_v36 = vadd.f32 1.4214138, %v3744_v23  ;;  %v5710_v55 = vpop.eup %5709  ;;  %v4854_v5 = vadd.f32 -1.4531521, %v3729_v49 }
0x18a4   :  { %v4859_v58 = vadd.f32 -0.28449672, %v3758_v2  ;;  %v3759_v45 = vmul.f32 %v6921_v62, %v3751_v29  ;;  %v3754_v61 = vadd.f32 1.4214138, %v3746_v47  ;;  %v3731_v53 = vmul.f32 1.0614054, %v6946_v39  ;;  %v5712_v7 = vpop.eup %5711 }
0x18a5   :  { %v3772_v30 = vmul.f32 %v6907_v4, %v4857_v35  ;;  %v4858_v1 = vadd.f32 -0.28449672, %v3757_v25  ;;  %v3760_v3 = vmul.f32 %v6927_v44, %v3752_v36  ;;  %v5714_v35 = vpop.eup %5713  ;;  %v3745_v13 = vmul.f32 %v6938_v11, %v4854_v5 }
0x18a6   :  { %v3774_v34 = vmul.f32 %v6909_v6, %v4859_v58  ;;  %v4860_v9 = vadd.f32 -0.28449672, %v3759_v45  ;;  %v3762_v32 = vmul.f32 %v6930_v37, %v3754_v61  ;;  %v4856_v12 = vadd.f32 -1.4531521, %v3731_v53  ;;  %v5716_v43 = vpop.eup %5715 }
0x18a7   :  { %v3780_v38 = vadd.f32 0.2548296, %v3772_v30  ;;  %v3773_v48 = vmul.f32 %v6917_v52, %v4858_v1  ;;  %v4861_v16 = vadd.f32 -0.28449672, %v3760_v3  ;;  %v3753_v25 = vadd.f32 1.4214138, %v3745_v13  ;;  %v5718_v1 = vpop.eup %5717 }
0x18a8   :  { %v3782_v56 = vadd.f32 0.2548296, %v3774_v34  ;;  %v3775_v8 = vmul.f32 %v6921_v62, %v4860_v9  ;;  %v4863_v30 = vadd.f32 -0.28449672, %v3762_v32  ;;  %v3747_v29 = vmul.f32 %v6946_v39, %v4856_v12 }
0x18a9   :  { %v3788_v60 = vmul.f32 %v6907_v4, %v3780_v38  ;;  %v3781_v0 = vadd.f32 0.2548296, %v3773_v48  ;;  %v3776_v14 = vmul.f32 %v6927_v44, %v4861_v16  ;;  %v3826_v38 = vmul.f32 1.442695, %v3811_v33 }
0x18aa   :  { %v3790_v57 = vmul.f32 %v6909_v6, %v3782_v56  ;;  %v3783_v58 = vadd.f32 0.2548296, %v3775_v8  ;;  %v3778_v23 = vmul.f32 %v6930_v37, %v4863_v30  ;;  %v3868_v49 = vmul.f32 0.5, %v6860_v41  ;;  %v5720_v8 = vpop.eup %5719 }
0x18ab   :  { %v3828_v2 = vmul.f32 %v5706_v59, %v3788_v60  ;;  %v3789_v6 = vmul.f32 %v6917_v52, %v3781_v0  ;;  %v3761_v59 = vmul.f32 %v6938_v11, %v3753_v25  ;;  %v3755_v52 = vadd.f32 1.4214138, %v3747_v29 }
0x18ac   :  { %v3830_v4 = vmul.f32 %v5710_v55, %v3790_v57  ;;  %v3791_v56 = vmul.f32 %v6921_v62, %v3783_v58  ;;  %v3784_v47 = vadd.f32 0.2548296, %v3776_v14  ;;  %v3786_v31 = vadd.f32 0.2548296, %v3778_v23 }
0x18ad   :  { %v3836_v17 = vsub.f32 1.0, %v3828_v2  ;;  %v3829_v45 = vmul.f32 %v5712_v7, %v3789_v6  ;;  %v4862_v60 = vadd.f32 -0.28449672, %v3761_v59  ;;  %5721 = vpow2.f32 %v3826_v38 }
0x18ae   :  { %v3838_v34 = vsub.f32 1.0, %v3830_v4  ;;  %v3792_v36 = vmul.f32 %v6927_v44, %v3784_v47  ;;  %v3794_v55 = vmul.f32 %v6930_v37, %v3786_v31  ;;  %v3763_v61 = vmul.f32 %v6946_v39, %v3755_v52 }
0x18af   :  { %v3852_v48 = vsub.f32 0.0, %v3836_v17  ;;  %v3837_v33 = vsub.f32 1.0, %v3829_v45  ;;  %v3777_v57 = vmul.f32 %v6938_v11, %v4862_v60  ;;  %v3870_v5 = vmul.f32 0.5, %v6862_v27 }
0x18b0   :  { %v3854_v9 = vsub.f32 0.0, %v3838_v34  ;;  %v3869_v62 = vmul.f32 0.5, %v6864_v50  ;;  %v3831_v53 = vmul.f32 %v5714_v35, %v3791_v56  ;;  %v3832_v41 = vmul.f32 %v5716_v43, %v3792_v36 }
0x18b1   :  { %v3834_v7 = vmul.f32 %v5718_v1, %v3794_v55  ;;  %v3785_v2 = vadd.f32 0.2548296, %v3777_v57  ;;  %v4864_v0 = vadd.f32 -0.28449672, %v3763_v61  ;;  %v3860_v44 = vsel %vm3844_vm11, %v3836_v17, %v3852_v48 }
0x18b2   :  { %v3840_v37 = vsub.f32 1.0, %v3832_v41  ;;  %v3862_v3 = vsel %vm3846_vm12, %v3838_v34, %v3854_v9  ;;  %v3853_v4 = vsub.f32 0.0, %v3837_v33  ;;  %v3839_v50 = vsub.f32 1.0, %v3831_v53 }
0x18b3   :  { %v3842_v32 = vsub.f32 1.0, %v3834_v7  ;;  %v3793_v27 = vmul.f32 %v6938_v11, %v3785_v2  ;;  %v3872_v13 = vmul.f32 0.5, %v6884_v42  ;;  %v3779_v24 = vmul.f32 %v6946_v39, %v4864_v0 }
0x18b4   :  { %v3856_v35 = vsub.f32 0.0, %v3840_v37  ;;  %v3876_v12 = vadd.f32 1.0, %v3860_v44  ;;  %v3878_v58 = vadd.f32 1.0, %v3862_v3  ;;  %v3861_v30 = vsel %vm3845_vm13, %v3837_v33, %v3853_v4 }
0x18b5   :  { %v3858_v6 = vsub.f32 0.0, %v3842_v32  ;;  %v3833_v21 = vmul.f32 %v5720_v8, %v3793_v27  ;;  %v3787_v43 = vadd.f32 0.2548296, %v3779_v24  ;;  %v3855_v42 = vsub.f32 0.0, %v3839_v50 }
0x18b6   :  { %v3864_v16 = vsel %vm3848_vm14, %v3840_v37, %v3856_v35  ;;  %v3874_v34 = vmul.f32 0.5, %v6886_v15  ;;  %v3884_v38 = vmul.f32 %v3876_v12, %v3868_v49  ;;  %v3886_v54 = vmul.f32 %v3878_v58, %v3870_v5 }
0x18b7   :  { %v3880_v11 = vadd.f32 1.0, %v3864_v16  ;;  %v3866_v25 = vsel %vm3850_vm15, %v3842_v32, %v3858_v6  ;;  %v3841_v29 = vsub.f32 1.0, %v3833_v21  ;;  %v5722_v17 = vpop.eup %5721  ;;  %v3795_v28 = vmul.f32 %v6946_v39, %v3787_v43 }
0x18b8   :  { %v3882_v14 = vadd.f32 1.0, %v3866_v25  ;;  %v3877_v23 = vadd.f32 1.0, %v3861_v30  ;;  %v3873_v47 = vmul.f32 0.5, %v6891_v22  ;;  %v3863_v31 = vsel %vm3847_vm3, %v3839_v50, %v3855_v42  ;;  %v5596_v25 = vld [vmem:[#allocation15 + $0x8] sm:$0xff]   ;;  %v5601_v42 = vld [vmem:[#allocation15 + $0x30] sm:$0xff]  }
0x18b9   :  { %v3888_v1 = vmul.f32 %v3880_v11, %v3872_v13  ;;  %v3857_v45 = vsub.f32 0.0, %v3841_v29  ;;  %v3835_v26 = vmul.f32 %v5722_v17, %v3795_v28  ;;  %v3879_v36 = vadd.f32 1.0, %v3863_v31  ;;  %v5595_v11 = vld [vmem:[#allocation15] sm:$0xff]   ;;  %v5600_v17 = vld [vmem:[#allocation15 + $0x28] sm:$0xff]  }
0x18ba   :  { %v3890_v59 = vmul.f32 %v3882_v14, %v3874_v34  ;;  %v3885_v39 = vmul.f32 %v3877_v23, %v3869_v62  ;;  %v3871_v55 = vmul.f32 0.5, %v6866_v46  ;;  %v4866_v46 = vld [vmem:[%s7027_s13 + $0x1] ss:$0 sm:$0xff]  ;;  %v5602_v34 = vld [vmem:[#allocation15 + $0x38] sm:$0xff]   ;;  %v5603_v14 = vld [vmem:[#allocation18] sm:$0xff]  }
0x18bb   :  { %v3959_v52 = vpack.c.bf16 %v3888_v1, %v3884_v38  ;;  %v3865_v56 = vsel %vm3849_vm2, %v3841_v29, %v3857_v45  ;;  %v3843_v48 = vsub.f32 1.0, %v3835_v26  ;;  %v5599_v29 = vld [vmem:[#allocation15 + $0x20] sm:$0xff]   ;;  %v5604_v28 = vld [vmem:[#allocation18 + $0x8] sm:$0xff]   ;;  %v5605_v38 = vld [vmem:[#allocation18 + $0x10] sm:$0xff]  }
0x18bc   :  { %v3961_v15 = vpack.c.bf16 %v3890_v59, %v3886_v54  ;;  %v3881_v60 = vadd.f32 1.0, %v3865_v56  ;;  %v3887_v61 = vmul.f32 %v3879_v36, %v3871_v55  ;;  %v5606_v1 = vld [vmem:[#allocation18 + $0x18] sm:$0xff]  }
0x18bd   :  { %v3859_v9 = vsub.f32 0.0, %v3843_v48 }
0x18be   :  { %v3889_v49 = vmul.f32 %v3881_v60, %v3873_v47  ;;  %v4899_v47 = vld [vmem:[#allocation12 + $0x1] ss:$0 sm:$0xff]  ;;  %v4900_v60 = vld [vmem:[#allocation13 + $0x1] ss:$0 sm:$0xff] }
0x18bf   :  { %v3867_v10 = vsel %vm3851_vm4, %v3843_v48, %v3859_v9 }
0x18c0   :  { %v3960_v33 = vpack.c.bf16 %v3889_v49, %v3885_v39  ;;  %v3883_v57 = vadd.f32 1.0, %v3867_v10 }
0x18c2   :  { %4193 = vmatprep.mubr.bf16.mxu1 %v3960_v33  ;;  %v3891_v22 = vmul.f32 %v3883_v57, %v3875_v40 }
0x18c3   :  { %4194 = vmatmul.mubr.bf16.vlgmr.msra.gmra.mrb[72].mxu1 %v3959_v52 }
0x18c4   :  { %5213 = vmatprep.mubr.msk.bf16.mxu1 %vm6028_vm0, %v6027_v18  ;;  %v3962_v5 = vpack.c.bf16 %v3891_v22, %v3887_v61  ;;  %5198 = vmatpush3.bf16.msra.mxu1 %v5595_v11 }
0x18c5   :  { %5199 = vmatprep.subr.bf16.mxu1 %v6027_v18 }
0x18c6   :  { %4234 = vmatprep.mubr.bf16.mxu0 %v3962_v5 }
0x18c7   :  { %4235 = vmatmul.mubr.bf16.vlgmr.msra.gmra.mrb[48].mxu0 %v3961_v15 }
0x18c8   :  { %5233 = vmatprep.mubr.msk.bf16.mxu0 %vm6028_vm0, %v6027_v18  ;;  %5200 = vmatpush3.bf16.msra.mxu1 %v5596_v25  ;;  %vm4303_vm0 = vcmask 1040384  }
0x18c9   :  { %5201 = vmatprep.subr.bf16.mxu1 %v6027_v18  ;;  %5218 = vmatpush3.bf16.msra.mxu0 %v5603_v14 }
0x18ca   :  { %5219 = vmatprep.subr.bf16.mxu0 %v6027_v18 }
0x18cd   :  { %5220 = vmatpush3.bf16.msra.mxu0 %v5604_v28 }
0x18ce   :  { %5221 = vmatprep.subr.bf16.mxu0 %v6027_v18 }
0x18d1   :  { %5222 = vmatpush3.bf16.msra.mxu0 %v5605_v38 }
0x18d2   :  { %5223 = vmatprep.subr.bf16.mxu0 %v6027_v18 }
0x18d5   :  { %5224 = vmatpush3.bf16.msra.mxu0 %v5606_v1 }
0x18d6   :  { %5225 = vmatprep.subr.bf16.mxu0 %v6027_v18 }
0x1996   :  { %v5055_v63 = vpop.f32.mrb[72].mxu1 }
0x1997   :  { %v5056_v62 = vpop.f32.mrb[73].mxu1 }
0x1998   :  { %v5057_v19 = vadd.f32 %v5056_v62, %v5055_v63  ;;  %v5058_v53 = vpop.f32.mrb[74].mxu1 }
0x1999   :  { %v5059_v41 = vpop.f32.mrb[75].mxu1 }
0x199a   :  { %v5060_v7 = vadd.f32 %v5059_v41, %v5058_v53  ;;  %v5077_v2 = vpop.f32.mrb[48].mxu0  ;;  %v4196_v0 = vadd.f32 %v5057_v19, %v4866_v46 }
0x199b   :  { %v5078_v44 = vpop.f32.mrb[49].mxu0 }
0x199c   :  { %v5079_v37 = vadd.f32 %v5078_v44, %v5077_v2  ;;  %v5080_v8 = vpop.f32.mrb[50].mxu0  ;;  %v4199_v3 = vadd.f32 %v5060_v7, %v4866_v46  ;;  %v5607_v2 = vld [vmem:[#allocation18 + $0x20] sm:$0xff]   ;;  %v5609_v44 = vld [vmem:[#allocation18 + $0x30] sm:$0xff]  }
0x199d   :  { %v5081_v4 = vpop.f32.mrb[51].mxu0  ;;  %5226 = vmatpush3.bf16.msra.mxu0 %v5607_v2 }
0x199e   :  { %v4237_v32 = vadd.f32 %v5079_v37, %v4196_v0  ;;  %v5082_v27 = vadd.f32 %v5081_v4, %v5080_v8  ;;  %5227 = vmatprep.subr.bf16.mxu0 %v6027_v18  ;;  %v5608_v0 = vld [vmem:[#allocation18 + $0x28] sm:$0xff]   ;;  %v5610_v37 = vld [vmem:[#allocation18 + $0x38] sm:$0xff]  }
0x199f   :  { %v4901_v8 = vld [vmem:[#allocation16] ss:$0 sm:$0xff] }
0x19a0   :  { %v4240_v50 = vadd.f32 %v5082_v27, %v4199_v3  ;;  %v4243_v35 = vadd.f32 %v4237_v32, %v6845_v20  ;;  %v5597_v20 = vld [vmem:[#allocation15 + $0x10] sm:$0xff]  }
0x19a1   :  { %5202 = vmatpush3.bf16.msra.mxu1 %v5597_v20  ;;  %5228 = vmatpush3.bf16.msra.mxu0 %v5608_v0 }
0x19a2   :  { %4249 = vadd.xlane.f32.xlu1 %v4243_v35  ;;  %v4244_v13 = vadd.f32 %v4240_v50, %v6847_v51  ;;  %5203 = vmatprep.subr.bf16.mxu1 %v6027_v18  ;;  %v5598_v51 = vld [vmem:[#allocation15 + $0x18] sm:$0xff]  }
0x19a3   :  { %5229 = vmatprep.subr.bf16.mxu0 %v6027_v18 }
0x19a4   :  { %4251 = vadd.xlane.f32.xlu0 %v4244_v13 }
0x19a5   :  { %5204 = vmatpush3.bf16.msra.mxu1 %v5598_v51  ;;  %5230 = vmatpush3.bf16.msra.mxu0 %v5609_v44 }
0x19a6   :  { %5205 = vmatprep.subr.bf16.mxu1 %v6027_v18  ;;  %5231 = vmatprep.subr.bf16.mxu0 %v6027_v18 }
0x19a9   :  { %5206 = vmatpush3.bf16.msra.mxu1 %v5599_v29  ;;  %5232 = vmatpush3.bf16.msra.mxu0 %v5610_v37 }
0x19aa   :  { %5207 = vmatprep.subr.bf16.mxu1 %v6027_v18 }
0x19ad   :  { %5208 = vmatpush3.bf16.msra.mxu1 %v5600_v17 }
0x19ae   :  { %5209 = vmatprep.subr.bf16.mxu1 %v6027_v18 }
0x19b1   :  { %5210 = vmatpush3.bf16.msra.mxu1 %v5601_v42 }
0x19b2   :  { %5211 = vmatprep.subr.bf16.mxu1 %v6027_v18 }
0x19b5   :  { %5212 = vmatpush3.bf16.msra.mxu1 %v5602_v34 }
0x1a2f   :  { %v4250_v24 = vpop.xlane.xlu1 %4249 }
0x1a30   :  { %v4253_v12 = vmul.f32 0.0078125, %v4250_v24  ;;  %v4910_v24 = vld [vmem:[#allocation19] ss:$0 sm:$0xff] }
0x1a31   :  { %v4252_v6 = vpop.xlane.xlu0 %4251 }
0x1a32   :  { %v4255_v21 = vsub.f32 %v4243_v35, %v4253_v12  ;;  %v4254_v58 = vmul.f32 0.0078125, %v4252_v6 }
0x1a34   :  { %v4256_v16 = vsub.f32 %v4244_v13, %v4254_v58  ;;  %v4257_v43 = vmul.f32 %v4255_v21, %v4255_v21 }
0x1a36   :  { %4259 = vadd.xlane.f32.xlu1 %v4257_v43  ;;  %v4258_v30 = vmul.f32 %v4256_v16, %v4256_v16 }
0x1a38   :  { %4261 = vadd.xlane.f32.xlu0 %v4258_v30 }
0x1ac3   :  { %v4260_v45 = vpop.xlane.xlu1 %4259 }
0x1ac4   :  { %v4263_v54 = vmul.f32 0.0078125, %v4260_v45 }
0x1ac5   :  { %v4262_v23 = vpop.xlane.xlu0 %4261 }
0x1ac6   :  { %v4265_v59 = vadd.f32 1e-12, %v4263_v54  ;;  %v4264_v26 = vmul.f32 0.0078125, %v4262_v23 }
0x1ac8   :  { %5723 = vrsqrt.f32 %v4265_v59  ;;  %v4266_v52 = vadd.f32 1e-12, %v4264_v26 }
0x1aca   :  { %5725 = vrsqrt.f32 %v4266_v52 }
0x1ad2   :  { %v5724_v56 = vpop.eup %5723 }
0x1ad3   :  { %v4269_v31 = vmul.f32 %v5724_v56, %v4255_v21 }
0x1ad4   :  { %v5726_v15 = vpop.eup %5725 }
0x1ad5   :  { %v4277_v48 = vmul.f32 %v4899_v47, %v4269_v31  ;;  %v4270_v39 = vmul.f32 %v5726_v15, %v4256_v16 }
0x1ad7   :  { %v4278_v49 = vmul.f32 %v4899_v47, %v4270_v39  ;;  %v4285_v9 = vadd.f32 %v4900_v60, %v4277_v48 }
0x1ad9   :  { %v4286_v36 = vadd.f32 %v4900_v60, %v4278_v49  ;;  %v4291_v33 = vrot.slane %v4285_v9, 6  ;;  %v4293_v40 = vrot.slane %v4285_v9, 5  ;;  %v4295_v57 = vrot.slane %v4285_v9, 4 }
0x1ada   :  { %v4297_v22 = vrot.slane %v4285_v9, 3  ;;  %v4299_v63 = vrot.slane %v4285_v9, 2  ;;  %v4301_v46 = vrot.slane %v4285_v9, 1 }
0x1adb   :  { %v4288_v10 = vrot.slane %v4286_v36, 7 }
0x1add   :  { %v4304_v55 = vsel %vm4303_vm0, %v4285_v9, %v4288_v10 }
0x1ade   :  { %v4306_v61 = vsel %vm4305_vm5, %v4304_v55, %v4291_v33 }
0x1adf   :  { %v4308_v5 = vsel %vm4307_vm6, %v4306_v61, %v4293_v40 }
0x1ae0   :  { %v4309_v62 = vsel %vm807_vm1, %v4308_v5, %v4295_v57 }
0x1ae1   :  { %v4311_v19 = vsel %vm4310_vm7, %v4309_v62, %v4297_v22 }
0x1ae2   :  { %v4313_v53 = vsel %vm4312_vm8, %v4311_v19, %v4299_v63 }
0x1ae3   :  { %v4315_v41 = vsel %vm4314_vm9, %v4313_v53, %v4301_v46 }
0x1ae4   :  { %v4333_v7 = vpack.c.bf16 %v4315_v41, %v4315_v41 }
0x1ae6   :  { %5214 = vmatmul.mubr.bf16.vlgmr.msra.gmra.mrb[76].mxu1 %v4333_v7 }
0x1bb9   :  { %v4422_v3 = vpop.f32.mrb[76].mxu1 }
0x1bba   :  { %v4423_v4 = vadd.f32 %v4901_v8, %v4422_v3  ;;  %v5215_v32 = vpop.f32.mrb[77].mxu1 }
0x1bbb   :  { %v4425_v27 = vpop.f32.mrb[78].mxu1 }
0x1bbc   :  { %5727 = vtanh.f32 %v4423_v4  ;;  %v5216_v50 = vpop.f32.mrb[79].mxu1 }
0x1bc6   :  { %v5728_v35 = vpop.eup %5727 }
0x1bc7   :  { %v4446_v13 = vpack.c.bf16 %v5728_v35, %v5728_v35 }
0x1bc9   :  { %5234 = vmatmul.mubr.bf16.vlgmr.msra.gmra.mrb[52].mxu0 %v4446_v13 }
0x1c9c   :  { %v4535_v12 = vpop.f32.mrb[52].mxu0 }
0x1c9d   :  { %v4536_v6 = vadd.f32 %v4910_v24, %v4535_v12  ;;  %v5235_v21 = vpop.f32.mrb[53].mxu0 }
0x1c9e   :  { %v4538_v58 = vpop.f32.mrb[54].mxu0 }
0x1c9f   :  { %4541 = vst [vmem:[%s7056_s5] sm:$0xff] %v4536_v6  ;;  %v5236_v18 = vpop.f32.mrb[55].mxu0 }
0x1ca0   :  { %4546 = vsyncpa [#allocation3], 1 }
0x1ca1   :  { %4547 = vsyncpa [#allocation5], 1 }
0x1ca2   :  { %4548 = vsyncpa [#allocation8], 1 }
0x1ca3   :  { %4549 = vsyncpa [#allocation11], 1 }
0x1ca4   :  { %4550 = vsyncpa [#allocation14], 1 }
0x1ca5   :  { %4551 = vsyncpa [#allocation17], 1 }
0x1ca6   :  { %4552 = vsyncpa [#allocation20], 1 }

</bundles_post_ra>
